<compile_context>
chip_gen: v7x
topology: tpu7x:2x2x1
jax: 0.10.0
libtpu: 0.0.40
codegen_flags: <defaults>
</compile_context>

<pallas_src>
import numpy as np
import jax
import jax.numpy as jnp
from jax.experimental import pallas as pl
from jax.experimental.pallas import tpu as pltpu


# ----------------------------------------------------------------------------
# Pallas kernels
# ----------------------------------------------------------------------------
def _conv1_pool_bn_relu_kernel(a_ref, b_ref, scale_ref, shift_ref, o_ref):
    """Fused conv1(3x3, Cin=1, pad=1) + MaxPool2d(2) + BN affine + ReLU.

    a_ref  : (tm, 256)  bf16  row-pair windows
             lanes   0..101 : padded rows 2r, 2r+1, 2r+2  (conv row 2r)
             lanes 128..229 : padded rows 2r+1, 2r+2, 2r+3 (conv row 2r+1)
    b_ref  : (128, 1024) bf16 conv taps; column = dw*512 + wo*32 + c
    scale  : (1, 512) f32  BN scale, tiled over wo
    shift  : (1, 512) f32  BN shift (+ conv bias folded), tiled over wo
    o_ref  : (tm, 512) bf16 pooled output; lane = wo*32 + c
    """
    a = a_ref[...]
    a_e = a[:, 0:128]          # window for conv row 2r   (tile-aligned slice)
    a_o = a[:, 128:256]        # window for conv row 2r+1
    b0 = b_ref[:, 0:512]       # output columns for w = 2*wo
    b1 = b_ref[:, 512:1024]    # output columns for w = 2*wo + 1
    # Vertical pool max, per dw half (bounds live vregs to < 64).
    v0 = jnp.maximum(jnp.dot(a_e, b0, preferred_element_type=jnp.float32),
                     jnp.dot(a_o, b0, preferred_element_type=jnp.float32))
    v1 = jnp.maximum(jnp.dot(a_e, b1, preferred_element_type=jnp.float32),
                     jnp.dot(a_o, b1, preferred_element_type=jnp.float32))
    h = jnp.maximum(v0, v1)    # horizontal pool max — contiguous halves
    o_ref[...] = jnp.maximum(h * scale_ref[...] + shift_ref[...], 0.0
                             ).astype(o_ref.dtype)


def _matmul_kernel(a_ref, b_ref, o_ref):
    # bf16 x bf16 -> f32 accumulation -> bf16 store (conv bias folded into BN shift).
    o_ref[...] = jnp.dot(a_ref[...], b_ref[...],
                         preferred_element_type=jnp.float32).astype(o_ref.dtype)


def _make_pool_bn_relu_kernel(Wo, C):
    """MaxPool2d(2) + BN affine (conv bias folded) + ReLU on a lane-dense view.

    Input row r holds two conv rows concatenated along lanes:
      [ conv row 2r : W*C lanes | conv row 2r+1 : W*C lanes ]
    """
    L = Wo * 2 * C  # lanes per single conv row (W*C)

    def kernel(x_ref, scale_ref, shift_ref, o_ref):
        # f32 in-kernel compute (v5e has no bf16 VALU path); bf16 at boundaries.
        xl = x_ref[:, :L].astype(jnp.float32)
        xr = x_ref[:, L:].astype(jnp.float32)
        v = jnp.maximum(xl, xr)                               # vertical max
        if Wo == 1:
            h = jnp.maximum(v[:, :C], v[:, C:])               # horizontal max
        else:
            h = jnp.concatenate(
                [jnp.maximum(v[:, (2 * w) * C:(2 * w + 1) * C],
                             v[:, (2 * w + 1) * C:(2 * w + 2) * C])
                 for w in range(Wo)], axis=1)
        # Single full-width affine + ReLU with pre-tiled (1, Wo*C) scale/shift.
        o_ref[...] = jnp.maximum(h * scale_ref[...] + shift_ref[...], 0.0
                                 ).astype(o_ref.dtype)

    return kernel


def _dense_head_kernel(x_ref, *refs):
    # refs = (w1, b1, [w2, b2, ...], o_ref); whole Linear chain stays in VMEM.
    o_ref = refs[-1]
    h = x_ref[...].astype(jnp.float32)
    for i in range(0, len(refs) - 1, 2):
        h = jnp.dot(h, refs[i][...], preferred_element_type=jnp.float32) + refs[i + 1][...]
    o_ref[...] = h


# ----------------------------------------------------------------------------
# pallas_call wrappers
# ----------------------------------------------------------------------------
def _pick_tm(M, max_tm=256):
    """Largest multiple-of-8 tile <= max_tm that divides M (else the full M)."""
    if M <= max_tm or M % 8 != 0:
        return M
    t = max_tm - (max_tm % 8)
    while t >= 8:
        if M % t == 0:
            return t
        t -= 8
    return M


def conv1_pool_bn_relu(x_2d, b_mat, scale_t, shift_t):
    """Fused stage 1. x_2d: (N, 160, 32) single-channel -> (N, 80, 16, 32) bf16."""
    N, H, W = x_2d.shape
    Ho, Wo, Cout = H // 2, W // 2, 32
    a = _build_conv1_windows(x_2d.astype(jnp.bfloat16))      # (N*Ho, 256) bf16
    R = N * Ho
    tm = _pick_tm(R, max_tm=32)                              # grid of 5 for N=2
    out = pl.pallas_call(
        _conv1_pool_bn_relu_kernel,
        out_shape=jax.ShapeDtypeStruct((R, Wo * Cout), jnp.bfloat16),
        grid=(R // tm,),
        in_specs=[
            pl.BlockSpec((tm, 256), lambda i: (i, 0)),
            pl.BlockSpec((128, 1024), lambda i: (0, 0)),
            pl.BlockSpec((1, Wo * Cout), lambda i: (0, 0)),
            pl.BlockSpec((1, Wo * Cout), lambda i: (0, 0)),
        ],
        out_specs=pl.BlockSpec((tm, Wo * Cout), lambda i: (i, 0)),
        compiler_params=pltpu.CompilerParams(dimension_semantics=("parallel",)),
    )(a, b_mat, scale_t, shift_t)
    return out.reshape(N, Ho, Wo, Cout)


def matmul(a, b):
    """a: (M, K) bf16, b: (K, N) bf16 -> (M, N) bf16 (f32 accumulation)."""
    M, K = a.shape
    Nc = b.shape[1]
    tm = _pick_tm(M)
    return pl.pallas_call(
        _matmul_kernel,
        out_shape=jax.ShapeDtypeStruct((M, Nc), jnp.bfloat16),
        grid=(M // tm,),
        in_specs=[pl.BlockSpec((tm, K), lambda i: (i, 0)),
                  pl.BlockSpec((K, Nc), lambda i: (0, 0))],
        out_specs=pl.BlockSpec((tm, Nc), lambda i: (i, 0)),
        compiler_params=pltpu.CompilerParams(dimension_semantics=("parallel",)),
    )(a.astype(jnp.bfloat16), b)


def pool_bn_relu(x_nhwc, scale_t, shift_t):
    """MaxPool2d(2) -> BN affine (conv bias folded) -> ReLU. bf16 in/out."""
    N, H, W, C = x_nhwc.shape
    Ho, Wo = H // 2, W // 2
    if H != 2 * Ho or W != 2 * Wo:
        # PyTorch MaxPool2d(2) floors: drop trailing odd row/col (tiny stages).
        x_nhwc = x_nhwc[:, :2 * Ho, :2 * Wo, :]
    R = N * Ho
    lanes_in = 2 * Wo * 2 * C                       # two conv rows per pooled row
    x2 = x_nhwc.reshape(R, lanes_in)                # free contiguous reshape
    out = pl.pallas_call(
        _make_pool_bn_relu_kernel(Wo, C),
        out_shape=jax.ShapeDtypeStruct((R, Wo * C), jnp.bfloat16),
        grid=(1,),
        in_specs=[
            pl.BlockSpec((R, lanes_in), lambda i: (0, 0)),
            pl.BlockSpec((1, Wo * C), lambda i: (0, 0)),
            pl.BlockSpec((1, Wo * C), lambda i: (0, 0)),
        ],
        out_specs=pl.BlockSpec((R, Wo * C), lambda i: (0, 0)),
    )(x2, scale_t, shift_t)
    return out.reshape(N, Ho, Wo, C)


def dense_head(x, layers):
    """Fused Linear chain (whole chain resident in VMEM, one launch)."""
    M = x.shape[0]
    args = [x]
    for w, b in layers:
        args.append(w)
        args.append(b)
    out_dim = layers[-1][0].shape[1]
    return pl.pallas_call(
        _dense_head_kernel,
        out_shape=jax.ShapeDtypeStruct((M, out_dim), jnp.float32),
    )(*args)


# ----------------------------------------------------------------------------
# Glue: conv1 window construction + im2col for the 4x4 convs (XLA side, tiny)
# ----------------------------------------------------------------------------
def _build_conv1_windows(x_2d):
    """(N, 160, 32) -> (N*80, 256) row-pair windows for the fused conv1 kernel."""
    N, H, W = x_2d.shape
    Ho = H // 2
    xp = jnp.pad(x_2d, ((0, 0), (1, 1), (1, 1)))                     # (N, 162, 34)
    s0 = xp[:, 0:2 * Ho:2]                                           # padded row 2r
    s1 = xp[:, 1:2 * Ho + 1:2]                                       # 2r+1
    s2 = xp[:, 2:2 * Ho + 2:2]                                       # 2r+2
    s3 = xp[:, 3:2 * Ho + 3:2]                                       # 2r+3
    z = jnp.zeros(s0.shape[:2] + (26,), xp.dtype)                    # pad 102 -> 128
    a = jnp.concatenate([s0, s1, s2, z, s1, s2, s3, z], axis=-1)     # (N, Ho, 256)
    return a.reshape(N * Ho, 256)


def _im2col(x_nhwc, kh, kw, stride, pad):
    N, H, W, C = x_nhwc.shape
    xp = jnp.pad(x_nhwc, ((0, 0), (pad, pad), (pad, pad), (0, 0)))
    Hp, Wp = H + 2 * pad, W + 2 * pad
    Ho = (Hp - kh) // stride + 1
    Wo = (Wp - kw) // stride + 1
    patches = []
    for i in range(kh):
        for j in range(kw):
            patches.append(
                xp[:, i:i + stride * (Ho - 1) + 1:stride,
                      j:j + stride * (Wo - 1) + 1:stride, :])
    p = jnp.stack(patches, axis=3)                  # (N, Ho, Wo, kh*kw, C)
    return p.reshape(N * Ho * Wo, kh * kw * C), (N, Ho, Wo)


def conv2d_gemm(x_nhwc, wm, *, kh, kw, stride, pad):
    """kxk conv via XLA im2col + Pallas GEMM. wm pre-laid-out (kh*kw*Cin, Cout) bf16."""
    cols, (N, Ho, Wo) = _im2col(x_nhwc, kh, kw, stride, pad)
    y = matmul(cols, wm)
    return y.reshape(N, Ho, Wo, wm.shape[1])


def conv1x1(x_nhwc, wm, *, pad):
    """1x1 conv: no im2col — pad + reshape + GEMM. wm: (Cin, Cout) bf16."""
    N, H, W, C = x_nhwc.shape
    xp = jnp.pad(x_nhwc, ((0, 0), (pad, pad), (pad, pad), (0, 0)))
    Hp, Wp = H + 2 * pad, W + 2 * pad
    y = matmul(xp.reshape(N * Hp * Wp, C), wm)
    return y.reshape(N, Hp, Wp, wm.shape[1])


# ----------------------------------------------------------------------------
# Parameter init (synthetic, deterministic) with all layouts pre-baked
# ----------------------------------------------------------------------------
def _build_conv1_matrix(w_oihw):
    """(32, 1, 3, 3) PyTorch conv1 weight -> (128, 1024) bf16 GEMM matrix.

    Row = ki*34 + wp (zero-padded 102 -> 128); column = dw*512 + wo*32 + c,
    where the conv output position is w = 2*wo + dw.
    """
    kt = jnp.transpose(w_oihw[:, 0], (1, 2, 0))              # (ki, kj, c)
    sel = np.zeros((34, 2, 16, 3), np.float32)               # sel[wp, dw, wo, kj]
    for dw in range(2):
        for wo in range(16):
            for kj in range(3):
                sel[2 * wo + dw + kj, dw, wo, kj] = 1.0
    b = jnp.einsum('pdok,ikc->ipdoc', jnp.asarray(sel), kt)  # (3, 34, 2, 16, 32)
    b = b.reshape(102, 1024)
    b = jnp.pad(b, ((0, 26), (0, 0)))                        # K -> 128
    return b.astype(jnp.bfloat16)


def init_params():
    key = jax.random.PRNGKey(0)
    ks = iter(jax.random.split(key, 64))

    def conv_w(cout, cin, kh, kw):
        w = jax.random.normal(next(ks), (cout, cin, kh, kw), jnp.float32) * 0.05
        b = jax.random.normal(next(ks), (cout,), jnp.float32) * 0.05
        return w, b

    def bn_affine(c):
        gamma = 1.0 + 0.1 * jax.random.normal(next(ks), (c,), jnp.float32)
        beta = 0.1 * jax.random.normal(next(ks), (c,), jnp.float32)
        mean = 0.1 * jax.random.normal(next(ks), (c,), jnp.float32)
        var = jax.random.uniform(next(ks), (c,), jnp.float32, 0.5, 1.5)
        scale = gamma / jnp.sqrt(var + 1e-5)
        shift = beta - mean * scale
        return scale, shift

    def lin_w(out_f, in_f):
        w = jax.random.normal(next(ks), (out_f, in_f), jnp.float32) * 0.05
        b = jax.random.normal(next(ks), (out_f,), jnp.float32) * 0.05
        return w, b

    p = {}

    # --- con1 (fused conv+pool+bn+relu) ---
    w1, b1 = conv_w(32, 1, 3, 3)
    s1, t1 = bn_affine(32)
    p['c1_B'] = _build_conv1_matrix(w1)
    p['c1_scale'] = jnp.tile(s1, 16).reshape(1, 512)
    p['c1_shift'] = jnp.tile(t1 + b1 * s1, 16).reshape(1, 512)   # conv bias folded

    # --- con2..con5: GEMM weight pre-layout + folded/tiled BN affine ---
    def conv_stage(cout, cin, kh, kw, wo_pool):
        w, b = conv_w(cout, cin, kh, kw)
        s, t = bn_affine(cout)
        wm = jnp.transpose(w, (2, 3, 1, 0)).reshape(kh * kw * cin, cout)
        scale_t = jnp.tile(s, wo_pool).reshape(1, wo_pool * cout)
        shift_t = jnp.tile(t + b * s, wo_pool).reshape(1, wo_pool * cout)
        return wm.astype(jnp.bfloat16), scale_t, shift_t

    p['c2_w'], p['c2_scale'], p['c2_shift'] = conv_stage(64, 32, 4, 4, 4)
    p['c3_w'], p['c3_scale'], p['c3_shift'] = conv_stage(64, 64, 4, 4, 1)
    p['c4_w'], p['c4_scale'], p['c4_shift'] = conv_stage(128, 64, 1, 1, 1)
    p['c5_w'], p['c5_scale'], p['c5_shift'] = conv_stage(256, 128, 1, 1, 1)

    # --- dense heads: (in, out) weights, NCHW-flatten row permutation baked in ---
    def dense_first(out_f, c, h, w):
        wt, bb = lin_w(out_f, c * h * w)
        # PyTorch flatten index = c*H*W + h*W + w; our NHWC reshape gives h*W*C + w*C + c.
        wr = wt.reshape(out_f, c, h, w).transpose(0, 2, 3, 1).reshape(out_f, -1).T
        return jnp.asarray(wr, jnp.float32), bb.reshape(1, out_f)

    def dense_rest(out_f, in_f):
        wt, bb = lin_w(out_f, in_f)
        return wt.T.astype(jnp.float32), bb.reshape(1, out_f)

    p['d1'] = [dense_first(10, 64, 5, 1), dense_rest(1, 10)]
    p['d2'] = [dense_first(10, 128, 3, 1), dense_rest(1, 10)]
    p['d3'] = [dense_first(50, 256, 2, 1), dense_rest(5, 50), dense_rest(1, 5)]
    return p


# ----------------------------------------------------------------------------
# Generator forward
# ----------------------------------------------------------------------------
@jax.jit
def generator_forward(x_nchw, p):
    N = x_nchw.shape[0]

    # con1 (Conv 3x3 pad=1 + MaxPool + BN + ReLU, fully fused)
    x = conv1_pool_bn_relu(x_nchw[:, 0], p['c1_B'], p['c1_scale'], p['c1_shift'])
    # con2
    x = conv2d_gemm(x, p['c2_w'], kh=4, kw=4, stride=2, pad=1)
    x = pool_bn_relu(x, p['c2_scale'], p['c2_shift'])            # (N, 20, 4, 64)
    # con3
    x = conv2d_gemm(x, p['c3_w'], kh=4, kw=4, stride=2, pad=1)
    x = pool_bn_relu(x, p['c3_scale'], p['c3_shift'])            # (N, 5, 1, 64)

    volfrac = dense_head(x.reshape(N, -1), p['d1'])              # (N, 320) flat, no transpose

    # con4 (1x1, pad=1)
    x = conv1x1(x, p['c4_w'], pad=1)
    x = pool_bn_relu(x, p['c4_scale'], p['c4_shift'])            # (N, 3, 1, 128)
    penal = dense_head(x.reshape(N, -1), p['d2'])                # (N, 384)

    # con5 (1x1, pad=1)
    x = conv1x1(x, p['c5_w'], pad=1)
    x = pool_bn_relu(x, p['c5_scale'], p['c5_shift'])            # (N, 2, 1, 256)
    rmin = dense_head(x.reshape(N, -1), p['d3'])                 # (N, 512)

    return volfrac, penal, rmin


if __name__ == "__main__":
    key = jax.random.PRNGKey(0)
    # Smallest input consistent with the dense fan-ins: NCHW (2, 1, 160, 32).
    x = jax.random.normal(key, (2, 1, 160, 32), jnp.float32)
    params = init_params()

    volfrac, penal, rmin = generator_forward(x, params)
    jax.block_until_ready((volfrac, penal, rmin))

    assert volfrac.shape == (2, 1)
    assert penal.shape == (2, 1)
    assert rmin.shape == (2, 1)
    print("KERNEL_OK")
</pallas_src>

<mosaic_0001>
module attributes {stable_mosaic.version = 11 : i64} {
  func.func @_conv1_pool_bn_relu_kernel(%arg0: i32, %arg1: memref<32x256xbf16, #tpu.memory_space<vmem>>, %arg2: memref<128x1024xbf16, #tpu.memory_space<vmem>>, %arg3: memref<1x512xf32, #tpu.memory_space<vmem>>, %arg4: memref<1x512xf32, #tpu.memory_space<vmem>>, %arg5: memref<32x512xbf16, #tpu.memory_space<vmem>>) attributes {dimension_semantics = [#tpu.dimension_semantics<parallel>], iteration_bounds = array<i64: 5>, scalar_prefetch = 0 : i64, scratch_operands = 0 : i64, tpu.core_type = #tpu.core_type<tc>, window_params = [{transform_indices = @transform_0, window_bounds = array<i64: 32, 256>}, {pipeline_mode = #tpu.pipeline_mode<synchronous>, transform_indices = @transform_1, window_bounds = array<i64: 128, 1024>}, {pipeline_mode = #tpu.pipeline_mode<synchronous>, transform_indices = @transform_2, window_bounds = array<i64: 1, 512>}, {pipeline_mode = #tpu.pipeline_mode<synchronous>, transform_indices = @transform_3, window_bounds = array<i64: 1, 512>}, {transform_indices = @transform_4, window_bounds = array<i64: 32, 512>}]} {
    %c0 = arith.constant 0 : index
    %c0_0 = arith.constant 0 : index
    %0 = vector.load %arg1[%c0, %c0_0] : memref<32x256xbf16, #tpu.memory_space<vmem>>, vector<32x256xbf16>
    %1 = vector.extract_strided_slice %0 {offsets = [0, 0], sizes = [32, 128], strides = [1, 1]} : vector<32x256xbf16> to vector<32x128xbf16>
    %2 = vector.extract_strided_slice %0 {offsets = [0, 128], sizes = [32, 128], strides = [1, 1]} : vector<32x256xbf16> to vector<32x128xbf16>
    %c0_1 = arith.constant 0 : index
    %c0_2 = arith.constant 0 : index
    %3 = vector.load %arg2[%c0_1, %c0_2] : memref<128x1024xbf16, #tpu.memory_space<vmem>>, vector<128x512xbf16>
    %c0_3 = arith.constant 0 : index
    %c512 = arith.constant 512 : index
    %4 = vector.load %arg2[%c0_3, %c512] : memref<128x1024xbf16, #tpu.memory_space<vmem>>, vector<128x512xbf16>
    %cst = arith.constant dense<0.000000e+00> : vector<32x512xf32>
    %5 = tpu.matmul %1, %3, %cst {dimension_numbers = #tpu.dot_dimension_numbers<[1], [0], [0], [1], [0, 0, 1, 1], [], []>} : vector<32x128xbf16>, vector<128x512xbf16>, vector<32x512xf32> -> vector<32x512xf32>
    %cst_4 = arith.constant dense<0.000000e+00> : vector<32x512xf32>
    %6 = tpu.matmul %2, %3, %cst_4 {dimension_numbers = #tpu.dot_dimension_numbers<[1], [0], [0], [1], [0, 0, 1, 1], [], []>} : vector<32x128xbf16>, vector<128x512xbf16>, vector<32x512xf32> -> vector<32x512xf32>
    %7 = arith.maximumf %5, %6 : vector<32x512xf32>
    %cst_5 = arith.constant dense<0.000000e+00> : vector<32x512xf32>
    %8 = tpu.matmul %1, %4, %cst_5 {dimension_numbers = #tpu.dot_dimension_numbers<[1], [0], [0], [1], [0, 0, 1, 1], [], []>} : vector<32x128xbf16>, vector<128x512xbf16>, vector<32x512xf32> -> vector<32x512xf32>
    %cst_6 = arith.constant dense<0.000000e+00> : vector<32x512xf32>
    %9 = tpu.matmul %2, %4, %cst_6 {dimension_numbers = #tpu.dot_dimension_numbers<[1], [0], [0], [1], [0, 0, 1, 1], [], []>} : vector<32x128xbf16>, vector<128x512xbf16>, vector<32x512xf32> -> vector<32x512xf32>
    %10 = arith.maximumf %8, %9 : vector<32x512xf32>
    %11 = arith.maximumf %7, %10 : vector<32x512xf32>
    %c0_7 = arith.constant 0 : index
    %c0_8 = arith.constant 0 : index
    %12 = vector.load %arg3[%c0_7, %c0_8] : memref<1x512xf32, #tpu.memory_space<vmem>>, vector<1x512xf32>
    %13 = vector.broadcast %12 : vector<1x512xf32> to vector<32x512xf32>
    %14 = arith.mulf %11, %13 : vector<32x512xf32>
    %c0_9 = arith.constant 0 : index
    %c0_10 = arith.constant 0 : index
    %15 = vector.load %arg4[%c0_9, %c0_10] : memref<1x512xf32, #tpu.memory_space<vmem>>, vector<1x512xf32>
    %16 = vector.broadcast %15 : vector<1x512xf32> to vector<32x512xf32>
    %17 = arith.addf %14, %16 : vector<32x512xf32>
    %cst_11 = arith.constant 0.000000e+00 : f32
    %18 = vector.broadcast %cst_11 : f32 to vector<32x512xf32>
    %19 = arith.maximumf %17, %18 : vector<32x512xf32>
    %20 = arith.truncf %19 : vector<32x512xf32> to vector<32x512xbf16>
    %c0_12 = arith.constant 0 : index
    %c0_13 = arith.constant 0 : index
    %21 = vector.load %arg5[%c0_12, %c0_13] : memref<32x512xbf16, #tpu.memory_space<vmem>>, vector<32x512xbf16>
    tpu.vector_store %arg5[%c0_12, %c0_13], %20 {strides = array<i32>} : memref<32x512xbf16, #tpu.memory_space<vmem>>, vector<32x512xbf16>,
    return
  }
  func.func @transform_0(%arg0: i32) -> (i32, i32) {
    %c0_i32 = arith.constant 0 : i32
    %c0_i32_0 = arith.constant 0 : i32
    return %arg0, %c0_i32 : i32, i32
  }
  func.func @transform_1(%arg0: i32) -> (i32, i32) {
    %c0_i32 = arith.constant 0 : i32
    %c0_i32_0 = arith.constant 0 : i32
    %c0_i32_1 = arith.constant 0 : i32
    return %c0_i32, %c0_i32_0 : i32, i32
  }
  func.func @transform_2(%arg0: i32) -> (i32, i32) {
    %c0_i32 = arith.constant 0 : i32
    %c0_i32_0 = arith.constant 0 : i32
    %c0_i32_1 = arith.constant 0 : i32
    return %c0_i32, %c0_i32_0 : i32, i32
  }
  func.func @transform_3(%arg0: i32) -> (i32, i32) {
    %c0_i32 = arith.constant 0 : i32
    %c0_i32_0 = arith.constant 0 : i32
    %c0_i32_1 = arith.constant 0 : i32
    return %c0_i32, %c0_i32_0 : i32, i32
  }
  func.func @transform_4(%arg0: i32) -> (i32, i32) {
    %c0_i32 = arith.constant 0 : i32
    %c0_i32_0 = arith.constant 0 : i32
    return %arg0, %c0_i32 : i32, i32
  }
}

module attributes {stable_mosaic.version = 11 : i64} {
  func.func @_matmul_kernel(%arg0: i32, %arg1: memref<160x512xbf16, #tpu.memory_space<vmem>>, %arg2: memref<512x64xbf16, #tpu.memory_space<vmem>>, %arg3: memref<160x64xbf16, #tpu.memory_space<vmem>>) attributes {dimension_semantics = [#tpu.dimension_semantics<parallel>], iteration_bounds = array<i64: 4>, scalar_prefetch = 0 : i64, scratch_operands = 0 : i64, tpu.core_type = #tpu.core_type<tc>, window_params = [{transform_indices = @transform_0, window_bounds = array<i64: 160, 512>}, {pipeline_mode = #tpu.pipeline_mode<synchronous>, transform_indices = @transform_1, window_bounds = array<i64: 512, 64>}, {transform_indices = @transform_2, window_bounds = array<i64: 160, 64>}]} {
    %c0 = arith.constant 0 : index
    %c0_0 = arith.constant 0 : index
    %0 = vector.load %arg1[%c0, %c0_0] : memref<160x512xbf16, #tpu.memory_space<vmem>>, vector<160x512xbf16>
    %c0_1 = arith.constant 0 : index
    %c0_2 = arith.constant 0 : index
    %1 = vector.load %arg2[%c0_1, %c0_2] : memref<512x64xbf16, #tpu.memory_space<vmem>>, vector<512x64xbf16>
    %cst = arith.constant dense<0.000000e+00> : vector<160x64xf32>
    %2 = tpu.matmul %0, %1, %cst {dimension_numbers = #tpu.dot_dimension_numbers<[1], [0], [0], [1], [0, 0, 1, 1], [], []>} : vector<160x512xbf16>, vector<512x64xbf16>, vector<160x64xf32> -> vector<160x64xf32>
    %3 = arith.truncf %2 : vector<160x64xf32> to vector<160x64xbf16>
    %c0_3 = arith.constant 0 : index
    %c0_4 = arith.constant 0 : index
    %4 = vector.load %arg3[%c0_3, %c0_4] : memref<160x64xbf16, #tpu.memory_space<vmem>>, vector<160x64xbf16>
    tpu.vector_store %arg3[%c0_3, %c0_4], %3 {strides = array<i32>} : memref<160x64xbf16, #tpu.memory_space<vmem>>, vector<160x64xbf16>,
    return
  }
  func.func @transform_0(%arg0: i32) -> (i32, i32) {
    %c0_i32 = arith.constant 0 : i32
    %c0_i32_0 = arith.constant 0 : i32
    return %arg0, %c0_i32 : i32, i32
  }
  func.func @transform_1(%arg0: i32) -> (i32, i32) {
    %c0_i32 = arith.constant 0 : i32
    %c0_i32_0 = arith.constant 0 : i32
    %c0_i32_1 = arith.constant 0 : i32
    return %c0_i32, %c0_i32_0 : i32, i32
  }
  func.func @transform_2(%arg0: i32) -> (i32, i32) {
    %c0_i32 = arith.constant 0 : i32
    %c0_i32_0 = arith.constant 0 : i32
    return %arg0, %c0_i32 : i32, i32
  }
}

module attributes {stable_mosaic.version = 11 : i64} {
  func.func @kernel(%arg0: i32, %arg1: memref<40x1024xbf16, #tpu.memory_space<vmem>>, %arg2: memref<1x256xf32, #tpu.memory_space<vmem>>, %arg3: memref<1x256xf32, #tpu.memory_space<vmem>>, %arg4: memref<40x256xbf16, #tpu.memory_space<vmem>>) attributes {dimension_semantics = [#tpu.dimension_semantics<arbitrary>], iteration_bounds = array<i64: 1>, scalar_prefetch = 0 : i64, scratch_operands = 0 : i64, tpu.core_type = #tpu.core_type<tc>, window_params = [{pipeline_mode = #tpu.pipeline_mode<synchronous>, transform_indices = @transform_0, window_bounds = array<i64: 40, 1024>}, {pipeline_mode = #tpu.pipeline_mode<synchronous>, transform_indices = @transform_1, window_bounds = array<i64: 1, 256>}, {pipeline_mode = #tpu.pipeline_mode<synchronous>, transform_indices = @transform_2, window_bounds = array<i64: 1, 256>}, {pipeline_mode = #tpu.pipeline_mode<synchronous>, transform_indices = @transform_3, window_bounds = array<i64: 40, 256>}]} {
    %c0 = arith.constant 0 : index
    %c0_0 = arith.constant 0 : index
    %0 = vector.load %arg1[%c0, %c0_0] : memref<40x1024xbf16, #tpu.memory_space<vmem>>, vector<40x512xbf16>
    %1 = arith.extf %0 : vector<40x512xbf16> to vector<40x512xf32>
    %c0_1 = arith.constant 0 : index
    %c512 = arith.constant 512 : index
    %2 = vector.load %arg1[%c0_1, %c512] : memref<40x1024xbf16, #tpu.memory_space<vmem>>, vector<40x512xbf16>
    %3 = arith.extf %2 : vector<40x512xbf16> to vector<40x512xf32>
    %4 = arith.maximumf %1, %3 : vector<40x512xf32>
    %5 = vector.extract_strided_slice %4 {offsets = [0, 0], sizes = [40, 64], strides = [1, 1]} : vector<40x512xf32> to vector<40x64xf32>
    %6 = vector.extract_strided_slice %4 {offsets = [0, 64], sizes = [40, 64], strides = [1, 1]} : vector<40x512xf32> to vector<40x64xf32>
    %7 = arith.maximumf %5, %6 : vector<40x64xf32>
    %8 = vector.extract_strided_slice %4 {offsets = [0, 128], sizes = [40, 64], strides = [1, 1]} : vector<40x512xf32> to vector<40x64xf32>
    %9 = vector.extract_strided_slice %4 {offsets = [0, 192], sizes = [40, 64], strides = [1, 1]} : vector<40x512xf32> to vector<40x64xf32>
    %10 = arith.maximumf %8, %9 : vector<40x64xf32>
    %11 = vector.extract_strided_slice %4 {offsets = [0, 256], sizes = [40, 64], strides = [1, 1]} : vector<40x512xf32> to vector<40x64xf32>
    %12 = vector.extract_strided_slice %4 {offsets = [0, 320], sizes = [40, 64], strides = [1, 1]} : vector<40x512xf32> to vector<40x64xf32>
    %13 = arith.maximumf %11, %12 : vector<40x64xf32>
    %14 = vector.extract_strided_slice %4 {offsets = [0, 384], sizes = [40, 64], strides = [1, 1]} : vector<40x512xf32> to vector<40x64xf32>
    %15 = vector.extract_strided_slice %4 {offsets = [0, 448], sizes = [40, 64], strides = [1, 1]} : vector<40x512xf32> to vector<40x64xf32>
    %16 = arith.maximumf %14, %15 : vector<40x64xf32>
    %17 = tpu.concatenate %7, %10, %13, %16 in 1 : vector<40x64xf32>, vector<40x64xf32>, vector<40x64xf32>, vector<40x64xf32> -> vector<40x256xf32>
    %c0_2 = arith.constant 0 : index
    %c0_3 = arith.constant 0 : index
    %18 = vector.load %arg2[%c0_2, %c0_3] : memref<1x256xf32, #tpu.memory_space<vmem>>, vector<1x256xf32>
    %19 = vector.broadcast %18 : vector<1x256xf32> to vector<40x256xf32>
    %20 = arith.mulf %17, %19 : vector<40x256xf32>
    %c0_4 = arith.constant 0 : index
    %c0_5 = arith.constant 0 : index
    %21 = vector.load %arg3[%c0_4, %c0_5] : memref<1x256xf32, #tpu.memory_space<vmem>>, vector<1x256xf32>
    %22 = vector.broadcast %21 : vector<1x256xf32> to vector<40x256xf32>
    %23 = arith.addf %20, %22 : vector<40x256xf32>
    %cst = arith.constant 0.000000e+00 : f32
    %24 = vector.broadcast %cst : f32 to vector<40x256xf32>
    %25 = arith.maximumf %23, %24 : vector<40x256xf32>
    %26 = arith.truncf %25 : vector<40x256xf32> to vector<40x256xbf16>
    %c0_6 = arith.constant 0 : index
    %c0_7 = arith.constant 0 : index
    %27 = vector.load %arg4[%c0_6, %c0_7] : memref<40x256xbf16, #tpu.memory_space<vmem>>, vector<40x256xbf16>
    tpu.vector_store %arg4[%c0_6, %c0_7], %26 {strides = array<i32>} : memref<40x256xbf16, #tpu.memory_space<vmem>>, vector<40x256xbf16>,
    return
  }
  func.func @transform_0(%arg0: i32) -> (i32, i32) {
    %c0_i32 = arith.constant 0 : i32
    %c0_i32_0 = arith.constant 0 : i32
    %c0_i32_1 = arith.constant 0 : i32
    return %c0_i32, %c0_i32_0 : i32, i32
  }
  func.func @transform_1(%arg0: i32) -> (i32, i32) {
    %c0_i32 = arith.constant 0 : i32
    %c0_i32_0 = arith.constant 0 : i32
    %c0_i32_1 = arith.constant 0 : i32
    return %c0_i32, %c0_i32_0 : i32, i32
  }
  func.func @transform_2(%arg0: i32) -> (i32, i32) {
    %c0_i32 = arith.constant 0 : i32
    %c0_i32_0 = arith.constant 0 : i32
    %c0_i32_1 = arith.constant 0 : i32
    return %c0_i32, %c0_i32_0 : i32, i32
  }
  func.func @transform_3(%arg0: i32) -> (i32, i32) {
    %c0_i32 = arith.constant 0 : i32
    %c0_i32_0 = arith.constant 0 : i32
    %c0_i32_1 = arith.constant 0 : i32
    return %c0_i32, %c0_i32_0 : i32, i32
  }
}

module attributes {stable_mosaic.version = 11 : i64} {
  func.func @_matmul_kernel(%arg0: i32, %arg1: memref<40x1024xbf16, #tpu.memory_space<vmem>>, %arg2: memref<1024x64xbf16, #tpu.memory_space<vmem>>, %arg3: memref<40x64xbf16, #tpu.memory_space<vmem>>) attributes {dimension_semantics = [#tpu.dimension_semantics<parallel>], iteration_bounds = array<i64: 1>, scalar_prefetch = 0 : i64, scratch_operands = 0 : i64, tpu.core_type = #tpu.core_type<tc>, window_params = [{transform_indices = @transform_0, window_bounds = array<i64: 40, 1024>}, {pipeline_mode = #tpu.pipeline_mode<synchronous>, transform_indices = @transform_1, window_bounds = array<i64: 1024, 64>}, {transform_indices = @transform_2, window_bounds = array<i64: 40, 64>}]} {
    %c0 = arith.constant 0 : index
    %c0_0 = arith.constant 0 : index
    %0 = vector.load %arg1[%c0, %c0_0] : memref<40x1024xbf16, #tpu.memory_space<vmem>>, vector<40x1024xbf16>
    %c0_1 = arith.constant 0 : index
    %c0_2 = arith.constant 0 : index
    %1 = vector.load %arg2[%c0_1, %c0_2] : memref<1024x64xbf16, #tpu.memory_space<vmem>>, vector<1024x64xbf16>
    %cst = arith.constant dense<0.000000e+00> : vector<40x64xf32>
    %2 = tpu.matmul %0, %1, %cst {dimension_numbers = #tpu.dot_dimension_numbers<[1], [0], [0], [1], [0, 0, 1, 1], [], []>} : vector<40x1024xbf16>, vector<1024x64xbf16>, vector<40x64xf32> -> vector<40x64xf32>
    %3 = arith.truncf %2 : vector<40x64xf32> to vector<40x64xbf16>
    %c0_3 = arith.constant 0 : index
    %c0_4 = arith.constant 0 : index
    %4 = vector.load %arg3[%c0_3, %c0_4] : memref<40x64xbf16, #tpu.memory_space<vmem>>, vector<40x64xbf16>
    tpu.vector_store %arg3[%c0_3, %c0_4], %3 {strides = array<i32>} : memref<40x64xbf16, #tpu.memory_space<vmem>>, vector<40x64xbf16>,
    return
  }
  func.func @transform_0(%arg0: i32) -> (i32, i32) {
    %c0_i32 = arith.constant 0 : i32
    %c0_i32_0 = arith.constant 0 : i32
    return %arg0, %c0_i32 : i32, i32
  }
  func.func @transform_1(%arg0: i32) -> (i32, i32) {
    %c0_i32 = arith.constant 0 : i32
    %c0_i32_0 = arith.constant 0 : i32
    %c0_i32_1 = arith.constant 0 : i32
    return %c0_i32, %c0_i32_0 : i32, i32
  }
  func.func @transform_2(%arg0: i32) -> (i32, i32) {
    %c0_i32 = arith.constant 0 : i32
    %c0_i32_0 = arith.constant 0 : i32
    return %arg0, %c0_i32 : i32, i32
  }
}

module attributes {stable_mosaic.version = 11 : i64} {
  func.func @kernel(%arg0: i32, %arg1: memref<10x256xbf16, #tpu.memory_space<vmem>>, %arg2: memref<1x64xf32, #tpu.memory_space<vmem>>, %arg3: memref<1x64xf32, #tpu.memory_space<vmem>>, %arg4: memref<10x64xbf16, #tpu.memory_space<vmem>>) attributes {dimension_semantics = [#tpu.dimension_semantics<arbitrary>], iteration_bounds = array<i64: 1>, scalar_prefetch = 0 : i64, scratch_operands = 0 : i64, tpu.core_type = #tpu.core_type<tc>, window_params = [{pipeline_mode = #tpu.pipeline_mode<synchronous>, transform_indices = @transform_0, window_bounds = array<i64: 10, 256>}, {pipeline_mode = #tpu.pipeline_mode<synchronous>, transform_indices = @transform_1, window_bounds = array<i64: 1, 64>}, {pipeline_mode = #tpu.pipeline_mode<synchronous>, transform_indices = @transform_2, window_bounds = array<i64: 1, 64>}, {pipeline_mode = #tpu.pipeline_mode<synchronous>, transform_indices = @transform_3, window_bounds = array<i64: 10, 64>}]} {
    %c0 = arith.constant 0 : index
    %c0_0 = arith.constant 0 : index
    %0 = vector.load %arg1[%c0, %c0_0] : memref<10x256xbf16, #tpu.memory_space<vmem>>, vector<10x128xbf16>
    %1 = arith.extf %0 : vector<10x128xbf16> to vector<10x128xf32>
    %c0_1 = arith.constant 0 : index
    %c128 = arith.constant 128 : index
    %2 = vector.load %arg1[%c0_1, %c128] : memref<10x256xbf16, #tpu.memory_space<vmem>>, vector<10x128xbf16>
    %3 = arith.extf %2 : vector<10x128xbf16> to vector<10x128xf32>
    %4 = arith.maximumf %1, %3 : vector<10x128xf32>
    %5 = vector.extract_strided_slice %4 {offsets = [0, 0], sizes = [10, 64], strides = [1, 1]} : vector<10x128xf32> to vector<10x64xf32>
    %6 = vector.extract_strided_slice %4 {offsets = [0, 64], sizes = [10, 64], strides = [1, 1]} : vector<10x128xf32> to vector<10x64xf32>
    %7 = arith.maximumf %5, %6 : vector<10x64xf32>
    %c0_2 = arith.constant 0 : index
    %c0_3 = arith.constant 0 : index
    %8 = vector.load %arg2[%c0_2, %c0_3] : memref<1x64xf32, #tpu.memory_space<vmem>>, vector<1x64xf32>
    %9 = vector.broadcast %8 : vector<1x64xf32> to vector<10x64xf32>
    %10 = arith.mulf %7, %9 : vector<10x64xf32>
    %c0_4 = arith.constant 0 : index
    %c0_5 = arith.constant 0 : index
    %11 = vector.load %arg3[%c0_4, %c0_5] : memref<1x64xf32, #tpu.memory_space<vmem>>, vector<1x64xf32>
    %12 = vector.broadcast %11 : vector<1x64xf32> to vector<10x64xf32>
    %13 = arith.addf %10, %12 : vector<10x64xf32>
    %cst = arith.constant 0.000000e+00 : f32
    %14 = vector.broadcast %cst : f32 to vector<10x64xf32>
    %15 = arith.maximumf %13, %14 : vector<10x64xf32>
    %16 = arith.truncf %15 : vector<10x64xf32> to vector<10x64xbf16>
    %c0_6 = arith.constant 0 : index
    %c0_7 = arith.constant 0 : index
    %17 = vector.load %arg4[%c0_6, %c0_7] : memref<10x64xbf16, #tpu.memory_space<vmem>>, vector<10x64xbf16>
    tpu.vector_store %arg4[%c0_6, %c0_7], %16 {strides = array<i32>} : memref<10x64xbf16, #tpu.memory_space<vmem>>, vector<10x64xbf16>,
    return
  }
  func.func @transform_0(%arg0: i32) -> (i32, i32) {
    %c0_i32 = arith.constant 0 : i32
    %c0_i32_0 = arith.constant 0 : i32
    %c0_i32_1 = arith.constant 0 : i32
    return %c0_i32, %c0_i32_0 : i32, i32
  }
  func.func @transform_1(%arg0: i32) -> (i32, i32) {
    %c0_i32 = arith.constant 0 : i32
    %c0_i32_0 = arith.constant 0 : i32
    %c0_i32_1 = arith.constant 0 : i32
    return %c0_i32, %c0_i32_0 : i32, i32
  }
  func.func @transform_2(%arg0: i32) -> (i32, i32) {
    %c0_i32 = arith.constant 0 : i32
    %c0_i32_0 = arith.constant 0 : i32
    %c0_i32_1 = arith.constant 0 : i32
    return %c0_i32, %c0_i32_0 : i32, i32
  }
  func.func @transform_3(%arg0: i32) -> (i32, i32) {
    %c0_i32 = arith.constant 0 : i32
    %c0_i32_0 = arith.constant 0 : i32
    %c0_i32_1 = arith.constant 0 : i32
    return %c0_i32, %c0_i32_0 : i32, i32
  }
}

module attributes {stable_mosaic.version = 11 : i64} {
  func.func @_matmul_kernel(%arg0: i32, %arg1: memref<42x64xbf16, #tpu.memory_space<vmem>>, %arg2: memref<64x128xbf16, #tpu.memory_space<vmem>>, %arg3: memref<42x128xbf16, #tpu.memory_space<vmem>>) attributes {dimension_semantics = [#tpu.dimension_semantics<parallel>], iteration_bounds = array<i64: 1>, scalar_prefetch = 0 : i64, scratch_operands = 0 : i64, tpu.core_type = #tpu.core_type<tc>, window_params = [{transform_indices = @transform_0, window_bounds = array<i64: 42, 64>}, {pipeline_mode = #tpu.pipeline_mode<synchronous>, transform_indices = @transform_1, window_bounds = array<i64: 64, 128>}, {transform_indices = @transform_2, window_bounds = array<i64: 42, 128>}]} {
    %c0 = arith.constant 0 : index
    %c0_0 = arith.constant 0 : index
    %0 = vector.load %arg1[%c0, %c0_0] : memref<42x64xbf16, #tpu.memory_space<vmem>>, vector<42x64xbf16>
    %c0_1 = arith.constant 0 : index
    %c0_2 = arith.constant 0 : index
    %1 = vector.load %arg2[%c0_1, %c0_2] : memref<64x128xbf16, #tpu.memory_space<vmem>>, vector<64x128xbf16>
    %cst = arith.constant dense<0.000000e+00> : vector<42x128xf32>
    %2 = tpu.matmul %0, %1, %cst {dimension_numbers = #tpu.dot_dimension_numbers<[1], [0], [0], [1], [0, 0, 1, 1], [], []>} : vector<42x64xbf16>, vector<64x128xbf16>, vector<42x128xf32> -> vector<42x128xf32>
    %3 = arith.truncf %2 : vector<42x128xf32> to vector<42x128xbf16>
    %c0_3 = arith.constant 0 : index
    %c0_4 = arith.constant 0 : index
    %4 = vector.load %arg3[%c0_3, %c0_4] : memref<42x128xbf16, #tpu.memory_space<vmem>>, vector<42x128xbf16>
    tpu.vector_store %arg3[%c0_3, %c0_4], %3 {strides = array<i32>} : memref<42x128xbf16, #tpu.memory_space<vmem>>, vector<42x128xbf16>,
    return
  }
  func.func @transform_0(%arg0: i32) -> (i32, i32) {
    %c0_i32 = arith.constant 0 : i32
    %c0_i32_0 = arith.constant 0 : i32
    return %arg0, %c0_i32 : i32, i32
  }
  func.func @transform_1(%arg0: i32) -> (i32, i32) {
    %c0_i32 = arith.constant 0 : i32
    %c0_i32_0 = arith.constant 0 : i32
    %c0_i32_1 = arith.constant 0 : i32
    return %c0_i32, %c0_i32_0 : i32, i32
  }
  func.func @transform_2(%arg0: i32) -> (i32, i32) {
    %c0_i32 = arith.constant 0 : i32
    %c0_i32_0 = arith.constant 0 : i32
    return %arg0, %c0_i32 : i32, i32
  }
}

module attributes {stable_mosaic.version = 11 : i64} {
  func.func @kernel(%arg0: i32, %arg1: memref<6x512xbf16, #tpu.memory_space<vmem>>, %arg2: memref<1x128xf32, #tpu.memory_space<vmem>>, %arg3: memref<1x128xf32, #tpu.memory_space<vmem>>, %arg4: memref<6x128xbf16, #tpu.memory_space<vmem>>) attributes {dimension_semantics = [#tpu.dimension_semantics<arbitrary>], iteration_bounds = array<i64: 1>, scalar_prefetch = 0 : i64, scratch_operands = 0 : i64, tpu.core_type = #tpu.core_type<tc>, window_params = [{pipeline_mode = #tpu.pipeline_mode<synchronous>, transform_indices = @transform_0, window_bounds = array<i64: 6, 512>}, {pipeline_mode = #tpu.pipeline_mode<synchronous>, transform_indices = @transform_1, window_bounds = array<i64: 1, 128>}, {pipeline_mode = #tpu.pipeline_mode<synchronous>, transform_indices = @transform_2, window_bounds = array<i64: 1, 128>}, {pipeline_mode = #tpu.pipeline_mode<synchronous>, transform_indices = @transform_3, window_bounds = array<i64: 6, 128>}]} {
    %c0 = arith.constant 0 : index
    %c0_0 = arith.constant 0 : index
    %0 = vector.load %arg1[%c0, %c0_0] : memref<6x512xbf16, #tpu.memory_space<vmem>>, vector<6x256xbf16>
    %1 = arith.extf %0 : vector<6x256xbf16> to vector<6x256xf32>
    %c0_1 = arith.constant 0 : index
    %c256 = arith.constant 256 : index
    %2 = vector.load %arg1[%c0_1, %c256] : memref<6x512xbf16, #tpu.memory_space<vmem>>, vector<6x256xbf16>
    %3 = arith.extf %2 : vector<6x256xbf16> to vector<6x256xf32>
    %4 = arith.maximumf %1, %3 : vector<6x256xf32>
    %5 = vector.extract_strided_slice %4 {offsets = [0, 0], sizes = [6, 128], strides = [1, 1]} : vector<6x256xf32> to vector<6x128xf32>
    %6 = vector.extract_strided_slice %4 {offsets = [0, 128], sizes = [6, 128], strides = [1, 1]} : vector<6x256xf32> to vector<6x128xf32>
    %7 = arith.maximumf %5, %6 : vector<6x128xf32>
    %c0_2 = arith.constant 0 : index
    %c0_3 = arith.constant 0 : index
    %8 = vector.load %arg2[%c0_2, %c0_3] : memref<1x128xf32, #tpu.memory_space<vmem>>, vector<1x128xf32>
    %9 = vector.broadcast %8 : vector<1x128xf32> to vector<6x128xf32>
    %10 = arith.mulf %7, %9 : vector<6x128xf32>
    %c0_4 = arith.constant 0 : index
    %c0_5 = arith.constant 0 : index
    %11 = vector.load %arg3[%c0_4, %c0_5] : memref<1x128xf32, #tpu.memory_space<vmem>>, vector<1x128xf32>
    %12 = vector.broadcast %11 : vector<1x128xf32> to vector<6x128xf32>
    %13 = arith.addf %10, %12 : vector<6x128xf32>
    %cst = arith.constant 0.000000e+00 : f32
    %14 = vector.broadcast %cst : f32 to vector<6x128xf32>
    %15 = arith.maximumf %13, %14 : vector<6x128xf32>
    %16 = arith.truncf %15 : vector<6x128xf32> to vector<6x128xbf16>
    %c0_6 = arith.constant 0 : index
    %c0_7 = arith.constant 0 : index
    %17 = vector.load %arg4[%c0_6, %c0_7] : memref<6x128xbf16, #tpu.memory_space<vmem>>, vector<6x128xbf16>
    tpu.vector_store %arg4[%c0_6, %c0_7], %16 {strides = array<i32>} : memref<6x128xbf16, #tpu.memory_space<vmem>>, vector<6x128xbf16>,
    return
  }
  func.func @transform_0(%arg0: i32) -> (i32, i32) {
    %c0_i32 = arith.constant 0 : i32
    %c0_i32_0 = arith.constant 0 : i32
    %c0_i32_1 = arith.constant 0 : i32
    return %c0_i32, %c0_i32_0 : i32, i32
  }
  func.func @transform_1(%arg0: i32) -> (i32, i32) {
    %c0_i32 = arith.constant 0 : i32
    %c0_i32_0 = arith.constant 0 : i32
    %c0_i32_1 = arith.constant 0 : i32
    return %c0_i32, %c0_i32_0 : i32, i32
  }
  func.func @transform_2(%arg0: i32) -> (i32, i32) {
    %c0_i32 = arith.constant 0 : i32
    %c0_i32_0 = arith.constant 0 : i32
    %c0_i32_1 = arith.constant 0 : i32
    return %c0_i32, %c0_i32_0 : i32, i32
  }
  func.func @transform_3(%arg0: i32) -> (i32, i32) {
    %c0_i32 = arith.constant 0 : i32
    %c0_i32_0 = arith.constant 0 : i32
    %c0_i32_1 = arith.constant 0 : i32
    return %c0_i32, %c0_i32_0 : i32, i32
  }
}

module attributes {stable_mosaic.version = 11 : i64} {
  func.func @_matmul_kernel(%arg0: i32, %arg1: memref<30x128xbf16, #tpu.memory_space<vmem>>, %arg2: memref<128x256xbf16, #tpu.memory_space<vmem>>, %arg3: memref<30x256xbf16, #tpu.memory_space<vmem>>) attributes {dimension_semantics = [#tpu.dimension_semantics<parallel>], iteration_bounds = array<i64: 1>, scalar_prefetch = 0 : i64, scratch_operands = 0 : i64, tpu.core_type = #tpu.core_type<tc>, window_params = [{transform_indices = @transform_0, window_bounds = array<i64: 30, 128>}, {pipeline_mode = #tpu.pipeline_mode<synchronous>, transform_indices = @transform_1, window_bounds = array<i64: 128, 256>}, {transform_indices = @transform_2, window_bounds = array<i64: 30, 256>}]} {
    %c0 = arith.constant 0 : index
    %c0_0 = arith.constant 0 : index
    %0 = vector.load %arg1[%c0, %c0_0] : memref<30x128xbf16, #tpu.memory_space<vmem>>, vector<30x128xbf16>
    %c0_1 = arith.constant 0 : index
    %c0_2 = arith.constant 0 : index
    %1 = vector.load %arg2[%c0_1, %c0_2] : memref<128x256xbf16, #tpu.memory_space<vmem>>, vector<128x256xbf16>
    %cst = arith.constant dense<0.000000e+00> : vector<30x256xf32>
    %2 = tpu.matmul %0, %1, %cst {dimension_numbers = #tpu.dot_dimension_numbers<[1], [0], [0], [1], [0, 0, 1, 1], [], []>} : vector<30x128xbf16>, vector<128x256xbf16>, vector<30x256xf32> -> vector<30x256xf32>
    %3 = arith.truncf %2 : vector<30x256xf32> to vector<30x256xbf16>
    %c0_3 = arith.constant 0 : index
    %c0_4 = arith.constant 0 : index
    %4 = vector.load %arg3[%c0_3, %c0_4] : memref<30x256xbf16, #tpu.memory_space<vmem>>, vector<30x256xbf16>
    tpu.vector_store %arg3[%c0_3, %c0_4], %3 {strides = array<i32>} : memref<30x256xbf16, #tpu.memory_space<vmem>>, vector<30x256xbf16>,
    return
  }
  func.func @transform_0(%arg0: i32) -> (i32, i32) {
    %c0_i32 = arith.constant 0 : i32
    %c0_i32_0 = arith.constant 0 : i32
    return %arg0, %c0_i32 : i32, i32
  }
  func.func @transform_1(%arg0: i32) -> (i32, i32) {
    %c0_i32 = arith.constant 0 : i32
    %c0_i32_0 = arith.constant 0 : i32
    %c0_i32_1 = arith.constant 0 : i32
    return %c0_i32, %c0_i32_0 : i32, i32
  }
  func.func @transform_2(%arg0: i32) -> (i32, i32) {
    %c0_i32 = arith.constant 0 : i32
    %c0_i32_0 = arith.constant 0 : i32
    return %arg0, %c0_i32 : i32, i32
  }
}

module attributes {stable_mosaic.version = 11 : i64} {
  func.func @kernel(%arg0: i32, %arg1: memref<4x1024xbf16, #tpu.memory_space<vmem>>, %arg2: memref<1x256xf32, #tpu.memory_space<vmem>>, %arg3: memref<1x256xf32, #tpu.memory_space<vmem>>, %arg4: memref<4x256xbf16, #tpu.memory_space<vmem>>) attributes {dimension_semantics = [#tpu.dimension_semantics<arbitrary>], iteration_bounds = array<i64: 1>, scalar_prefetch = 0 : i64, scratch_operands = 0 : i64, tpu.core_type = #tpu.core_type<tc>, window_params = [{pipeline_mode = #tpu.pipeline_mode<synchronous>, transform_indices = @transform_0, window_bounds = array<i64: 4, 1024>}, {pipeline_mode = #tpu.pipeline_mode<synchronous>, transform_indices = @transform_1, window_bounds = array<i64: 1, 256>}, {pipeline_mode = #tpu.pipeline_mode<synchronous>, transform_indices = @transform_2, window_bounds = array<i64: 1, 256>}, {pipeline_mode = #tpu.pipeline_mode<synchronous>, transform_indices = @transform_3, window_bounds = array<i64: 4, 256>}]} {
    %c0 = arith.constant 0 : index
    %c0_0 = arith.constant 0 : index
    %0 = vector.load %arg1[%c0, %c0_0] : memref<4x1024xbf16, #tpu.memory_space<vmem>>, vector<4x512xbf16>
    %1 = arith.extf %0 : vector<4x512xbf16> to vector<4x512xf32>
    %c0_1 = arith.constant 0 : index
    %c512 = arith.constant 512 : index
    %2 = vector.load %arg1[%c0_1, %c512] : memref<4x1024xbf16, #tpu.memory_space<vmem>>, vector<4x512xbf16>
    %3 = arith.extf %2 : vector<4x512xbf16> to vector<4x512xf32>
    %4 = arith.maximumf %1, %3 : vector<4x512xf32>
    %5 = vector.extract_strided_slice %4 {offsets = [0, 0], sizes = [4, 256], strides = [1, 1]} : vector<4x512xf32> to vector<4x256xf32>
    %6 = vector.extract_strided_slice %4 {offsets = [0, 256], sizes = [4, 256], strides = [1, 1]} : vector<4x512xf32> to vector<4x256xf32>
    %7 = arith.maximumf %5, %6 : vector<4x256xf32>
    %c0_2 = arith.constant 0 : index
    %c0_3 = arith.constant 0 : index
    %8 = vector.load %arg2[%c0_2, %c0_3] : memref<1x256xf32, #tpu.memory_space<vmem>>, vector<1x256xf32>
    %9 = vector.broadcast %8 : vector<1x256xf32> to vector<4x256xf32>
    %10 = arith.mulf %7, %9 : vector<4x256xf32>
    %c0_4 = arith.constant 0 : index
    %c0_5 = arith.constant 0 : index
    %11 = vector.load %arg3[%c0_4, %c0_5] : memref<1x256xf32, #tpu.memory_space<vmem>>, vector<1x256xf32>
    %12 = vector.broadcast %11 : vector<1x256xf32> to vector<4x256xf32>
    %13 = arith.addf %10, %12 : vector<4x256xf32>
    %cst = arith.constant 0.000000e+00 : f32
    %14 = vector.broadcast %cst : f32 to vector<4x256xf32>
    %15 = arith.maximumf %13, %14 : vector<4x256xf32>
    %16 = arith.truncf %15 : vector<4x256xf32> to vector<4x256xbf16>
    %c0_6 = arith.constant 0 : index
    %c0_7 = arith.constant 0 : index
    %17 = vector.load %arg4[%c0_6, %c0_7] : memref<4x256xbf16, #tpu.memory_space<vmem>>, vector<4x256xbf16>
    tpu.vector_store %arg4[%c0_6, %c0_7], %16 {strides = array<i32>} : memref<4x256xbf16, #tpu.memory_space<vmem>>, vector<4x256xbf16>,
    return
  }
  func.func @transform_0(%arg0: i32) -> (i32, i32) {
    %c0_i32 = arith.constant 0 : i32
    %c0_i32_0 = arith.constant 0 : i32
    %c0_i32_1 = arith.constant 0 : i32
    return %c0_i32, %c0_i32_0 : i32, i32
  }
  func.func @transform_1(%arg0: i32) -> (i32, i32) {
    %c0_i32 = arith.constant 0 : i32
    %c0_i32_0 = arith.constant 0 : i32
    %c0_i32_1 = arith.constant 0 : i32
    return %c0_i32, %c0_i32_0 : i32, i32
  }
  func.func @transform_2(%arg0: i32) -> (i32, i32) {
    %c0_i32 = arith.constant 0 : i32
    %c0_i32_0 = arith.constant 0 : i32
    %c0_i32_1 = arith.constant 0 : i32
    return %c0_i32, %c0_i32_0 : i32, i32
  }
  func.func @transform_3(%arg0: i32) -> (i32, i32) {
    %c0_i32 = arith.constant 0 : i32
    %c0_i32_0 = arith.constant 0 : i32
    %c0_i32_1 = arith.constant 0 : i32
    return %c0_i32, %c0_i32_0 : i32, i32
  }
}

module attributes {stable_mosaic.version = 11 : i64} {
  func.func @_dense_head_kernel(%arg0: memref<2x512xbf16, #tpu.memory_space<vmem>>, %arg1: memref<512x50xf32, #tpu.memory_space<vmem>>, %arg2: memref<1x50xf32, #tpu.memory_space<vmem>>, %arg3: memref<50x5xf32, #tpu.memory_space<vmem>>, %arg4: memref<1x5xf32, #tpu.memory_space<vmem>>, %arg5: memref<5x1xf32, #tpu.memory_space<vmem>>, %arg6: memref<1x1xf32, #tpu.memory_space<vmem>>, %arg7: memref<2x1xf32, #tpu.memory_space<vmem>>) attributes {dimension_semantics = [], scalar_prefetch = 0 : i64, scratch_operands = 0 : i64, tpu.core_type = #tpu.core_type<tc>} {
    %c0 = arith.constant 0 : index
    %c0_0 = arith.constant 0 : index
    %0 = vector.load %arg0[%c0, %c0_0] : memref<2x512xbf16, #tpu.memory_space<vmem>>, vector<2x512xbf16>
    %1 = arith.extf %0 : vector<2x512xbf16> to vector<2x512xf32>
    %c0_1 = arith.constant 0 : index
    %c0_2 = arith.constant 0 : index
    %2 = vector.load %arg1[%c0_1, %c0_2] : memref<512x50xf32, #tpu.memory_space<vmem>>, vector<512x50xf32>
    %cst = arith.constant dense<0.000000e+00> : vector<2x50xf32>
    %3 = tpu.matmul %1, %2, %cst {dimension_numbers = #tpu.dot_dimension_numbers<[1], [0], [0], [1], [0, 0, 1, 1], [], []>} : vector<2x512xf32>, vector<512x50xf32>, vector<2x50xf32> -> vector<2x50xf32>
    %c0_3 = arith.constant 0 : index
    %c0_4 = arith.constant 0 : index
    %4 = vector.load %arg2[%c0_3, %c0_4] : memref<1x50xf32, #tpu.memory_space<vmem>>, vector<1x50xf32>
    %5 = vector.broadcast %4 : vector<1x50xf32> to vector<2x50xf32>
    %6 = arith.addf %3, %5 : vector<2x50xf32>
    %c0_5 = arith.constant 0 : index
    %c0_6 = arith.constant 0 : index
    %7 = vector.load %arg3[%c0_5, %c0_6] : memref<50x5xf32, #tpu.memory_space<vmem>>, vector<50x5xf32>
    %cst_7 = arith.constant dense<0.000000e+00> : vector<2x5xf32>
    %8 = tpu.matmul %6, %7, %cst_7 {dimension_numbers = #tpu.dot_dimension_numbers<[1], [0], [0], [1], [0, 0, 1, 1], [], []>} : vector<2x50xf32>, vector<50x5xf32>, vector<2x5xf32> -> vector<2x5xf32>
    %c0_8 = arith.constant 0 : index
    %c0_9 = arith.constant 0 : index
    %9 = vector.load %arg4[%c0_8, %c0_9] : memref<1x5xf32, #tpu.memory_space<vmem>>, vector<1x5xf32>
    %10 = vector.broadcast %9 : vector<1x5xf32> to vector<2x5xf32>
    %11 = arith.addf %8, %10 : vector<2x5xf32>
    %c0_10 = arith.constant 0 : index
    %c0_11 = arith.constant 0 : index
    %12 = vector.load %arg5[%c0_10, %c0_11] : memref<5x1xf32, #tpu.memory_space<vmem>>, vector<5x1xf32>
    %cst_12 = arith.constant dense<0.000000e+00> : vector<2x1xf32>
    %13 = tpu.matmul %11, %12, %cst_12 {dimension_numbers = #tpu.dot_dimension_numbers<[1], [0], [0], [1], [0, 0, 1, 1], [], []>} : vector<2x5xf32>, vector<5x1xf32>, vector<2x1xf32> -> vector<2x1xf32>
    %c0_13 = arith.constant 0 : index
    %c0_14 = arith.constant 0 : index
    %14 = vector.load %arg6[%c0_13, %c0_14] : memref<1x1xf32, #tpu.memory_space<vmem>>, vector<1x1xf32>
    %15 = vector.broadcast %14 : vector<1x1xf32> to vector<2x1xf32>
    %16 = arith.addf %13, %15 : vector<2x1xf32>
    %c0_15 = arith.constant 0 : index
    %c0_16 = arith.constant 0 : index
    %17 = vector.load %arg7[%c0_15, %c0_16] : memref<2x1xf32, #tpu.memory_space<vmem>>, vector<2x1xf32>
    tpu.vector_store %arg7[%c0_15, %c0_16], %16 {strides = array<i32>} : memref<2x1xf32, #tpu.memory_space<vmem>>, vector<2x1xf32>,
    return
  }
}

module attributes {stable_mosaic.version = 11 : i64} {
  func.func @_dense_head_kernel(%arg0: memref<2x384xbf16, #tpu.memory_space<vmem>>, %arg1: memref<384x10xf32, #tpu.memory_space<vmem>>, %arg2: memref<1x10xf32, #tpu.memory_space<vmem>>, %arg3: memref<10x1xf32, #tpu.memory_space<vmem>>, %arg4: memref<1x1xf32, #tpu.memory_space<vmem>>, %arg5: memref<2x1xf32, #tpu.memory_space<vmem>>) attributes {dimension_semantics = [], scalar_prefetch = 0 : i64, scratch_operands = 0 : i64, tpu.core_type = #tpu.core_type<tc>} {
    %c0 = arith.constant 0 : index
    %c0_0 = arith.constant 0 : index
    %0 = vector.load %arg0[%c0, %c0_0] : memref<2x384xbf16, #tpu.memory_space<vmem>>, vector<2x384xbf16>
    %1 = arith.extf %0 : vector<2x384xbf16> to vector<2x384xf32>
    %c0_1 = arith.constant 0 : index
    %c0_2 = arith.constant 0 : index
    %2 = vector.load %arg1[%c0_1, %c0_2] : memref<384x10xf32, #tpu.memory_space<vmem>>, vector<384x10xf32>
    %cst = arith.constant dense<0.000000e+00> : vector<2x10xf32>
    %3 = tpu.matmul %1, %2, %cst {dimension_numbers = #tpu.dot_dimension_numbers<[1], [0], [0], [1], [0, 0, 1, 1], [], []>} : vector<2x384xf32>, vector<384x10xf32>, vector<2x10xf32> -> vector<2x10xf32>
    %c0_3 = arith.constant 0 : index
    %c0_4 = arith.constant 0 : index
    %4 = vector.load %arg2[%c0_3, %c0_4] : memref<1x10xf32, #tpu.memory_space<vmem>>, vector<1x10xf32>
    %5 = vector.broadcast %4 : vector<1x10xf32> to vector<2x10xf32>
    %6 = arith.addf %3, %5 : vector<2x10xf32>
    %c0_5 = arith.constant 0 : index
    %c0_6 = arith.constant 0 : index
    %7 = vector.load %arg3[%c0_5, %c0_6] : memref<10x1xf32, #tpu.memory_space<vmem>>, vector<10x1xf32>
    %cst_7 = arith.constant dense<0.000000e+00> : vector<2x1xf32>
    %8 = tpu.matmul %6, %7, %cst_7 {dimension_numbers = #tpu.dot_dimension_numbers<[1], [0], [0], [1], [0, 0, 1, 1], [], []>} : vector<2x10xf32>, vector<10x1xf32>, vector<2x1xf32> -> vector<2x1xf32>
    %c0_8 = arith.constant 0 : index
    %c0_9 = arith.constant 0 : index
    %9 = vector.load %arg4[%c0_8, %c0_9] : memref<1x1xf32, #tpu.memory_space<vmem>>, vector<1x1xf32>
    %10 = vector.broadcast %9 : vector<1x1xf32> to vector<2x1xf32>
    %11 = arith.addf %8, %10 : vector<2x1xf32>
    %c0_10 = arith.constant 0 : index
    %c0_11 = arith.constant 0 : index
    %12 = vector.load %arg5[%c0_10, %c0_11] : memref<2x1xf32, #tpu.memory_space<vmem>>, vector<2x1xf32>
    tpu.vector_store %arg5[%c0_10, %c0_11], %11 {strides = array<i32>} : memref<2x1xf32, #tpu.memory_space<vmem>>, vector<2x1xf32>,
    return
  }
}

module attributes {stable_mosaic.version = 11 : i64} {
  func.func @_dense_head_kernel(%arg0: memref<2x320xbf16, #tpu.memory_space<vmem>>, %arg1: memref<320x10xf32, #tpu.memory_space<vmem>>, %arg2: memref<1x10xf32, #tpu.memory_space<vmem>>, %arg3: memref<10x1xf32, #tpu.memory_space<vmem>>, %arg4: memref<1x1xf32, #tpu.memory_space<vmem>>, %arg5: memref<2x1xf32, #tpu.memory_space<vmem>>) attributes {dimension_semantics = [], scalar_prefetch = 0 : i64, scratch_operands = 0 : i64, tpu.core_type = #tpu.core_type<tc>} {
    %c0 = arith.constant 0 : index
    %c0_0 = arith.constant 0 : index
    %0 = vector.load %arg0[%c0, %c0_0] : memref<2x320xbf16, #tpu.memory_space<vmem>>, vector<2x320xbf16>
    %1 = arith.extf %0 : vector<2x320xbf16> to vector<2x320xf32>
    %c0_1 = arith.constant 0 : index
    %c0_2 = arith.constant 0 : index
    %2 = vector.load %arg1[%c0_1, %c0_2] : memref<320x10xf32, #tpu.memory_space<vmem>>, vector<320x10xf32>
    %cst = arith.constant dense<0.000000e+00> : vector<2x10xf32>
    %3 = tpu.matmul %1, %2, %cst {dimension_numbers = #tpu.dot_dimension_numbers<[1], [0], [0], [1], [0, 0, 1, 1], [], []>} : vector<2x320xf32>, vector<320x10xf32>, vector<2x10xf32> -> vector<2x10xf32>
    %c0_3 = arith.constant 0 : index
    %c0_4 = arith.constant 0 : index
    %4 = vector.load %arg2[%c0_3, %c0_4] : memref<1x10xf32, #tpu.memory_space<vmem>>, vector<1x10xf32>
    %5 = vector.broadcast %4 : vector<1x10xf32> to vector<2x10xf32>
    %6 = arith.addf %3, %5 : vector<2x10xf32>
    %c0_5 = arith.constant 0 : index
    %c0_6 = arith.constant 0 : index
    %7 = vector.load %arg3[%c0_5, %c0_6] : memref<10x1xf32, #tpu.memory_space<vmem>>, vector<10x1xf32>
    %cst_7 = arith.constant dense<0.000000e+00> : vector<2x1xf32>
    %8 = tpu.matmul %6, %7, %cst_7 {dimension_numbers = #tpu.dot_dimension_numbers<[1], [0], [0], [1], [0, 0, 1, 1], [], []>} : vector<2x10xf32>, vector<10x1xf32>, vector<2x1xf32> -> vector<2x1xf32>
    %c0_8 = arith.constant 0 : index
    %c0_9 = arith.constant 0 : index
    %9 = vector.load %arg4[%c0_8, %c0_9] : memref<1x1xf32, #tpu.memory_space<vmem>>, vector<1x1xf32>
    %10 = vector.broadcast %9 : vector<1x1xf32> to vector<2x1xf32>
    %11 = arith.addf %8, %10 : vector<2x1xf32>
    %c0_10 = arith.constant 0 : index
    %c0_11 = arith.constant 0 : index
    %12 = vector.load %arg5[%c0_10, %c0_11] : memref<2x1xf32, #tpu.memory_space<vmem>>, vector<2x1xf32>
    tpu.vector_store %arg5[%c0_10, %c0_11], %11 {strides = array<i32>} : memref<2x1xf32, #tpu.memory_space<vmem>>, vector<2x1xf32>,
    return
  }
}

</mosaic_0001>

<bundles_post_ra>
// kernel: generator_forward.12
= control target key start
LH: loop header
LB: loop body
LE: loop exit
PB: predicated region body
PF: predicated region fallthrough
CT: control target
= control target key end

     0   :  { %9 = vsyncpa [#allocation3], 0  ;;  %s2210_s0 = inlined_call_operand.vmem [shape: bf16[160,256], index: 0, kind: input, shape index: {}]   ;;  %s2211_s1 = inlined_call_operand.hbm [shape: bf16[128,1024], index: 1, kind: input, shape index: {}]   ;;  %s2212_s2 = inlined_call_operand.hbm [shape: f32[1,512], index: 2, kind: input, shape index: {}]   ;;  %s2213_s3 = inlined_call_operand.hbm [shape: f32[1,512], index: 3, kind: input, shape index: {}]   ;;  %s2214_s4 = inlined_call_operand.vmem [shape: bf16[160,512], index: 4, kind: output, shape index: {}]  }
   0x1   :  { %10 = vsyncpa [#allocation5], 0  ;;  %s1648_s15 = smov 0  }
   0x2 LB: > { %s1617_s16 = smov [#allocation4]   ;;  %s1364_s18 = sadd.s32 4294967295, %s1615_s15   ;;  %s1615_s15 = sphi %s1648_s15, %s16_s15  }
   0x3   : > { %s162_s17 = sshll.u32 %s1617_s16, 4  ;;  %p1366_p0 = scmp.ge.s32.totalorder %s1615_s15, 1  ;;  %s163_s17 = int_to_ptr.vmem [resolvable:$true] %s162_s17 }
   0x4   : > { %p136_p1 = scmp.lt.s32.totalorder %s1615_s15, 6  ;;  %p1658_p2 = scmp.eq.s32.totalorder %s1364_s18, 0 }
   0x5   : > { %s1618_s21 = smov [#allocation2]   ;;  %s1619_s24 = smov [#allocation6]  }
   0x6   : > { %s2225_s19 = scalar_select %p1658_p2, 1, 0 }
   0x7   : > { %p1662_p3 = pnand %p1366_p0, %p136_p1  ;;  %s148_s22 = sshll.u32 %s1618_s21, 4  ;;  %s1674_s22 = int_to_ptr.vmem [resolvable:$true] %s148_s22 }
   0x8   : > { %s173_s25 = sshll.u32 %s1619_s24, 4  ;;  %s1517_s28 = scalar_lea.hbm %s2212_s2, 64  ;;  %s1676_s25 = int_to_ptr.vmem [resolvable:$true] %s173_s25 }
   0x9   : > { %s2226_s20 = scalar_select %p1662_p3, 1, 0 }
   0xa   : > { %p1481_p4 = pneg %p1662_p3  ;;  %p1518_p6 = scmp.ne.s32.totalorder %s2212_s2, %s1517_s28 }
   0xb   : > { %p1524_p10 = scmp.lt.u32.totalorder %s1517_s28, %s2212_s2 }
   0xc   : > { %p1670_p5 = pnand %p1658_p2, %p1481_p4 }
   0xe   : > { %p1686_p7 = pneg %p1670_p5 }
  0x10   : > { %p1520_p8 = pnand %p1686_p7, %p1518_p6 }
  0x12   : > { %p1521_p9 = pneg %p1520_p8 }
  0x14   : > { %p1526_p11 = pnand %p1524_p10, %p1521_p9 }
  0x16   : > { %1529 = shalt.err (!%p1526_p11)
}
  0x17   : > { %s1530_s8 = scalar_lea.vmem %s163_s17, 64  ;;  %p1538_p1 = scmp.lt.s32.totalorder %s163_s17, %s163_s17 }
  0x18   : > { %p1531_p12 = scmp.ne.s32.totalorder %s163_s17, %s1530_s8  ;;  %p1539_p4 = scmp.lt.s32.totalorder %s1530_s8, %s1530_s8 }
  0x1a   : > { %p1533_p13 = pnand %p1531_p12, %p1686_p7  ;;  %p1540_p2 = por %p1539_p4, %p1538_p1 }
  0x1c   : > { %p1534_p0 = pneg %p1533_p13 }
  0x1e   : > { %p1541_p3 = pnand %p1540_p2, %p1534_p0 }
  0x20   : > { %1544 = shalt.err (!%p1541_p3)
}
  0x21   : > { %1487 = dma.hbm_to_vmem [thread:$0]  (!%p1670_p5), %s2212_s2, 64, %s163_s17, [#allocation5]  }
  0x22   : > { %s1545_s13 = scalar_lea.hbm %s2211_s1, 8192 }
  0x23   : > { %p1546_p6 = scmp.ne.s32.totalorder %s2211_s1, %s1545_s13  ;;  %p1552_p2 = scmp.lt.u32.totalorder %s1545_s13, %s2211_s1 }
  0x25   : > { %p1548_p8 = pnand %p1546_p6, %p1686_p7 }
  0x27   : > { %p1549_p9 = pneg %p1548_p8 }
  0x29   : > { %p1554_p3 = pnand %p1552_p2, %p1549_p9 }
  0x2b   : > { %1557 = shalt.err (!%p1554_p3)
}
  0x2c   : > { %s1558_s17 = scalar_lea.vmem %s1674_s22, 8192  ;;  %p1566_p13 = scmp.lt.s32.totalorder %s1674_s22, %s1674_s22 }
  0x2d   : > { %p1559_p10 = scmp.ne.s32.totalorder %s1674_s22, %s1558_s17  ;;  %p1567_p0 = scmp.lt.s32.totalorder %s1558_s17, %s1558_s17 }
  0x2f   : > { %p1561_p11 = pnand %p1559_p10, %p1686_p7  ;;  %p1568_p1 = por %p1567_p0, %p1566_p13 }
  0x31   : > { %p1562_p12 = pneg %p1561_p11 }
  0x33   : > { %p1569_p4 = pnand %p1568_p1, %p1562_p12 }
  0x35   : > { %1572 = shalt.err (!%p1569_p4)
}
  0x36   : > { %s1620_s26 = smov 512   ;;  %s1621_s27 = smov 32  }
  0x37   : > { %1484 = dma.hbm_to_vmem [thread:$0]  (!%p1670_p5), %s2211_s1, 8192, %s1674_s22, [#allocation3], %s1620_s26, %s1620_s26, %s1621_s27  }
  0x38   : > { %s1573_s7 = scalar_lea.hbm %s2213_s3, 64 }
  0x39   : > { %p1574_p6 = scmp.ne.s32.totalorder %s2213_s3, %s1573_s7  ;;  %p1580_p2 = scmp.lt.u32.totalorder %s1573_s7, %s2213_s3 }
  0x3b   : > { %p1576_p8 = pnand %p1574_p6, %p1686_p7 }
  0x3d   : > { %p1577_p9 = pneg %p1576_p8 }
  0x3f   : > { %p1582_p3 = pnand %p1580_p2, %p1577_p9 }
  0x41   : > { %1585 = shalt.err (!%p1582_p3)
}
  0x42   : > { %s1586_s22 = scalar_lea.vmem %s1676_s25, 64  ;;  %p1594_p13 = scmp.lt.s32.totalorder %s1676_s25, %s1676_s25 }
  0x43   : > { %p1587_p10 = scmp.ne.s32.totalorder %s1676_s25, %s1586_s22  ;;  %p1595_p0 = scmp.lt.s32.totalorder %s1586_s22, %s1586_s22 }
  0x45   : > { %p1589_p11 = pnand %p1587_p10, %p1686_p7  ;;  %p1596_p1 = por %p1595_p0, %p1594_p13 }
  0x47   : > { %p1590_p12 = pneg %p1589_p11 }
  0x49   : > { %p1597_p4 = pnand %p1596_p1, %p1590_p12 }
  0x4b   : > { %1600 = shalt.err (!%p1597_p4)
}
  0x4c   : > { %1490 = dma.hbm_to_vmem [thread:$0]  (!%p1670_p5), %s2213_s3, 64, %s1676_s25, [#allocation5]  }
  0x4d   : > { %p2229_p6 = scmp.ne.s32.totalorder %s2226_s20, 0 }
  0x4f   : > { %196 = sbr.rel (%p2229_p6) target bundleno = 468 (0x1d4), region = 36 }
  0x56   : > { %p2230_p8 = scmp.ne.s32.totalorder %s2225_s19, 0 }
  0x58   : > { %1606 = dma.done.wait (%p2230_p8), [#allocation3], 8192  }
  0x59   : > { %1608 = vsyncadd (%p2230_p8), [#allocation3], 4294959104 }
  0x5a   : > { %1610 = dma.done.wait (%p2230_p8), [#allocation5], 128  }
  0x5b   : > { %1612 = vsyncadd (%p2230_p8), [#allocation5], 4294967168  ;;  %v1622_v0 = vmov 0   ;;  %s1375_s20 = sshll.u32 %s1364_s18, 2  ;;  %v251_v1 = vld [vmem:[#allocation2] sm:$0xff]  ;;  %v252_v3 = vld [vmem:[#allocation2 + $0x8] sm:$0xff] }
  0x5c   : > { %519 = vmatprep.mubr.bf16.mxu0 %v1622_v0  ;;  %572 = vmatprep.mubr.bf16.mxu1 %v1622_v0  ;;  %p233_p5 = scmp.lt.s32.totalorder %s1375_s20, 19  ;;  %v253_v2 = vld [vmem:[#allocation2 + $0x20] sm:$0xff]  ;;  %v254_v5 = vld [vmem:[#allocation2 + $0x28] sm:$0xff] }
  0x5d   : > { %v1762_v4 = vcombine.high %v251_v1, %v253_v2  ;;  %v1764_v6 = vcombine.low %v251_v1, %v253_v2  ;;  %v255_v7 = vld [vmem:[#allocation2 + $0x40] sm:$0xff]  ;;  %v1766_v9 = vcombine.high %v252_v3, %v254_v5  ;;  %v1768_v10 = vcombine.low %v252_v3, %v254_v5  ;;  %v256_v12 = vld [vmem:[#allocation2 + $0x48] sm:$0xff]  ;;  %v285_v5 = vld [vmem:[#allocation2 + $0x30] sm:$0xff] }
  0x5e   : > { %v257_v8 = vld [vmem:[#allocation2 + $0x60] sm:$0xff]  ;;  %v258_v13 = vld [vmem:[#allocation2 + $0x68] sm:$0xff]  ;;  %s2266_s20 = smov (!%p233_p5, %s1375_s20), 19 }
  0x5f   : > { %v1770_v11 = vcombine.high %v255_v7, %v257_v8  ;;  %v259_v14 = vld [vmem:[#allocation2 + $0x80] sm:$0xff]  ;;  %487 = vmatprep.subr.bf16.mxu0 %v1762_v4  ;;  %v1776_v15 = vcombine.high %v256_v12, %v258_v13  ;;  %v260_v17 = vld [vmem:[#allocation2 + $0x88] sm:$0xff]  ;;  %540 = vmatprep.subr.bf16.mxu1 %v1766_v9  ;;  %v1780_v19 = vcombine.low %v255_v7, %v257_v8  ;;  %s1459_s18 = sshll.u32 %s2266_s20, 3  ;;  %v286_v7 = vld [vmem:[#allocation2 + $0x38] sm:$0xff]  ;;  %s1460_s5 = sshll.u32 %s2266_s20, 4 }
  0x60   : > { %v261_v16 = vld [vmem:[#allocation2 + $0xa0] sm:$0xff]  ;;  %v262_v18 = vld [vmem:[#allocation2 + $0xa8] sm:$0xff]  ;;  %488 = vmatpush1.bf16.msra.mxu0 %v1764_v6  ;;  %541 = vmatpush1.bf16.msra.mxu1 %v1768_v10  ;;  %v1784_v20 = vcombine.low %v256_v12, %v258_v13  ;;  %s1804_s25 = scalar_lea.vmem %s2210_s0, %s1459_s18  ;;  %v288_v13 = vld [vmem:[#allocation2 + $0x58] sm:$0xff]  ;;  %s2148_s21 = scalar_lea.vmem %s2214_s4, %s1460_s5 }
  0x61   : > { %489 = vmatprep.subr.bf16.mxu0 %v1770_v11  ;;  %v1786_v21 = vcombine.high %v259_v14, %v261_v16  ;;  %542 = vmatprep.subr.bf16.mxu1 %v1776_v15  ;;  %v1789_v22 = vcombine.high %v260_v17, %v262_v18  ;;  %v263_v23 = vld [vmem:[#allocation2 + $0xc0] sm:$0xff]  ;;  %v264_v25 = vld [vmem:[#allocation2 + $0xc8] sm:$0xff]  ;;  %v1793_v27 = vcombine.low %v259_v14, %v261_v16  ;;  %v1851_v3 = vld [vmem:[%s1804_s25 + $0x10] ss:$8 sps:$4 sm:$0xff]  }
  0x62   : > { %v265_v24 = vld [vmem:[#allocation2 + $0xe0] sm:$0xff]  ;;  %v266_v26 = vld [vmem:[#allocation2 + $0xe8] sm:$0xff]  ;;  %v1797_v28 = vcombine.low %v260_v17, %v262_v18  ;;  %v290_v14 = vld [vmem:[#allocation2 + $0x78] sm:$0xff] }
  0x63   : > { %v1799_v29 = vcombine.high %v263_v23, %v265_v24  ;;  %v1807_v30 = vcombine.high %v264_v25, %v266_v26  ;;  %v267_v31 = vld [vmem:[#allocation2 + $0x100] sm:$0xff]  ;;  %v268_v33 = vld [vmem:[#allocation2 + $0x108] sm:$0xff]  ;;  %v1810_v35 = vcombine.low %v263_v23, %v265_v24  ;;  %v1814_v36 = vcombine.low %v264_v25, %v266_v26 }
  0x64   : > { %490 = vmatpush1.bf16.msra.mxu0 %v1780_v19  ;;  %543 = vmatpush1.bf16.msra.mxu1 %v1784_v20  ;;  %v269_v32 = vld [vmem:[#allocation2 + $0x120] sm:$0xff]  ;;  %v270_v34 = vld [vmem:[#allocation2 + $0x128] sm:$0xff]  ;;  %v1888_v18 = vcombine.high %v288_v13, %v290_v14  ;;  %v1897_v24 = vcombine.low %v288_v13, %v290_v14 }
  0x65   : > { %491 = vmatprep.subr.bf16.mxu0 %v1786_v21  ;;  %544 = vmatprep.subr.bf16.mxu1 %v1789_v22  ;;  %v1816_v37 = vcombine.high %v267_v31, %v269_v32  ;;  %v1819_v38 = vcombine.high %v268_v33, %v270_v34  ;;  %v271_v39 = vld [vmem:[#allocation2 + $0x140] sm:$0xff]  ;;  %v272_v41 = vld [vmem:[#allocation2 + $0x148] sm:$0xff]  ;;  %v1822_v43 = vcombine.low %v267_v31, %v269_v32  ;;  %v298_v31 = vld [vmem:[#allocation2 + $0xf8] sm:$0xff] }
  0x66   : > { %v273_v40 = vld [vmem:[#allocation2 + $0x160] sm:$0xff]  ;;  %v274_v42 = vld [vmem:[#allocation2 + $0x168] sm:$0xff]  ;;  %v1826_v44 = vcombine.low %v268_v33, %v270_v34 }
  0x67   : > { %v1828_v45 = vcombine.high %v271_v39, %v273_v40  ;;  %v1831_v46 = vcombine.high %v272_v41, %v274_v42  ;;  %v275_v47 = vld [vmem:[#allocation2 + $0x180] sm:$0xff]  ;;  %v276_v49 = vld [vmem:[#allocation2 + $0x188] sm:$0xff]  ;;  %v1403_v51 = vcombine.low %v271_v39, %v273_v40  ;;  %v1405_v52 = vcombine.low %v272_v41, %v274_v42  ;;  %v302_v39 = vld [vmem:[#allocation2 + $0x138] sm:$0xff] }
  0x68   : > { %492 = vmatpush1.bf16.msra.mxu0 %v1793_v27  ;;  %545 = vmatpush1.bf16.msra.mxu1 %v1797_v28  ;;  %v277_v48 = vld [vmem:[#allocation2 + $0x1a0] sm:$0xff]  ;;  %v278_v50 = vld [vmem:[#allocation2 + $0x1a8] sm:$0xff] }
  0x69   : > { %493 = vmatprep.subr.bf16.mxu0 %v1799_v29  ;;  %546 = vmatprep.subr.bf16.mxu1 %v1807_v30  ;;  %v1408_v53 = vcombine.high %v275_v47, %v277_v48  ;;  %v1410_v54 = vcombine.high %v276_v49, %v278_v50  ;;  %v279_v55 = vld [vmem:[#allocation2 + $0x1c0] sm:$0xff]  ;;  %v280_v57 = vld [vmem:[#allocation2 + $0x1c8] sm:$0xff]  ;;  %v1407_v59 = vcombine.low %v275_v47, %v277_v48  ;;  %v306_v47 = vld [vmem:[#allocation2 + $0x178] sm:$0xff] }
  0x6a   : > { %v281_v56 = vld [vmem:[#allocation2 + $0x1e0] sm:$0xff]  ;;  %v282_v58 = vld [vmem:[#allocation2 + $0x1e8] sm:$0xff]  ;;  %v1409_v60 = vcombine.low %v276_v49, %v278_v50 }
  0x6b   : > { %v1412_v61 = vcombine.high %v279_v55, %v281_v56  ;;  %v1414_v62 = vcombine.high %v280_v57, %v282_v58  ;;  %v1411_v63 = vcombine.low %v279_v55, %v281_v56  ;;  %v1413_v1 = vcombine.low %v280_v57, %v282_v58  ;;  %v1838_v2 = vld [vmem:[%s1804_s25] ss:$8 sps:$4 sm:$0xff]   ;;  %v1878_v12 = vld [vmem:[%s1804_s25 + $0x4] ss:$8 sps:$4 sm:$0xff]   ;;  %v310_v55 = vld [vmem:[#allocation2 + $0x1b8] sm:$0xff] }
  0x6c   : > { %494 = vmatpush1.bf16.msra.mxu0 %v1810_v35  ;;  %547 = vmatpush1.bf16.msra.mxu1 %v1814_v36 }
  0x6d   : > { %495 = vmatprep.subr.bf16.mxu0 %v1816_v37  ;;  %548 = vmatprep.subr.bf16.mxu1 %v1819_v38 }
  0x70   : > { %496 = vmatpush1.bf16.msra.mxu0 %v1822_v43  ;;  %549 = vmatpush1.bf16.msra.mxu1 %v1826_v44 }
  0x71   : > { %497 = vmatprep.subr.bf16.mxu0 %v1828_v45  ;;  %550 = vmatprep.subr.bf16.mxu1 %v1831_v46 }
  0x74   : > { %498 = vmatpush1.bf16.msra.mxu0 %v1403_v51  ;;  %551 = vmatpush1.bf16.msra.mxu1 %v1405_v52 }
  0x75   : > { %499 = vmatprep.subr.bf16.mxu0 %v1408_v53  ;;  %552 = vmatprep.subr.bf16.mxu1 %v1410_v54 }
  0x78   : > { %500 = vmatpush1.bf16.msra.mxu0 %v1407_v59  ;;  %553 = vmatpush1.bf16.msra.mxu1 %v1409_v60 }
  0x79   : > { %501 = vmatprep.subr.bf16.mxu0 %v1412_v61  ;;  %554 = vmatprep.subr.bf16.mxu1 %v1414_v62 }
  0x7c   : > { %502 = vmatpush1.bf16.msra.mxu0 %v1411_v63  ;;  %555 = vmatpush1.bf16.msra.mxu1 %v1413_v1 }
  0x7d   : > { %601 = vmatprep.subr.bf16.mxu0 %v1762_v4  ;;  %654 = vmatprep.subr.bf16.mxu1 %v1766_v9  ;;  %v283_v4 = vld [vmem:[#allocation2 + $0x10] sm:$0xff] }
  0x7e   : > { %v1873_v8 = vcombine.high %v283_v4, %v285_v5 }
  0x7f   : > { %520 = vmatmul.mubr.bf16.vlgmr.msra.gmra.mrb[0].mxu0 %v1838_v2  ;;  %573 = vmatmul.mubr.bf16.vlgmr.msra.gmra.mrb[0].mxu1 %v1838_v2 }
  0x80   : > { %602 = vmatpush1.bf16.msra.mxu0 %v1764_v6  ;;  %655 = vmatpush1.bf16.msra.mxu1 %v1768_v10  ;;  %v284_v6 = vld [vmem:[#allocation2 + $0x18] sm:$0xff]  ;;  %v287_v10 = vld [vmem:[#allocation2 + $0x50] sm:$0xff] }
  0x81   : > { %603 = vmatprep.subr.bf16.mxu0 %v1770_v11  ;;  %656 = vmatprep.subr.bf16.mxu1 %v1776_v15  ;;  %v1875_v9 = vcombine.high %v284_v6, %v286_v7  ;;  %v289_v11 = vld [vmem:[#allocation2 + $0x70] sm:$0xff]  ;;  %v1880_v15 = vcombine.low %v283_v4, %v285_v5  ;;  %v1883_v16 = vcombine.low %v284_v6, %v286_v7 }
  0x82   : > { %529 = vmatprep.mubr.bf16.mxu0 %v1622_v0  ;;  %582 = vmatprep.mubr.bf16.mxu1 %v1622_v0  ;;  %v1885_v17 = vcombine.high %v287_v10, %v289_v11  ;;  %v1893_v23 = vcombine.low %v287_v10, %v289_v11 }
  0x84   : > { %604 = vmatpush1.bf16.msra.mxu0 %v1780_v19  ;;  %657 = vmatpush1.bf16.msra.mxu1 %v1784_v20  ;;  %v291_v19 = vld [vmem:[#allocation2 + $0x90] sm:$0xff] }
  0x85   : > { %605 = vmatprep.subr.bf16.mxu0 %v1786_v21  ;;  %658 = vmatprep.subr.bf16.mxu1 %v1789_v22  ;;  %v293_v20 = vld [vmem:[#allocation2 + $0xb0] sm:$0xff]  ;;  %v292_v21 = vld [vmem:[#allocation2 + $0x98] sm:$0xff] }
  0x86   : > { %v294_v22 = vld [vmem:[#allocation2 + $0xb8] sm:$0xff]  ;;  %v1899_v25 = vcombine.high %v291_v19, %v293_v20  ;;  %v1910_v32 = vcombine.low %v291_v19, %v293_v20 }
  0x87   : > { %530 = vmatmul.mubr.bf16.gmra.mrb[4].mxu0 %v1851_v3  ;;  %583 = vmatmul.mubr.bf16.gmra.mrb[4].mxu1 %v1851_v3  ;;  %v1903_v26 = vcombine.high %v292_v21, %v294_v22  ;;  %v1914_v33 = vcombine.low %v292_v21, %v294_v22 }
  0x88   : > { %606 = vmatpush1.bf16.msra.mxu0 %v1793_v27  ;;  %659 = vmatpush1.bf16.msra.mxu1 %v1797_v28  ;;  %v295_v27 = vld [vmem:[#allocation2 + $0xd0] sm:$0xff] }
  0x89   : > { %607 = vmatprep.subr.bf16.mxu0 %v1799_v29  ;;  %660 = vmatprep.subr.bf16.mxu1 %v1807_v30  ;;  %v297_v28 = vld [vmem:[#allocation2 + $0xf0] sm:$0xff]  ;;  %v296_v30 = vld [vmem:[#allocation2 + $0xd8] sm:$0xff] }
  0x8a   : > { %633 = vmatprep.mubr.bf16.mxu0 %v1622_v0  ;;  %686 = vmatprep.mubr.bf16.mxu1 %v1622_v0  ;;  %v1907_v29 = vld [vmem:[%s1804_s25 + $0x14] ss:$8 sps:$4 sm:$0xff]   ;;  %v1916_v34 = vcombine.high %v295_v27, %v297_v28  ;;  %v1924_v40 = vcombine.low %v295_v27, %v297_v28  ;;  %v1928_v41 = vcombine.low %v296_v30, %v298_v31 }
  0x8c   : > { %608 = vmatpush1.bf16.msra.mxu0 %v1810_v35  ;;  %661 = vmatpush1.bf16.msra.mxu1 %v1814_v36  ;;  %v1919_v35 = vcombine.high %v296_v30, %v298_v31  ;;  %v299_v36 = vld [vmem:[#allocation2 + $0x110] sm:$0xff] }
  0x8d   : > { %609 = vmatprep.subr.bf16.mxu0 %v1816_v37  ;;  %662 = vmatprep.subr.bf16.mxu1 %v1819_v38  ;;  %v301_v37 = vld [vmem:[#allocation2 + $0x130] sm:$0xff]  ;;  %v300_v38 = vld [vmem:[#allocation2 + $0x118] sm:$0xff] }
  0x8e   : > { %v1930_v42 = vcombine.high %v299_v36, %v301_v37  ;;  %v1938_v48 = vcombine.low %v299_v36, %v301_v37  ;;  %v1435_v49 = vcombine.low %v300_v38, %v302_v39 }
  0x90   : > { %610 = vmatpush1.bf16.msra.mxu0 %v1822_v43  ;;  %663 = vmatpush1.bf16.msra.mxu1 %v1826_v44  ;;  %v1933_v43 = vcombine.high %v300_v38, %v302_v39  ;;  %v303_v44 = vld [vmem:[#allocation2 + $0x150] sm:$0xff]  ;;  %v1165_v39 = vld [vmem:[#allocation6] sm:$0xf] }
  0x91   : > { %611 = vmatprep.subr.bf16.mxu0 %v1828_v45  ;;  %664 = vmatprep.subr.bf16.mxu1 %v1831_v46  ;;  %v305_v45 = vld [vmem:[#allocation2 + $0x170] sm:$0xff]  ;;  %v304_v46 = vld [vmem:[#allocation2 + $0x158] sm:$0xff] }
  0x92   : > { %v1438_v50 = vcombine.high %v303_v44, %v305_v45  ;;  %v1437_v56 = vcombine.low %v303_v44, %v305_v45  ;;  %v1439_v57 = vcombine.low %v304_v46, %v306_v47 }
  0x94   : > { %612 = vmatpush1.bf16.msra.mxu0 %v1403_v51  ;;  %665 = vmatpush1.bf16.msra.mxu1 %v1405_v52  ;;  %v1440_v51 = vcombine.high %v304_v46, %v306_v47  ;;  %v307_v52 = vld [vmem:[#allocation2 + $0x190] sm:$0xff]  ;;  %v1127_v46 = vld [vmem:[#allocation4] sm:$0xf] }
  0x95   : > { %613 = vmatprep.subr.bf16.mxu0 %v1408_v53  ;;  %666 = vmatprep.subr.bf16.mxu1 %v1410_v54  ;;  %v309_v53 = vld [vmem:[#allocation2 + $0x1b0] sm:$0xff]  ;;  %v308_v54 = vld [vmem:[#allocation2 + $0x198] sm:$0xff] }
  0x96   : > { %v1442_v58 = vcombine.high %v307_v52, %v309_v53  ;;  %v1443_v4 = vcombine.low %v308_v54, %v310_v55 }
  0x98   : > { %614 = vmatpush1.bf16.msra.mxu0 %v1407_v59  ;;  %667 = vmatpush1.bf16.msra.mxu1 %v1409_v60  ;;  %v1444_v59 = vcombine.high %v308_v54, %v310_v55  ;;  %v311_v60 = vld [vmem:[#allocation2 + $0x1d0] sm:$0xff] }
  0x99   : > { %615 = vmatprep.subr.bf16.mxu0 %v1412_v61  ;;  %668 = vmatprep.subr.bf16.mxu1 %v1414_v62  ;;  %v313_v61 = vld [vmem:[#allocation2 + $0x1f0] sm:$0xff]  ;;  %v312_v62 = vld [vmem:[#allocation2 + $0x1d8] sm:$0xff] }
  0x9a   : > { %v1446_v5 = vcombine.high %v311_v60, %v313_v61  ;;  %v1445_v7 = vcombine.low %v311_v60, %v313_v61 }
  0x9c   : > { %616 = vmatpush1.bf16.msra.mxu0 %v1411_v63  ;;  %669 = vmatpush1.bf16.msra.mxu1 %v1413_v1  ;;  %v314_v63 = vld [vmem:[#allocation2 + $0x1f8] sm:$0xff]  ;;  %v1441_v1 = vcombine.low %v307_v52, %v309_v53  ;;  %v1129_v53 = vlaneseq }
  0x9d   : > { %883 = vmatprep.subr.bf16.mxu0 %v1873_v8  ;;  %936 = vmatprep.subr.bf16.mxu1 %v1875_v9  ;;  %v1448_v6 = vcombine.high %v312_v62, %v314_v63  ;;  %v1447_v10 = vcombine.low %v312_v62, %v314_v63 }
  0x9f   : > { %634 = vmatmul.mubr.bf16.vlgmr.msra.gmra.mrb[8].mxu0 %v1878_v12  ;;  %687 = vmatmul.mubr.bf16.vlgmr.msra.gmra.mrb[8].mxu1 %v1878_v12 }
  0xa0   : > { %884 = vmatpush1.bf16.msra.mxu0 %v1880_v15  ;;  %937 = vmatpush1.bf16.msra.mxu1 %v1883_v16 }
  0xa1   : > { %885 = vmatprep.subr.bf16.mxu0 %v1885_v17  ;;  %938 = vmatprep.subr.bf16.mxu1 %v1888_v18 }
  0xa2   : > { %643 = vmatprep.mubr.bf16.mxu0 %v1622_v0  ;;  %696 = vmatprep.mubr.bf16.mxu1 %v1622_v0 }
  0xa4   : > { %886 = vmatpush1.bf16.msra.mxu0 %v1893_v23  ;;  %939 = vmatpush1.bf16.msra.mxu1 %v1897_v24 }
  0xa5   : > { %887 = vmatprep.subr.bf16.mxu0 %v1899_v25  ;;  %940 = vmatprep.subr.bf16.mxu1 %v1903_v26 }
  0xa7   : > { %644 = vmatmul.mubr.bf16.gmra.mrb[12].mxu0 %v1907_v29  ;;  %697 = vmatmul.mubr.bf16.gmra.mrb[12].mxu1 %v1907_v29 }
  0xa8   : > { %888 = vmatpush1.bf16.msra.mxu0 %v1910_v32  ;;  %941 = vmatpush1.bf16.msra.mxu1 %v1914_v33 }
  0xa9   : > { %889 = vmatprep.subr.bf16.mxu0 %v1916_v34  ;;  %942 = vmatprep.subr.bf16.mxu1 %v1919_v35 }
  0xaa   : > { %915 = vmatprep.mubr.bf16.mxu0 %v1622_v0  ;;  %968 = vmatprep.mubr.bf16.mxu1 %v1622_v0 }
  0xac   : > { %890 = vmatpush1.bf16.msra.mxu0 %v1924_v40  ;;  %943 = vmatpush1.bf16.msra.mxu1 %v1928_v41 }
  0xad   : > { %891 = vmatprep.subr.bf16.mxu0 %v1930_v42  ;;  %944 = vmatprep.subr.bf16.mxu1 %v1933_v43 }
  0xb0   : > { %892 = vmatpush1.bf16.msra.mxu0 %v1938_v48  ;;  %945 = vmatpush1.bf16.msra.mxu1 %v1435_v49 }
  0xb1   : > { %893 = vmatprep.subr.bf16.mxu0 %v1438_v50  ;;  %946 = vmatprep.subr.bf16.mxu1 %v1440_v51 }
  0xb4   : > { %894 = vmatpush1.bf16.msra.mxu0 %v1437_v56  ;;  %947 = vmatpush1.bf16.msra.mxu1 %v1439_v57 }
  0xb5   : > { %895 = vmatprep.subr.bf16.mxu0 %v1442_v58  ;;  %948 = vmatprep.subr.bf16.mxu1 %v1444_v59 }
  0xb8   : > { %896 = vmatpush1.bf16.msra.mxu0 %v1441_v1  ;;  %949 = vmatpush1.bf16.msra.mxu1 %v1443_v4 }
  0xb9   : > { %897 = vmatprep.subr.bf16.mxu0 %v1446_v5  ;;  %950 = vmatprep.subr.bf16.mxu1 %v1448_v6 }
  0xbc   : > { %898 = vmatpush1.bf16.msra.mxu0 %v1445_v7  ;;  %951 = vmatpush1.bf16.msra.mxu1 %v1447_v10 }
  0xbd   : > { %989 = vmatprep.subr.bf16.mxu0 %v1873_v8  ;;  %1042 = vmatprep.subr.bf16.mxu1 %v1875_v9 }
  0xbf   : > { %916 = vmatmul.mubr.bf16.vlgmr.msra.gmra.mrb[16].mxu0 %v1838_v2  ;;  %969 = vmatmul.mubr.bf16.vlgmr.msra.gmra.mrb[16].mxu1 %v1838_v2 }
  0xc0   : > { %990 = vmatpush1.bf16.msra.mxu0 %v1880_v15  ;;  %1043 = vmatpush1.bf16.msra.mxu1 %v1883_v16 }
  0xc1   : > { %991 = vmatprep.subr.bf16.mxu0 %v1885_v17  ;;  %1044 = vmatprep.subr.bf16.mxu1 %v1888_v18 }
  0xc2   : > { %925 = vmatprep.mubr.bf16.mxu0 %v1622_v0  ;;  %978 = vmatprep.mubr.bf16.mxu1 %v1622_v0 }
  0xc4   : > { %992 = vmatpush1.bf16.msra.mxu0 %v1893_v23  ;;  %1045 = vmatpush1.bf16.msra.mxu1 %v1897_v24 }
  0xc5   : > { %993 = vmatprep.subr.bf16.mxu0 %v1899_v25  ;;  %1046 = vmatprep.subr.bf16.mxu1 %v1903_v26 }
  0xc7   : > { %926 = vmatmul.mubr.bf16.gmra.mrb[20].mxu0 %v1851_v3  ;;  %979 = vmatmul.mubr.bf16.gmra.mrb[20].mxu1 %v1851_v3 }
  0xc8   : > { %994 = vmatpush1.bf16.msra.mxu0 %v1910_v32  ;;  %1047 = vmatpush1.bf16.msra.mxu1 %v1914_v33 }
  0xc9   : > { %995 = vmatprep.subr.bf16.mxu0 %v1916_v34  ;;  %1048 = vmatprep.subr.bf16.mxu1 %v1919_v35 }
  0xca   : > { %1021 = vmatprep.mubr.bf16.mxu0 %v1622_v0  ;;  %1074 = vmatprep.mubr.bf16.mxu1 %v1622_v0 }
  0xcc   : > { %996 = vmatpush1.bf16.msra.mxu0 %v1924_v40  ;;  %1049 = vmatpush1.bf16.msra.mxu1 %v1928_v41 }
  0xcd   : > { %997 = vmatprep.subr.bf16.mxu0 %v1930_v42  ;;  %1050 = vmatprep.subr.bf16.mxu1 %v1933_v43 }
  0xd0   : > { %998 = vmatpush1.bf16.msra.mxu0 %v1938_v48  ;;  %1051 = vmatpush1.bf16.msra.mxu1 %v1435_v49 }
  0xd1   : > { %999 = vmatprep.subr.bf16.mxu0 %v1438_v50  ;;  %1052 = vmatprep.subr.bf16.mxu1 %v1440_v51  ;;  %v1130_v51 = vshrl.u32 %v1129_v53, 7 }
  0xd3   : > { %v1131_v50 = vsub.s32 0, %v1130_v51  ;;  %v1139_v47 = vsub.s32 2, %v1130_v51  ;;  %v1135_v43 = vsub.s32 1, %v1130_v51  ;;  %v1143_v42 = vsub.s32 3, %v1130_v51 }
  0xd4   : > { %1000 = vmatpush1.bf16.msra.mxu0 %v1437_v56  ;;  %1053 = vmatpush1.bf16.msra.mxu1 %v1439_v57 }
  0xd5   : > { %1001 = vmatprep.subr.bf16.mxu0 %v1442_v58  ;;  %1054 = vmatprep.subr.bf16.mxu1 %v1444_v59  ;;  %v2089_v35 = vrot.slane %v1127_v46, %v1131_v50  ;;  %v2091_v34 = vrot.slane %v1127_v46, %v1139_v47  ;;  %v2093_v30 = vrot.slane %v1165_v39, %v1131_v50 }
  0xd6   : > { %v2095_v23 = vrot.slane %v1127_v46, %v1135_v43  ;;  %v2101_v51 = vrot.slane %v1165_v39, %v1135_v43 }
  0xd8   : > { %1002 = vmatpush1.bf16.msra.mxu0 %v1441_v1  ;;  %1055 = vmatpush1.bf16.msra.mxu1 %v1443_v4 }
  0xd9   : > { %1003 = vmatprep.subr.bf16.mxu0 %v1446_v5  ;;  %1056 = vmatprep.subr.bf16.mxu1 %v1448_v6 }
  0xdc   : > { %1004 = vmatpush1.bf16.msra.mxu0 %v1445_v7  ;;  %1057 = vmatpush1.bf16.msra.mxu1 %v1447_v10 }
  0xdf   : > { %1022 = vmatmul.mubr.bf16.vlgmr.msra.gmra.mrb[24].mxu0 %v1878_v12  ;;  %1075 = vmatmul.mubr.bf16.vlgmr.msra.gmra.mrb[24].mxu1 %v1878_v12 }
  0xe0   : > { %1031 = vmatprep.mubr.bf16.mxu0 %v1622_v0  ;;  %1084 = vmatprep.mubr.bf16.mxu1 %v1622_v0 }
  0xe7   : > { %1032 = vmatmul.mubr.bf16.gmra.mrb[28].mxu0 %v1907_v29  ;;  %1085 = vmatmul.mubr.bf16.gmra.mrb[28].mxu1 %v1907_v29 }
 0x152   : > { %v1977_v2 = vpop.f32.mrb[0].mxu0  ;;  %v1979_v3 = vpop.f32.mrb[0].mxu1 }
 0x153   : > { %v1981_v8 = vpop.f32.mrb[1].mxu0  ;;  %v1983_v9 = vpop.f32.mrb[1].mxu1 }
 0x154   : > { %v1985_v11 = vpop.f32.mrb[2].mxu0  ;;  %v1987_v13 = vpop.f32.mrb[2].mxu1 }
 0x155   : > { %v1989_v12 = vpop.f32.mrb[3].mxu0  ;;  %v1991_v14 = vpop.f32.mrb[3].mxu1 }
 0x15a   : > { %v1993_v0 = vpop.f32.mrb[4].mxu0  ;;  %v1995_v15 = vpop.f32.mrb[4].mxu1 }
 0x15b   : > { %v1997_v16 = vpop.f32.mrb[5].mxu0  ;;  %v1999_v17 = vpop.f32.mrb[5].mxu1 }
 0x15c   : > { %v2001_v18 = vpop.f32.mrb[6].mxu0  ;;  %v2003_v19 = vpop.f32.mrb[6].mxu1 }
 0x15d   : > { %2231 = vst [vmem:[#allocation9_spill] sm:$0xff] %v2003_v19  ;;  %v2005_v20 = vpop.f32.mrb[7].mxu0  ;;  %v2007_v21 = vpop.f32.mrb[7].mxu1 }
 0x15e   : > { %2232 = vst [vmem:[#allocation10_spill] sm:$0xff] %v2005_v20  ;;  %2233 = vst [vmem:[#allocation11_spill] sm:$0xff] %v2007_v21  ;;  %v2099_v21 = vrot.slane %v1165_v39, %v1139_v47 }
 0x172   : > { %v2009_v22 = vpop.f32.mrb[8].mxu0  ;;  %v2013_v24 = vpop.f32.mrb[8].mxu1 }
 0x173   : > { %v2015_v25 = vpop.f32.mrb[9].mxu0  ;;  %v2021_v28 = vpop.f32.mrb[9].mxu1 }
 0x174   : > { %v2023_v29 = vpop.f32.mrb[10].mxu0  ;;  %v2029_v32 = vpop.f32.mrb[10].mxu1 }
 0x175   : > { %v2031_v33 = vpop.f32.mrb[11].mxu0  ;;  %v2037_v36 = vpop.f32.mrb[11].mxu1 }
 0x17a   : > { %v2041_v38 = vpop.f32.mrb[12].mxu0  ;;  %v2045_v40 = vpop.f32.mrb[12].mxu1 }
 0x17b   : > { %v2047_v41 = vpop.f32.mrb[13].mxu0  ;;  %v2053_v44 = vpop.f32.mrb[13].mxu1 }
 0x17c   : > { %v2055_v45 = vpop.f32.mrb[14].mxu0  ;;  %v2061_v48 = vpop.f32.mrb[14].mxu1 }
 0x17d   : > { %2234 = vst [vmem:[#allocation12_spill] sm:$0xff] %v2055_v45  ;;  %2235 = vst [vmem:[#allocation13_spill] sm:$0xff] %v2061_v48  ;;  %v2063_v49 = vpop.f32.mrb[15].mxu0  ;;  %v2069_v52 = vpop.f32.mrb[15].mxu1  ;;  %v2240_v48 = vmax.f32 %v1977_v2, %v2009_v22 }
 0x17e   : > { %2236 = vst [vmem:[#allocation14_spill] sm:$0xff] %v2063_v49  ;;  %2237 = vst [vmem:[#allocation15_spill] sm:$0xff] %v2069_v52  ;;  %v2097_v52 = vrot.slane %v1127_v46, %v1143_v42 }
 0x192   : > { %v917_v54 = vpop.f32.mrb[16].mxu0  ;;  %v970_v55 = vpop.f32.mrb[16].mxu1 }
 0x193   : > { %v919_v56 = vpop.f32.mrb[17].mxu0  ;;  %v972_v57 = vpop.f32.mrb[17].mxu1 }
 0x194   : > { %v921_v58 = vpop.f32.mrb[18].mxu0  ;;  %v974_v59 = vpop.f32.mrb[18].mxu1 }
 0x195   : > { %v923_v60 = vpop.f32.mrb[19].mxu0  ;;  %v976_v61 = vpop.f32.mrb[19].mxu1 }
 0x19a   : > { %v2073_v62 = vpop.f32.mrb[20].mxu0  ;;  %v2075_v63 = vpop.f32.mrb[20].mxu1 }
 0x19b   : > { %v2077_v1 = vpop.f32.mrb[21].mxu0  ;;  %v2079_v4 = vpop.f32.mrb[21].mxu1 }
 0x19c   : > { %v2081_v5 = vpop.f32.mrb[22].mxu0  ;;  %v2083_v6 = vpop.f32.mrb[22].mxu1 }
 0x19d   : > { %v2085_v7 = vpop.f32.mrb[23].mxu0  ;;  %v2087_v10 = vpop.f32.mrb[23].mxu1 }
 0x19e   : > { %2238 = vst [vmem:[#allocation16_spill] sm:$0xff] %v2085_v7  ;;  %2239 = vst [vmem:[#allocation17_spill] sm:$0xff] %v2087_v10 }
 0x1b2   : > { %v1023_v37 = vpop.f32.mrb[24].mxu0  ;;  %v1076_v27 = vpop.f32.mrb[24].mxu1 }
 0x1b3   : > { %v1095_v31 = vmax.f32 %v917_v54, %v1023_v37  ;;  %v1025_v26 = vpop.f32.mrb[25].mxu0  ;;  %v1097_v53 = vmax.f32 %v970_v55, %v1076_v27  ;;  %v1078_v20 = vpop.f32.mrb[25].mxu1  ;;  %v2106_v54 = vrot.slane %v1165_v39, %v1143_v42  ;;  %v2241_v27 = vmax.f32 %v1979_v3, %v2013_v24 }
 0x1b4   : > { %v1096_v49 = vmax.f32 %v919_v56, %v1025_v26  ;;  %v1027_v10 = vpop.f32.mrb[26].mxu0  ;;  %v1098_v50 = vmax.f32 %v972_v57, %v1078_v20  ;;  %v1080_v7 = vpop.f32.mrb[26].mxu1  ;;  %v2242_v26 = vmax.f32 %v1981_v8, %v2015_v25  ;;  %v2243_v20 = vmax.f32 %v1983_v9, %v2021_v28 }
 0x1b5   : > { %v1111_v37 = vmax.f32 %v2240_v48, %v1095_v31  ;;  %v1099_v19 = vmax.f32 %v921_v58, %v1027_v10  ;;  %v1029_v45 = vpop.f32.mrb[27].mxu0  ;;  %v1113_v46 = vmax.f32 %v2241_v27, %v1097_v53  ;;  %v1101_v47 = vmax.f32 %v974_v59, %v1080_v7  ;;  %v1082_v56 = vpop.f32.mrb[27].mxu1 }
 0x1b6   : > { %v1112_v43 = vmax.f32 %v2242_v26, %v1096_v49  ;;  %v1100_v55 = vmax.f32 %v923_v60, %v1029_v45  ;;  %v1114_v22 = vmax.f32 %v2243_v20, %v1098_v50  ;;  %v2244_v31 = vmax.f32 %v1985_v11, %v2023_v29 }
 0x1b7   : > { %v1149_v2 = vmul.f32 %v2089_v35, %v1111_v37  ;;  %v1102_v3 = vmax.f32 %v976_v61, %v1082_v56  ;;  %v1151_v24 = vmul.f32 %v2091_v34, %v1113_v46  ;;  %v2245_v25 = vmax.f32 %v1987_v13, %v2029_v32 }
 0x1b8   : > { %v1115_v39 = vmax.f32 %v2244_v31, %v1099_v19  ;;  %v1150_v8 = vmul.f32 %v2095_v23, %v1112_v43  ;;  %v2246_v45 = vmax.f32 %v1989_v12, %v2031_v33  ;;  %v1152_v28 = vmul.f32 %v2097_v52, %v1114_v22 }
 0x1b9   : > { %v1117_v42 = vmax.f32 %v2245_v25, %v1101_v47  ;;  %v1187_v9 = vadd.f32 %v2093_v30, %v1149_v2  ;;  %v2247_v19 = vmax.f32 %v1991_v14, %v2037_v36  ;;  %v1189_v49 = vadd.f32 %v2099_v21, %v1151_v24 }
 0x1ba   : > { %v1116_v48 = vmax.f32 %v2246_v45, %v1100_v55  ;;  %v1153_v11 = vmul.f32 %v2089_v35, %v1115_v39  ;;  %v1188_v13 = vadd.f32 %v2101_v51, %v1150_v8  ;;  %v1033_v33 = vpop.f32.mrb[28].mxu0  ;;  %v1190_v58 = vadd.f32 %v2106_v54, %v1152_v28  ;;  %v1086_v61 = vpop.f32.mrb[28].mxu1 }
 0x1bb   : > { %v1118_v29 = vmax.f32 %v2247_v19, %v1102_v3  ;;  %v1155_v32 = vmul.f32 %v2091_v34, %v1117_v42  ;;  %v1203_v57 = vmax.f32 %v1187_v9, 0.0  ;;  %v1035_v14 = vpop.f32.mrb[29].mxu0  ;;  %v1205_v36 = vmax.f32 %v1189_v49, 0.0  ;;  %v1088_v37 = vpop.f32.mrb[29].mxu1 }
 0x1bc   : > { %v1154_v12 = vmul.f32 %v2095_v23, %v1116_v48  ;;  %v1191_v59 = vadd.f32 %v2093_v30, %v1153_v11  ;;  %v1204_v7 = vmax.f32 %v1188_v13, 0.0  ;;  %v1037_v50 = vpop.f32.mrb[30].mxu0  ;;  %v1206_v27 = vmax.f32 %v1190_v58, 0.0  ;;  %v1090_v47 = vpop.f32.mrb[30].mxu1  ;;  %v2259_v58 = vld [vmem:[#allocation10_spill] sm:$0xff] }
 0x1bd   : > { %v1156_v60 = vmul.f32 %v2097_v52, %v1118_v29  ;;  %v1193_v10 = vadd.f32 %v2099_v21, %v1155_v32  ;;  %v1103_v43 = vmax.f32 %v2073_v62, %v1033_v33  ;;  %v1039_v55 = vpop.f32.mrb[31].mxu0  ;;  %v1105_v22 = vmax.f32 %v2075_v63, %v1086_v61  ;;  %v1092_v31 = vpop.f32.mrb[31].mxu1  ;;  %v2254_v29 = vld [vmem:[#allocation16_spill] sm:$0xff]  ;;  %v2258_v33 = vld [vmem:[#allocation17_spill] sm:$0xff] }
 0x1be   : > { %v1192_v53 = vadd.f32 %v2101_v51, %v1154_v12  ;;  %v1207_v46 = vmax.f32 %v1191_v59, 0.0  ;;  %v1461_v56 = vpack.c.bf16 %v1204_v7, %v1203_v57  ;;  %v1462_v39 = vpack.c.bf16 %v1206_v27, %v1205_v36  ;;  %v2260_v59 = vld [vmem:[#allocation14_spill] sm:$0xff] }
 0x1bf   : > { %v1194_v26 = vadd.f32 %v2106_v54, %v1156_v60  ;;  %v1209_v2 = vmax.f32 %v1193_v10, 0.0  ;;  %v2248_v24 = vmax.f32 %v1993_v0, %v2041_v38  ;;  %v1104_v25 = vmax.f32 %v2077_v1, %v1035_v14  ;;  %v2262_v10 = vld [vmem:[#allocation11_spill] sm:$0xff] }
 0x1c0   : > { %v1208_v20 = vmax.f32 %v1192_v53, 0.0  ;;  %1267 = vst [vmem:[%s2148_s21] sm:$0xff] %v1461_v56  ;;  %v2249_v42 = vmax.f32 %v1995_v15, %v2045_v40  ;;  %v1106_v48 = vmax.f32 %v2079_v4, %v1088_v37  ;;  %v1107_v63 = vmax.f32 %v2081_v5, %v1037_v50  ;;  %1268 = vst [vmem:[%s2148_s21 + $0x8] sm:$0xff] %v1462_v39  ;;  %v2252_v4 = vld [vmem:[#allocation12_spill] sm:$0xff]  ;;  %v2263_v53 = vld [vmem:[#allocation15_spill] sm:$0xff] }
 0x1c1   : > { %v1210_v3 = vmax.f32 %v1194_v26, 0.0  ;;  %v1119_v8 = vmax.f32 %v2248_v24, %v1103_v43  ;;  %v2250_v0 = vmax.f32 %v1997_v16, %v2047_v41  ;;  %v1109_v1 = vmax.f32 %v2083_v6, %v1090_v47  ;;  %v2255_v41 = vld [vmem:[#allocation9_spill] sm:$0xff] }
 0x1c2   : > { %v1463_v62 = vpack.c.bf16 %v1208_v20, %v1207_v46  ;;  %v1121_v45 = vmax.f32 %v2249_v42, %v1105_v22  ;;  %v2251_v15 = vmax.f32 %v1999_v17, %v2053_v44  ;;  %v2253_v5 = vmax.f32 %v2001_v18, %v2252_v4  ;;  %v2256_v6 = vld [vmem:[#allocation13_spill] sm:$0xff] }
 0x1c3   : > { %v1464_v9 = vpack.c.bf16 %v1210_v3, %v1209_v2  ;;  %v1157_v28 = vmul.f32 %v2089_v35, %v1119_v8  ;;  %v1120_v38 = vmax.f32 %v2250_v0, %v1104_v25  ;;  %v1108_v49 = vmax.f32 %v2254_v29, %v1039_v55 }
 0x1c4   : > { %1269 = vst [vmem:[%s2148_s21 + $0x10] sm:$0xff] %v1463_v62  ;;  %v1159_v11 = vmul.f32 %v2091_v34, %v1121_v45  ;;  %v1122_v40 = vmax.f32 %v2251_v15, %v1106_v48  ;;  %v1123_v19 = vmax.f32 %v2253_v5, %v1107_v63  ;;  %v2257_v32 = vmax.f32 %v2255_v41, %v2256_v6 }
 0x1c5   : > { %1270 = vst [vmem:[%s2148_s21 + $0x18] sm:$0xff] %v1464_v9  ;;  %v1195_v13 = vadd.f32 %v2093_v30, %v1157_v28  ;;  %v1158_v16 = vmul.f32 %v2095_v23, %v1120_v38  ;;  %v1110_v57 = vmax.f32 %v2258_v33, %v1092_v31  ;;  %v2261_v60 = vmax.f32 %v2259_v58, %v2260_v59 }
 0x1c6   : > { %v1125_v12 = vmax.f32 %v2257_v32, %v1109_v1  ;;  %v1197_v17 = vadd.f32 %v2099_v21, %v1159_v11  ;;  %v1160_v44 = vmul.f32 %v2097_v52, %v1122_v40  ;;  %v1161_v18 = vmul.f32 %v2089_v35, %v1123_v19 }
 0x1c7   : > { %v1124_v61 = vmax.f32 %v2261_v60, %v1108_v49  ;;  %v1211_v14 = vmax.f32 %v1195_v13, 0.0  ;;  %v1196_v36 = vadd.f32 %v2101_v51, %v1158_v16  ;;  %v2264_v37 = vmax.f32 %v2262_v10, %v2263_v53 }
 0x1c8   : > { %v1163_v7 = vmul.f32 %v2091_v34, %v1125_v12  ;;  %v1213_v27 = vmax.f32 %v1197_v17, 0.0  ;;  %v1198_v46 = vadd.f32 %v2106_v54, %v1160_v44  ;;  %v1199_v35 = vadd.f32 %v2093_v30, %v1161_v18 }
 0x1c9   : > { %v1126_v50 = vmax.f32 %v2264_v37, %v1110_v57  ;;  %v1162_v26 = vmul.f32 %v2095_v23, %v1124_v61  ;;  %v1212_v43 = vmax.f32 %v1196_v36, 0.0 }
 0x1ca   : > { %v1201_v47 = vadd.f32 %v2099_v21, %v1163_v7  ;;  %v1214_v55 = vmax.f32 %v1198_v46, 0.0  ;;  %v1215_v56 = vmax.f32 %v1199_v35, 0.0 }
 0x1cb   : > { %v1164_v34 = vmul.f32 %v2097_v52, %v1126_v50  ;;  %v1200_v2 = vadd.f32 %v2101_v51, %v1162_v26  ;;  %v1465_v20 = vpack.c.bf16 %v1212_v43, %v1211_v14 }
 0x1cc   : > { %v1217_v22 = vmax.f32 %v1201_v47, 0.0  ;;  %v1466_v39 = vpack.c.bf16 %v1214_v55, %v1213_v27 }
 0x1cd   : > { %v1202_v31 = vadd.f32 %v2106_v54, %v1164_v34  ;;  %v1216_v3 = vmax.f32 %v1200_v2, 0.0  ;;  %1271 = vst [vmem:[%s2148_s21 + $0x20] sm:$0xff] %v1465_v20 }
 0x1ce   : > { %1272 = vst [vmem:[%s2148_s21 + $0x28] sm:$0xff] %v1466_v39 }
 0x1cf   : > { %v1218_v30 = vmax.f32 %v1202_v31, 0.0  ;;  %v1467_v23 = vpack.c.bf16 %v1216_v3, %v1215_v56 }
 0x1d1   : > { %v1468_v24 = vpack.c.bf16 %v1218_v30, %v1217_v22  ;;  %1273 = vst [vmem:[%s2148_s21 + $0x30] sm:$0xff] %v1467_v23 }
 0x1d3   : > { %1274 = vst [vmem:[%s2148_s21 + $0x38] sm:$0xff] %v1468_v24 }
 0x1d4 PF: > { %s16_s15 = sadd.s32 1, %s1615_s15  }
 0x1d5   : > { %p13_p7 = scmp.ge.s32.totalorder %s16_s15, 7  }
 0x1d7   :  { %15 = sbr.rel (!%p13_p7) target bundleno = 2 (0x2), region = 79 }
 0x1de   :  { %1299 = vsyncpa [#allocation3], 1 }
 0x1df   :  { %1301 = vsyncpa [#allocation3 + $0x1], 1 }
 0x1e0   :  { %1302 = vsyncpa [#allocation5], 1 }

// kernel: generator_forward.13
= control target key start
LH: loop header
LB: loop body
LE: loop exit
PB: predicated region body
PF: predicated region fallthrough
CT: control target
= control target key end

     0   :  { %s1428_s9 = smov 0   ;;  %s1631_s0 = inlined_call_operand.vmem [shape: bf16[640,512], index: 0, kind: input, shape index: {}]   ;;  %s1632_s1 = inlined_call_operand.vmem [shape: bf16[512,64], index: 1, kind: input, shape index: {}]   ;;  %s1633_s2 = inlined_call_operand.vmem [shape: bf16[640,64], index: 2, kind: output, shape index: {}]  }
   0x1 LB: > { %s1030_s10 = sadd.s32 4294967295, %s1411_s9   ;;  %p1034_p0 = scmp.ge.s32.totalorder %s1411_s9, 1  ;;  %s1411_s9 = sphi %s1428_s9, %s12_s9  }
   0x2   : > { %p114_p1 = scmp.lt.s32.totalorder %s1411_s9, 5 }
   0x4   : > { %p115_p2 = pnand %p1034_p0, %p114_p1 }
   0x5   : > { %v1313_v0 = vld [vmem:[%s1632_s1 + $0x40] sm:$0xff] (!%p115_p2)   ;;  %v1317_v4 = vld [vmem:[%s1632_s1 + $0x48] sm:$0xff] (!%p115_p2)   ;;  %v1321_v8 = vld [vmem:[%s1632_s1 + $0x50] sm:$0xff] (!%p115_p2)   ;;  %s137_s15 = smul.u32 (!%p115_p2), 20, %s1030_s10  ;;  %vm953_vm0 = vcmask (!%p115_p2), 519168  }
   0x6   : > { %118 = sbr.rel (%p115_p2) target bundleno = 334 (0x14e), region = 28  ;;  %v1314_v1 = vld [vmem:[%s1632_s1 + $0xc0] sm:$0xff] (!%p115_p2)   ;;  %1153 = vmatprep.subr.bf16.mxu0 (!%p115_p2), %v1313_v0  ;;  %v1318_v5 = vld [vmem:[%s1632_s1 + $0xc8] sm:$0xff] (!%p115_p2)   ;;  %v1322_v9 = vld [vmem:[%s1632_s1 + $0xd0] sm:$0xff] (!%p115_p2)  }
   0x7   : > { %v1315_v2 = vld [vmem:[%s1632_s1] sm:$0xff] (!%p115_p2)   ;;  %1229 = vmatprep.subr.bf16.mxu1 (!%p115_p2), %v1314_v1  ;;  %v1319_v6 = vld [vmem:[%s1632_s1 + $0x8] sm:$0xff] (!%p115_p2)   ;;  %v1323_v10 = vld [vmem:[%s1632_s1 + $0x10] sm:$0xff] (!%p115_p2)   ;;  %p138_p3 = scmp.lt.s32.totalorder (!%p115_p2), %s137_s15, 79 }
   0x8   : > { %v1316_v3 = vld [vmem:[%s1632_s1 + $0x80] sm:$0xff] (!%p115_p2)   ;;  %1154 = vmatpush3.bf16.msra.mxu0 (!%p115_p2), %v1315_v2  ;;  %v1320_v7 = vld [vmem:[%s1632_s1 + $0x88] sm:$0xff] (!%p115_p2)   ;;  %v1324_v11 = vld [vmem:[%s1632_s1 + $0x90] sm:$0xff] (!%p115_p2)  }
   0x9   : > { %1230 = vmatpush3.bf16.msra.mxu1 (!%p115_p2), %v1316_v3  ;;  %1155 = vmatprep.subr.bf16.mxu0 (!%p115_p2), %v1317_v4  ;;  %v1325_v12 = vld [vmem:[%s1632_s1 + $0x58] sm:$0xff] (!%p115_p2)   ;;  %v1329_v16 = vld [vmem:[%s1632_s1 + $0x60] sm:$0xff] (!%p115_p2)   ;;  %v1333_v20 = vld [vmem:[%s1632_s1 + $0x68] sm:$0xff] (!%p115_p2)  }
   0xa   : > { %1231 = vmatprep.subr.bf16.mxu1 (!%p115_p2), %v1318_v5  ;;  %v1326_v13 = vld [vmem:[%s1632_s1 + $0xd8] sm:$0xff] (!%p115_p2)   ;;  %v1330_v17 = vld [vmem:[%s1632_s1 + $0xe0] sm:$0xff] (!%p115_p2)   ;;  %v1334_v21 = vld [vmem:[%s1632_s1 + $0xe8] sm:$0xff] (!%p115_p2)  }
   0xb   : > { %v1327_v14 = vld [vmem:[%s1632_s1 + $0x18] sm:$0xff] (!%p115_p2)   ;;  %v1331_v18 = vld [vmem:[%s1632_s1 + $0x20] sm:$0xff] (!%p115_p2)   ;;  %v1335_v22 = vld [vmem:[%s1632_s1 + $0x28] sm:$0xff] (!%p115_p2)  }
   0xc   : > { %1156 = vmatpush3.bf16.msra.mxu0 (!%p115_p2), %v1319_v6  ;;  %v1328_v15 = vld [vmem:[%s1632_s1 + $0x98] sm:$0xff] (!%p115_p2)   ;;  %v1332_v19 = vld [vmem:[%s1632_s1 + $0xa0] sm:$0xff] (!%p115_p2)   ;;  %v1336_v23 = vld [vmem:[%s1632_s1 + $0xa8] sm:$0xff] (!%p115_p2)  }
   0xd   : > { %1232 = vmatpush3.bf16.msra.mxu1 %v1320_v7  ;;  %1157 = vmatprep.subr.bf16.mxu0 %v1321_v8  ;;  %s1635_s15 = smov (!%p138_p3, %s137_s15), 79  ;;  %v1337_v24 = vld [vmem:[%s1632_s1 + $0x70] sm:$0xff]   ;;  %v1341_v28 = vld [vmem:[%s1632_s1 + $0x78] sm:$0xff]  }
   0xe   : > { %1233 = vmatprep.subr.bf16.mxu1 %v1322_v9  ;;  %v1338_v25 = vld [vmem:[%s1632_s1 + $0xf0] sm:$0xff]   ;;  %s1132_s13 = sshll.u32 %s1635_s15, 4  ;;  %v1342_v29 = vld [vmem:[%s1632_s1 + $0xf8] sm:$0xff]   ;;  %s1037_s27 = sshll.u32 %s1635_s15, 2 }
   0xf   : > { %v1339_v26 = vld [vmem:[%s1632_s1 + $0x30] sm:$0xff]   ;;  %s1534_s23 = scalar_lea.vmem %s1631_s0, %s1132_s13  ;;  %v1343_v30 = vld [vmem:[%s1632_s1 + $0x38] sm:$0xff]   ;;  %s1586_s30 = scalar_lea.vmem %s1633_s2, %s1037_s27 }
  0x10   : > { %1158 = vmatpush3.bf16.msra.mxu0 %v1323_v10  ;;  %v1340_v27 = vld [vmem:[%s1632_s1 + $0xb0] sm:$0xff]   ;;  %v1344_v31 = vld [vmem:[%s1632_s1 + $0xb8] sm:$0xff]  }
  0x11   : > { %1234 = vmatpush3.bf16.msra.mxu1 %v1324_v11  ;;  %1159 = vmatprep.subr.bf16.mxu0 %v1325_v12  ;;  %v1345_v32 = vld [vmem:[%s1534_s23] ss:$16 sps:$4 sm:$0xff]   ;;  %v1347_v33 = vld [vmem:[%s1534_s23 + $0x4] ss:$16 sps:$4 sm:$0xff]   ;;  %v1348_v34 = vld [vmem:[%s1534_s23 + $0x8] ss:$16 sps:$4 sm:$0xff]  }
  0x12   : > { %1235 = vmatprep.subr.bf16.mxu1 %v1326_v13  ;;  %v1350_v35 = vld [vmem:[%s1534_s23 + $0xc] ss:$16 sps:$4 sm:$0xff]   ;;  %679 = vmatprep.mubr.bf16.mxu0 %v1347_v33  ;;  %v1351_v36 = vld [vmem:[%s1534_s23 + $0x24] ss:$16 sps:$4 sm:$0xff]   ;;  %v1355_v38 = vld [vmem:[%s1534_s23 + $0x20] ss:$16 sps:$4 sm:$0xff]  }
  0x13   : > { %792 = vmatprep.mubr.bf16.mxu1 %v1350_v35  ;;  %v1353_v37 = vld [vmem:[%s1534_s23 + $0x2c] ss:$16 sps:$4 sm:$0xff]   ;;  %v1356_v39 = vld [vmem:[%s1534_s23 + $0x28] ss:$16 sps:$4 sm:$0xff]   ;;  %v1357_v40 = vld [vmem:[%s1534_s23 + $0x44] ss:$16 sps:$4 sm:$0xff]  }
  0x14   : > { %1160 = vmatpush3.bf16.msra.mxu0 %v1327_v14  ;;  %v1359_v41 = vld [vmem:[%s1534_s23 + $0x4c] ss:$16 sps:$4 sm:$0xff]   ;;  %v1361_v42 = vld [vmem:[%s1534_s23 + $0x40] ss:$16 sps:$4 sm:$0xff]   ;;  %v1362_v43 = vld [vmem:[%s1534_s23 + $0x48] ss:$16 sps:$4 sm:$0xff]  }
  0x15   : > { %1236 = vmatpush3.bf16.msra.mxu1 %v1328_v15  ;;  %1161 = vmatprep.subr.bf16.mxu0 %v1329_v16  ;;  %v1363_v44 = vld [vmem:[%s1534_s23 + $0x64] ss:$16 sps:$4 sm:$0xff]   ;;  %v1365_v45 = vld [vmem:[%s1534_s23 + $0x6c] ss:$16 sps:$4 sm:$0xff]   ;;  %v1367_v46 = vld [vmem:[%s1534_s23 + $0x60] ss:$16 sps:$4 sm:$0xff]  }
  0x16   : > { %1237 = vmatprep.subr.bf16.mxu1 %v1330_v17  ;;  %v1368_v47 = vld [vmem:[%s1534_s23 + $0x68] ss:$16 sps:$4 sm:$0xff]   ;;  %v1369_v48 = vld [vmem:[%s1534_s23 + $0x84] ss:$16 sps:$4 sm:$0xff]   ;;  %v1371_v49 = vld [vmem:[%s1534_s23 + $0x8c] ss:$16 sps:$4 sm:$0xff]  }
  0x17   : > { %v1373_v50 = vld [vmem:[%s1534_s23 + $0x80] ss:$16 sps:$4 sm:$0xff]   ;;  %v1374_v51 = vld [vmem:[%s1534_s23 + $0x88] ss:$16 sps:$4 sm:$0xff]   ;;  %v1375_v52 = vld [vmem:[%s1534_s23 + $0xa4] ss:$16 sps:$4 sm:$0xff]  }
  0x18   : > { %1162 = vmatpush3.bf16.msra.mxu0 %v1331_v18  ;;  %v1377_v53 = vld [vmem:[%s1534_s23 + $0xac] ss:$16 sps:$4 sm:$0xff]   ;;  %v1379_v54 = vld [vmem:[%s1534_s23 + $0xa0] ss:$16 sps:$4 sm:$0xff]   ;;  %v1380_v55 = vld [vmem:[%s1534_s23 + $0xa8] ss:$16 sps:$4 sm:$0xff]  }
  0x19   : > { %1238 = vmatpush3.bf16.msra.mxu1 %v1332_v19  ;;  %1163 = vmatprep.subr.bf16.mxu0 %v1333_v20  ;;  %v1381_v56 = vld [vmem:[%s1534_s23 + $0xc4] ss:$16 sps:$4 sm:$0xff]   ;;  %v1383_v57 = vld [vmem:[%s1534_s23 + $0xcc] ss:$16 sps:$4 sm:$0xff]   ;;  %v1385_v58 = vld [vmem:[%s1534_s23 + $0xc0] ss:$16 sps:$4 sm:$0xff]  }
  0x1a   : > { %1239 = vmatprep.subr.bf16.mxu1 %v1334_v21  ;;  %v1386_v59 = vld [vmem:[%s1534_s23 + $0xc8] ss:$16 sps:$4 sm:$0xff]   ;;  %v1387_v60 = vld [vmem:[%s1534_s23 + $0xe4] ss:$16 sps:$4 sm:$0xff]   ;;  %v1389_v61 = vld [vmem:[%s1534_s23 + $0xec] ss:$16 sps:$4 sm:$0xff]  }
  0x1b   : > { %v1391_v62 = vld [vmem:[%s1534_s23 + $0xe0] ss:$16 sps:$4 sm:$0xff]   ;;  %v1392_v63 = vld [vmem:[%s1534_s23 + $0xe8] ss:$16 sps:$4 sm:$0xff]   ;;  %v1393_v0 = vld [vmem:[%s1534_s23 + $0x104] ss:$16 sps:$4 sm:$0xff]  }
  0x1c   : > { %1164 = vmatpush3.bf16.msra.mxu0 %v1335_v22  ;;  %v1395_v1 = vld [vmem:[%s1534_s23 + $0x10c] ss:$16 sps:$4 sm:$0xff]   ;;  %v1397_v2 = vld [vmem:[%s1534_s23 + $0x100] ss:$16 sps:$4 sm:$0xff]   ;;  %v1398_v3 = vld [vmem:[%s1534_s23 + $0x108] ss:$16 sps:$4 sm:$0xff]  }
  0x1d   : > { %1240 = vmatpush3.bf16.msra.mxu1 %v1336_v23  ;;  %1165 = vmatprep.subr.bf16.mxu0 %v1337_v24  ;;  %v1399_v4 = vld [vmem:[%s1534_s23 + $0x124] ss:$16 sps:$4 sm:$0xff]   ;;  %v1401_v5 = vld [vmem:[%s1534_s23 + $0x12c] ss:$16 sps:$4 sm:$0xff]   ;;  %v1403_v6 = vld [vmem:[%s1534_s23 + $0x120] ss:$16 sps:$4 sm:$0xff]  }
  0x1e   : > { %1241 = vmatprep.subr.bf16.mxu1 %v1338_v25  ;;  %v1404_v7 = vld [vmem:[%s1534_s23 + $0x128] ss:$16 sps:$4 sm:$0xff]  }
  0x20   : > { %1166 = vmatpush3.bf16.msra.mxu0 %v1339_v26 }
  0x21   : > { %1242 = vmatpush3.bf16.msra.mxu1 %v1340_v27  ;;  %1167 = vmatprep.subr.bf16.mxu0 %v1341_v28 }
  0x22   : > { %1243 = vmatprep.subr.bf16.mxu1 %v1342_v29 }
  0x24   : > { %1168 = vmatpush3.bf16.msra.mxu0 %v1343_v30 }
  0x25   : > { %1244 = vmatpush3.bf16.msra.mxu1 %v1344_v31 }
  0x27   : > { %680 = vmatmul.mubr.bf16.vlgmr.msra.gmra.mrb[0].mxu0 %v1345_v32 }
  0x28   : > { %793 = vmatmul.mubr.bf16.vlgmr.msra.gmra.mrb[0].mxu1 %v1348_v34  ;;  %687 = vmatprep.mubr.bf16.mxu0 %v1351_v36 }
  0x29   : > { %800 = vmatprep.mubr.bf16.mxu1 %v1353_v37 }
  0x2f   : > { %688 = vmatmul.mubr.bf16.gmra.mrb[4].mxu0 %v1355_v38 }
  0x30   : > { %801 = vmatmul.mubr.bf16.gmra.mrb[4].mxu1 %v1356_v39  ;;  %695 = vmatprep.mubr.bf16.mxu0 %v1357_v40 }
  0x31   : > { %808 = vmatprep.mubr.bf16.mxu1 %v1359_v41 }
  0x37   : > { %696 = vmatmul.mubr.bf16.gmra.mrb[8].mxu0 %v1361_v42 }
  0x38   : > { %809 = vmatmul.mubr.bf16.gmra.mrb[8].mxu1 %v1362_v43  ;;  %703 = vmatprep.mubr.bf16.mxu0 %v1363_v44 }
  0x39   : > { %816 = vmatprep.mubr.bf16.mxu1 %v1365_v45 }
  0x3f   : > { %704 = vmatmul.mubr.bf16.gmra.mrb[12].mxu0 %v1367_v46 }
  0x40   : > { %817 = vmatmul.mubr.bf16.gmra.mrb[12].mxu1 %v1368_v47  ;;  %711 = vmatprep.mubr.bf16.mxu0 %v1369_v48 }
  0x41   : > { %824 = vmatprep.mubr.bf16.mxu1 %v1371_v49 }
  0x47   : > { %712 = vmatmul.mubr.bf16.gmra.mrb[16].mxu0 %v1373_v50 }
  0x48   : > { %825 = vmatmul.mubr.bf16.gmra.mrb[16].mxu1 %v1374_v51  ;;  %719 = vmatprep.mubr.bf16.mxu0 %v1375_v52 }
  0x49   : > { %832 = vmatprep.mubr.bf16.mxu1 %v1377_v53 }
  0x4f   : > { %720 = vmatmul.mubr.bf16.gmra.mrb[20].mxu0 %v1379_v54 }
  0x50   : > { %833 = vmatmul.mubr.bf16.gmra.mrb[20].mxu1 %v1380_v55  ;;  %727 = vmatprep.mubr.bf16.mxu0 %v1381_v56 }
  0x51   : > { %840 = vmatprep.mubr.bf16.mxu1 %v1383_v57 }
  0x57   : > { %728 = vmatmul.mubr.bf16.gmra.mrb[24].mxu0 %v1385_v58 }
  0x58   : > { %841 = vmatmul.mubr.bf16.gmra.mrb[24].mxu1 %v1386_v59  ;;  %735 = vmatprep.mubr.bf16.mxu0 %v1387_v60 }
  0x59   : > { %848 = vmatprep.mubr.bf16.mxu1 %v1389_v61 }
  0x5f   : > { %736 = vmatmul.mubr.bf16.gmra.mrb[28].mxu0 %v1391_v62 }
  0x60   : > { %849 = vmatmul.mubr.bf16.gmra.mrb[28].mxu1 %v1392_v63  ;;  %743 = vmatprep.mubr.bf16.mxu0 %v1393_v0 }
  0x61   : > { %856 = vmatprep.mubr.bf16.mxu1 %v1395_v1 }
  0x67   : > { %744 = vmatmul.mubr.bf16.gmra.mrb[32].mxu0 %v1397_v2 }
  0x68   : > { %857 = vmatmul.mubr.bf16.gmra.mrb[32].mxu1 %v1398_v3  ;;  %751 = vmatprep.mubr.bf16.mxu0 %v1399_v4 }
  0x69   : > { %864 = vmatprep.mubr.bf16.mxu1 %v1401_v5 }
  0x6f   : > { %752 = vmatmul.mubr.bf16.gmra.mrb[36].mxu0 %v1403_v6 }
  0x70   : > { %865 = vmatmul.mubr.bf16.gmra.mrb[36].mxu1 %v1404_v7 }
  0xfa   : > { %v1169_v8 = vpop.f32.mrb[0].mxu0 }
  0xfb   : > { %v1245_v9 = vpop.f32.mrb[0].mxu1  ;;  %v1170_v10 = vpop.f32.mrb[1].mxu0 }
  0xfc   : > { %v1171_v11 = vadd.f32 %v1170_v10, %v1169_v8  ;;  %v1246_v12 = vpop.f32.mrb[1].mxu1  ;;  %v1172_v13 = vpop.f32.mrb[2].mxu0 }
  0xfd   : > { %v1247_v14 = vadd.f32 %v1246_v12, %v1245_v9  ;;  %v1248_v15 = vpop.f32.mrb[2].mxu1  ;;  %v1173_v16 = vpop.f32.mrb[3].mxu0 }
  0xfe   : > { %v1174_v17 = vadd.f32 %v1173_v16, %v1172_v13  ;;  %v1249_v18 = vpop.f32.mrb[3].mxu1 }
  0xff   : > { %v795_v19 = vadd.f32 %v1247_v14, %v1171_v11  ;;  %v1250_v20 = vadd.f32 %v1249_v18, %v1248_v15 }
 0x101   : > { %v1133_v21 = vpack.c.bf16 %v795_v19, %v795_v19  ;;  %v798_v22 = vadd.f32 %v1250_v20, %v1174_v17 }
 0x102   : > { %v1175_v23 = vpop.f32.mrb[4].mxu0 }
 0x103   : > { %954 = vst.msk [vmem:[%s1586_s30] sm:$0xf] %vm953_vm0, %v1133_v21  ;;  %v1134_v24 = vpack.c.bf16 %v798_v22, %v798_v22  ;;  %v1251_v25 = vpop.f32.mrb[4].mxu1  ;;  %v1176_v26 = vpop.f32.mrb[5].mxu0 }
 0x104   : > { %v1177_v27 = vadd.f32 %v1176_v26, %v1175_v23  ;;  %v1252_v28 = vpop.f32.mrb[5].mxu1  ;;  %v1178_v29 = vpop.f32.mrb[6].mxu0 }
 0x105   : > { %955 = vst.msk [vmem:[%s1586_s30 + $0x4] sm:$0xf] %vm953_vm0, %v1134_v24  ;;  %v1253_v30 = vadd.f32 %v1252_v28, %v1251_v25  ;;  %v1254_v31 = vpop.f32.mrb[6].mxu1  ;;  %v1179_v32 = vpop.f32.mrb[7].mxu0 }
 0x106   : > { %v1180_v33 = vadd.f32 %v1179_v32, %v1178_v29  ;;  %v1255_v34 = vpop.f32.mrb[7].mxu1 }
 0x107   : > { %v803_v35 = vadd.f32 %v1253_v30, %v1177_v27  ;;  %v1256_v36 = vadd.f32 %v1255_v34, %v1254_v31 }
 0x109   : > { %v1135_v37 = vpack.c.bf16 %v803_v35, %v803_v35  ;;  %v806_v38 = vadd.f32 %v1256_v36, %v1180_v33 }
 0x10a   : > { %v1181_v39 = vpop.f32.mrb[8].mxu0 }
 0x10b   : > { %956 = vst.msk [vmem:[%s1586_s30 + $0x8] sm:$0xf] %vm953_vm0, %v1135_v37  ;;  %v1136_v40 = vpack.c.bf16 %v806_v38, %v806_v38  ;;  %v1257_v41 = vpop.f32.mrb[8].mxu1  ;;  %v1182_v42 = vpop.f32.mrb[9].mxu0 }
 0x10c   : > { %v1183_v43 = vadd.f32 %v1182_v42, %v1181_v39  ;;  %v1258_v44 = vpop.f32.mrb[9].mxu1  ;;  %v1184_v45 = vpop.f32.mrb[10].mxu0 }
 0x10d   : > { %957 = vst.msk [vmem:[%s1586_s30 + $0xc] sm:$0xf] %vm953_vm0, %v1136_v40  ;;  %v1259_v46 = vadd.f32 %v1258_v44, %v1257_v41  ;;  %v1260_v47 = vpop.f32.mrb[10].mxu1  ;;  %v1185_v48 = vpop.f32.mrb[11].mxu0 }
 0x10e   : > { %v1186_v49 = vadd.f32 %v1185_v48, %v1184_v45  ;;  %v1261_v50 = vpop.f32.mrb[11].mxu1 }
 0x10f   : > { %v811_v51 = vadd.f32 %v1259_v46, %v1183_v43  ;;  %v1262_v52 = vadd.f32 %v1261_v50, %v1260_v47 }
 0x111   : > { %v1137_v53 = vpack.c.bf16 %v811_v51, %v811_v51  ;;  %v814_v54 = vadd.f32 %v1262_v52, %v1186_v49 }
 0x112   : > { %v1187_v55 = vpop.f32.mrb[12].mxu0 }
 0x113   : > { %958 = vst.msk [vmem:[%s1586_s30 + $0x10] sm:$0xf] %vm953_vm0, %v1137_v53  ;;  %v1138_v56 = vpack.c.bf16 %v814_v54, %v814_v54  ;;  %v1263_v57 = vpop.f32.mrb[12].mxu1  ;;  %v1188_v58 = vpop.f32.mrb[13].mxu0 }
 0x114   : > { %v1189_v59 = vadd.f32 %v1188_v58, %v1187_v55  ;;  %v1264_v60 = vpop.f32.mrb[13].mxu1  ;;  %v1190_v61 = vpop.f32.mrb[14].mxu0 }
 0x115   : > { %959 = vst.msk [vmem:[%s1586_s30 + $0x14] sm:$0xf] %vm953_vm0, %v1138_v56  ;;  %v1265_v62 = vadd.f32 %v1264_v60, %v1263_v57  ;;  %v1266_v63 = vpop.f32.mrb[14].mxu1  ;;  %v1191_v0 = vpop.f32.mrb[15].mxu0 }
 0x116   : > { %v1192_v1 = vadd.f32 %v1191_v0, %v1190_v61  ;;  %v1267_v2 = vpop.f32.mrb[15].mxu1 }
 0x117   : > { %v819_v3 = vadd.f32 %v1265_v62, %v1189_v59  ;;  %v1268_v4 = vadd.f32 %v1267_v2, %v1266_v63 }
 0x119   : > { %v1139_v5 = vpack.c.bf16 %v819_v3, %v819_v3  ;;  %v822_v6 = vadd.f32 %v1268_v4, %v1192_v1 }
 0x11a   : > { %v1193_v7 = vpop.f32.mrb[16].mxu0 }
 0x11b   : > { %960 = vst.msk [vmem:[%s1586_s30 + $0x18] sm:$0xf] %vm953_vm0, %v1139_v5  ;;  %v1140_v8 = vpack.c.bf16 %v822_v6, %v822_v6  ;;  %v1269_v9 = vpop.f32.mrb[16].mxu1  ;;  %v1194_v10 = vpop.f32.mrb[17].mxu0 }
 0x11c   : > { %v1195_v11 = vadd.f32 %v1194_v10, %v1193_v7  ;;  %v1270_v12 = vpop.f32.mrb[17].mxu1  ;;  %v1196_v13 = vpop.f32.mrb[18].mxu0 }
 0x11d   : > { %961 = vst.msk [vmem:[%s1586_s30 + $0x1c] sm:$0xf] %vm953_vm0, %v1140_v8  ;;  %v1271_v14 = vadd.f32 %v1270_v12, %v1269_v9  ;;  %v1272_v15 = vpop.f32.mrb[18].mxu1  ;;  %v1197_v16 = vpop.f32.mrb[19].mxu0 }
 0x11e   : > { %v1198_v17 = vadd.f32 %v1197_v16, %v1196_v13  ;;  %v1273_v18 = vpop.f32.mrb[19].mxu1 }
 0x11f   : > { %v827_v19 = vadd.f32 %v1271_v14, %v1195_v11  ;;  %v1274_v20 = vadd.f32 %v1273_v18, %v1272_v15 }
 0x121   : > { %v1141_v21 = vpack.c.bf16 %v827_v19, %v827_v19  ;;  %v830_v22 = vadd.f32 %v1274_v20, %v1198_v17 }
 0x122   : > { %v1199_v23 = vpop.f32.mrb[20].mxu0 }
 0x123   : > { %962 = vst.msk [vmem:[%s1586_s30 + $0x20] sm:$0xf] %vm953_vm0, %v1141_v21  ;;  %v1142_v24 = vpack.c.bf16 %v830_v22, %v830_v22  ;;  %v1275_v25 = vpop.f32.mrb[20].mxu1  ;;  %v1200_v26 = vpop.f32.mrb[21].mxu0 }
 0x124   : > { %v1201_v27 = vadd.f32 %v1200_v26, %v1199_v23  ;;  %v1276_v28 = vpop.f32.mrb[21].mxu1  ;;  %v1202_v29 = vpop.f32.mrb[22].mxu0 }
 0x125   : > { %963 = vst.msk [vmem:[%s1586_s30 + $0x24] sm:$0xf] %vm953_vm0, %v1142_v24  ;;  %v1277_v30 = vadd.f32 %v1276_v28, %v1275_v25  ;;  %v1278_v31 = vpop.f32.mrb[22].mxu1  ;;  %v1203_v32 = vpop.f32.mrb[23].mxu0 }
 0x126   : > { %v1204_v33 = vadd.f32 %v1203_v32, %v1202_v29  ;;  %v1279_v34 = vpop.f32.mrb[23].mxu1 }
 0x127   : > { %v835_v35 = vadd.f32 %v1277_v30, %v1201_v27  ;;  %v1280_v36 = vadd.f32 %v1279_v34, %v1278_v31 }
 0x129   : > { %v1143_v37 = vpack.c.bf16 %v835_v35, %v835_v35  ;;  %v838_v38 = vadd.f32 %v1280_v36, %v1204_v33 }
 0x12a   : > { %v1205_v39 = vpop.f32.mrb[24].mxu0 }
 0x12b   : > { %964 = vst.msk [vmem:[%s1586_s30 + $0x28] sm:$0xf] %vm953_vm0, %v1143_v37  ;;  %v1144_v40 = vpack.c.bf16 %v838_v38, %v838_v38  ;;  %v1281_v41 = vpop.f32.mrb[24].mxu1  ;;  %v1206_v42 = vpop.f32.mrb[25].mxu0 }
 0x12c   : > { %v1207_v43 = vadd.f32 %v1206_v42, %v1205_v39  ;;  %v1282_v44 = vpop.f32.mrb[25].mxu1  ;;  %v1208_v45 = vpop.f32.mrb[26].mxu0 }
 0x12d   : > { %965 = vst.msk [vmem:[%s1586_s30 + $0x2c] sm:$0xf] %vm953_vm0, %v1144_v40  ;;  %v1283_v46 = vadd.f32 %v1282_v44, %v1281_v41  ;;  %v1284_v47 = vpop.f32.mrb[26].mxu1  ;;  %v1209_v48 = vpop.f32.mrb[27].mxu0 }
 0x12e   : > { %v1210_v49 = vadd.f32 %v1209_v48, %v1208_v45  ;;  %v1285_v50 = vpop.f32.mrb[27].mxu1 }
 0x12f   : > { %v843_v51 = vadd.f32 %v1283_v46, %v1207_v43  ;;  %v1286_v52 = vadd.f32 %v1285_v50, %v1284_v47 }
 0x131   : > { %v1145_v53 = vpack.c.bf16 %v843_v51, %v843_v51  ;;  %v846_v54 = vadd.f32 %v1286_v52, %v1210_v49 }
 0x132   : > { %v1211_v55 = vpop.f32.mrb[28].mxu0 }
 0x133   : > { %966 = vst.msk [vmem:[%s1586_s30 + $0x30] sm:$0xf] %vm953_vm0, %v1145_v53  ;;  %v1146_v56 = vpack.c.bf16 %v846_v54, %v846_v54  ;;  %v1287_v57 = vpop.f32.mrb[28].mxu1  ;;  %v1212_v58 = vpop.f32.mrb[29].mxu0 }
 0x134   : > { %v1213_v59 = vadd.f32 %v1212_v58, %v1211_v55  ;;  %v1288_v60 = vpop.f32.mrb[29].mxu1  ;;  %v1214_v61 = vpop.f32.mrb[30].mxu0 }
 0x135   : > { %967 = vst.msk [vmem:[%s1586_s30 + $0x34] sm:$0xf] %vm953_vm0, %v1146_v56  ;;  %v1289_v62 = vadd.f32 %v1288_v60, %v1287_v57  ;;  %v1290_v63 = vpop.f32.mrb[30].mxu1  ;;  %v1215_v0 = vpop.f32.mrb[31].mxu0 }
 0x136   : > { %v1216_v1 = vadd.f32 %v1215_v0, %v1214_v61  ;;  %v1291_v2 = vpop.f32.mrb[31].mxu1 }
 0x137   : > { %v851_v3 = vadd.f32 %v1289_v62, %v1213_v59  ;;  %v1292_v4 = vadd.f32 %v1291_v2, %v1290_v63 }
 0x139   : > { %v1147_v5 = vpack.c.bf16 %v851_v3, %v851_v3  ;;  %v854_v6 = vadd.f32 %v1292_v4, %v1216_v1 }
 0x13a   : > { %v1217_v7 = vpop.f32.mrb[32].mxu0 }
 0x13b   : > { %968 = vst.msk [vmem:[%s1586_s30 + $0x38] sm:$0xf] %vm953_vm0, %v1147_v5  ;;  %v1148_v8 = vpack.c.bf16 %v854_v6, %v854_v6  ;;  %v1293_v9 = vpop.f32.mrb[32].mxu1  ;;  %v1218_v10 = vpop.f32.mrb[33].mxu0 }
 0x13c   : > { %v1219_v11 = vadd.f32 %v1218_v10, %v1217_v7  ;;  %v1294_v12 = vpop.f32.mrb[33].mxu1  ;;  %v1220_v13 = vpop.f32.mrb[34].mxu0 }
 0x13d   : > { %969 = vst.msk [vmem:[%s1586_s30 + $0x3c] sm:$0xf] %vm953_vm0, %v1148_v8  ;;  %v1295_v14 = vadd.f32 %v1294_v12, %v1293_v9  ;;  %v1296_v15 = vpop.f32.mrb[34].mxu1  ;;  %v1221_v16 = vpop.f32.mrb[35].mxu0 }
 0x13e   : > { %v1222_v17 = vadd.f32 %v1221_v16, %v1220_v13  ;;  %v1297_v18 = vpop.f32.mrb[35].mxu1 }
 0x13f   : > { %v859_v19 = vadd.f32 %v1295_v14, %v1219_v11  ;;  %v1298_v20 = vadd.f32 %v1297_v18, %v1296_v15 }
 0x141   : > { %v1149_v21 = vpack.c.bf16 %v859_v19, %v859_v19  ;;  %v862_v22 = vadd.f32 %v1298_v20, %v1222_v17 }
 0x142   : > { %v1223_v23 = vpop.f32.mrb[36].mxu0 }
 0x143   : > { %970 = vst.msk [vmem:[%s1586_s30 + $0x40] sm:$0xf] %vm953_vm0, %v1149_v21  ;;  %v1150_v24 = vpack.c.bf16 %v862_v22, %v862_v22  ;;  %v1299_v25 = vpop.f32.mrb[36].mxu1  ;;  %v1224_v26 = vpop.f32.mrb[37].mxu0 }
 0x144   : > { %v1225_v27 = vadd.f32 %v1224_v26, %v1223_v23  ;;  %v1300_v28 = vpop.f32.mrb[37].mxu1  ;;  %v1226_v29 = vpop.f32.mrb[38].mxu0 }
 0x145   : > { %971 = vst.msk [vmem:[%s1586_s30 + $0x44] sm:$0xf] %vm953_vm0, %v1150_v24  ;;  %v1301_v30 = vadd.f32 %v1300_v28, %v1299_v25  ;;  %v1302_v31 = vpop.f32.mrb[38].mxu1  ;;  %v1227_v32 = vpop.f32.mrb[39].mxu0 }
 0x146   : > { %v1228_v33 = vadd.f32 %v1227_v32, %v1226_v29  ;;  %v1303_v34 = vpop.f32.mrb[39].mxu1 }
 0x147   : > { %v867_v35 = vadd.f32 %v1301_v30, %v1225_v27  ;;  %v1304_v36 = vadd.f32 %v1303_v34, %v1302_v31 }
 0x149   : > { %v1151_v37 = vpack.c.bf16 %v867_v35, %v867_v35  ;;  %v870_v38 = vadd.f32 %v1304_v36, %v1228_v33 }
 0x14b   : > { %972 = vst.msk [vmem:[%s1586_s30 + $0x48] sm:$0xf] %vm953_vm0, %v1151_v37  ;;  %v1152_v39 = vpack.c.bf16 %v870_v38, %v870_v38 }
 0x14d   : > { %973 = vst.msk [vmem:[%s1586_s30 + $0x4c] sm:$0xf] %vm953_vm0, %v1152_v39 }
 0x14e PF: > { %s12_s9 = sadd.s32 1, %s1411_s9  }
 0x14f   : > { %p9_p4 = scmp.ge.s32.totalorder %s12_s9, 6  }
 0x151   :  { %11 = sbr.rel (!%p9_p4) target bundleno = 1 (0x1), region = 58 }

// kernel: generator_forward.14
= control target key start
LH: loop header
LB: loop body
LE: loop exit
PB: predicated region body
PF: predicated region fallthrough
CT: control target
= control target key end

     0   :  { %s426_s25 = smov 64   ;;  %vm234_vm0 = vcmask 523264   ;;  %s674_s0 = inlined_call_operand.vmem [shape: bf16[40,1024], index: 0, kind: input, shape index: {}]   ;;  %s675_s1 = inlined_call_operand.vmem [shape: f32[1,256], index: 1, kind: input, shape index: {}]   ;;  %s676_s2 = inlined_call_operand.vmem [shape: f32[1,256], index: 2, kind: input, shape index: {}]   ;;  %s677_s3 = inlined_call_operand.vmem [shape: bf16[40,256], index: 3, kind: output, shape index: {}]  }
   0x1   :  { %v450_v0 = vld [vmem:[%s674_s0] sm:$0xff]  ;;  %v460_v2 = vld [vmem:[%s674_s0 + $0x10] sm:$0xff]  ;;  %v474_v8 = vld [vmem:[%s674_s0 + $0x8] sm:$0xff] }
   0x2   :  { %v455_v1 = vld [vmem:[%s674_s0 + $0x20] sm:$0xff]  ;;  %v25_v3 = vunpack.c.h.bf16 %v450_v0  ;;  %v468_v6 = vld [vmem:[%s674_s0 + $0x30] sm:$0xff]  ;;  %v54_v7 = vunpack.c.l.bf16 %v460_v2  ;;  %v55_v10 = vunpack.c.h.bf16 %v460_v2  ;;  %v24_v13 = vunpack.c.l.bf16 %v450_v0  ;;  %v488_v14 = vld [vmem:[%s674_s0 + $0x18] sm:$0xff] }
   0x3   :  { %v28_v4 = vunpack.c.l.bf16 %v455_v1  ;;  %v29_v5 = vunpack.c.h.bf16 %v455_v1  ;;  %v479_v9 = vld [vmem:[%s674_s0 + $0x80] sm:$0xff]  ;;  %v58_v11 = vunpack.c.l.bf16 %v468_v6  ;;  %v59_v12 = vunpack.c.h.bf16 %v468_v6  ;;  %v493_v15 = vld [vmem:[%s674_s0 + $0x90] sm:$0xff]  ;;  %v17_v28 = vld [vmem:[%s674_s0 + $0x28] sm:$0xff] }
   0x4   :  { %v18_v16 = vld [vmem:[%s674_s0 + $0x40] sm:$0xff]  ;;  %v27_v17 = vunpack.c.h.bf16 %v474_v8  ;;  %v40_v18 = vunpack.c.l.bf16 %v479_v9  ;;  %v41_v19 = vunpack.c.h.bf16 %v479_v9  ;;  %v56_v20 = vunpack.c.l.bf16 %v488_v14  ;;  %v48_v22 = vld [vmem:[%s674_s0 + $0x50] sm:$0xff]  ;;  %v19_v29 = vld [vmem:[%s674_s0 + $0x48] sm:$0xff] }
   0x5   :  { %v20_v21 = vld [vmem:[%s674_s0 + $0x60] sm:$0xff]  ;;  %v50_v23 = vld [vmem:[%s674_s0 + $0x70] sm:$0xff]  ;;  %v511_v24 = vmax.f32 %v25_v3, %v55_v10  ;;  %v513_v25 = vmax.f32 %v29_v5, %v59_v12  ;;  %v57_v26 = vunpack.c.h.bf16 %v488_v14  ;;  %v70_v27 = vunpack.c.l.bf16 %v493_v15  ;;  %v47_v30 = vld [vmem:[%s674_s0 + $0x38] sm:$0xff] }
   0x6   :  { %v71_v31 = vunpack.c.h.bf16 %v493_v15  ;;  %v26_v32 = vunpack.c.l.bf16 %v474_v8  ;;  %v33_v33 = vunpack.c.h.bf16 %v18_v16  ;;  %v37_v34 = vunpack.c.h.bf16 %v20_v21  ;;  %v49_v35 = vld [vmem:[%s674_s0 + $0x58] sm:$0xff]  ;;  %v21_v36 = vld [vmem:[%s674_s0 + $0x68] sm:$0xff] }
   0x7   :  { %v351_v37 = vpack.i.bf16 %v513_v25, %v511_v24  ;;  %v536_v38 = vmax.f32 %v27_v17, %v57_v26  ;;  %v63_v39 = vunpack.c.h.bf16 %v48_v22  ;;  %v67_v40 = vunpack.c.h.bf16 %v50_v23  ;;  %v23_v41 = vld [vmem:[%s674_s0 + $0x88] sm:$0xff]  ;;  %v51_v42 = vld [vmem:[%s674_s0 + $0x78] sm:$0xff] }
   0x8   :  { %v544_v43 = vmax.f32 %v41_v19, %v71_v31  ;;  %v31_v44 = vunpack.c.h.bf16 %v17_v28  ;;  %v35_v45 = vunpack.c.h.bf16 %v19_v29  ;;  %v61_v46 = vunpack.c.h.bf16 %v47_v30  ;;  %v53_v47 = vld [vmem:[%s674_s0 + $0x98] sm:$0xff] }
   0x9   :  { %352 = vrot.lane.b32.xlu0 %v351_v37, %s426_s25  ;;  %v550_v48 = vmax.f32 %v33_v33, %v63_v39  ;;  %v552_v49 = vmax.f32 %v37_v34, %v67_v40  ;;  %v65_v50 = vunpack.c.h.bf16 %v49_v35  ;;  %v39_v51 = vunpack.c.h.bf16 %v21_v36 }
   0xa   :  { %v361_v52 = vpack.i.bf16 %v536_v38, %v544_v43  ;;  %v556_v53 = vmax.f32 %v31_v44, %v61_v46  ;;  %v43_v54 = vunpack.c.h.bf16 %v23_v41  ;;  %v69_v55 = vunpack.c.h.bf16 %v51_v42 }
   0xb   :  { %v356_v56 = vpack.i.bf16 %v552_v49, %v550_v48  ;;  %v560_v57 = vmax.f32 %v35_v45, %v65_v50  ;;  %v73_v58 = vunpack.c.h.bf16 %v53_v47  ;;  %v32_v59 = vunpack.c.l.bf16 %v18_v16 }
   0xc   :  { %362 = vrot.lane.b32.xlu1 %v361_v52, %s426_s25  ;;  %v563_v60 = vmax.f32 %v39_v51, %v69_v55  ;;  %v36_v61 = vunpack.c.l.bf16 %v20_v21  ;;  %v62_v62 = vunpack.c.l.bf16 %v48_v22  ;;  %v66_v63 = vunpack.c.l.bf16 %v50_v23 }
   0xd   :  { %357 = vrot.lane.b32.xlu0 %v356_v56, %s426_s25  ;;  %v366_v0 = vpack.i.bf16 %v560_v57, %v556_v53  ;;  %v93_v3 = vmax.f32 %v43_v54, %v73_v58  ;;  %v570_v5 = vmax.f32 %v24_v13, %v54_v7  ;;  %v574_v6 = vmax.f32 %v28_v4, %v58_v11 }
   0xe   :  { %v576_v8 = vmax.f32 %v32_v59, %v62_v62  ;;  %v578_v10 = vmax.f32 %v36_v61, %v66_v63  ;;  %v30_v12 = vunpack.c.l.bf16 %v17_v28  ;;  %v34_v14 = vunpack.c.l.bf16 %v19_v29 }
   0xf   :  { %v371_v15 = vpack.i.bf16 %v93_v3, %v563_v60  ;;  %v376_v16 = vpack.i.bf16 %v574_v6, %v570_v5  ;;  %v60_v17 = vunpack.c.l.bf16 %v47_v30  ;;  %v64_v19 = vunpack.c.l.bf16 %v49_v35 }
  0x10   :  { %367 = vrot.lane.b32.xlu1 %v366_v0, %s426_s25  ;;  %v381_v1 = vpack.i.bf16 %v578_v10, %v576_v8  ;;  %v586_v2 = vmax.f32 %v26_v32, %v56_v20  ;;  %v590_v4 = vmax.f32 %v40_v18, %v70_v27  ;;  %v38_v7 = vunpack.c.l.bf16 %v21_v36 }
  0x11   :  { %372 = vrot.lane.b32.xlu0 %v371_v15, %s426_s25  ;;  %v593_v11 = vmax.f32 %v30_v12, %v60_v17  ;;  %v595_v13 = vmax.f32 %v34_v14, %v64_v19  ;;  %v42_v21 = vunpack.c.l.bf16 %v23_v41  ;;  %v68_v22 = vunpack.c.l.bf16 %v51_v42 }
  0x12   :  { %v72_v23 = vunpack.c.l.bf16 %v53_v47  ;;  %v386_v20 = vpack.i.bf16 %v586_v2, %v590_v4  ;;  %v247_v61 = vlaneseq }
  0x13   :  { %v600_v26 = vmax.f32 %v38_v7, %v68_v22  ;;  %v391_v18 = vpack.i.bf16 %v595_v13, %v593_v11 }
  0x14   :  { %377 = vrot.lane.b32.xlu1 %v376_v16, %s426_s25  ;;  %v602_v9 = vmax.f32 %v42_v21, %v72_v23 }
  0x15   :  { %382 = vrot.lane.b32.xlu0 %v381_v1, %s426_s25 }
  0x16   :  { %v396_v27 = vpack.i.bf16 %v602_v9, %v600_v26 }
  0x18   :  { %387 = vrot.lane.b32.xlu1 %v386_v20, %s426_s25 }
  0x19   :  { %392 = vrot.lane.b32.xlu0 %v391_v18, %s426_s25 }
  0x1c   :  { %397 = vrot.lane.b32.xlu1 %v396_v27, %s426_s25 }
  0x7b   :  { %v353_v28 = vpop.permute.xlu0 %352 }
  0x7c   :  { %v355_v29 = vunpack.i.h.bf16 %v353_v28  ;;  %v354_v30 = vunpack.i.l.bf16 %v353_v28 }
  0x7e   :  { %v140_v31 = vmax.f32 %v513_v25, %v355_v29  ;;  %v139_v32 = vmax.f32 %v511_v24, %v354_v30  ;;  %v363_v33 = vpop.permute.xlu1 %362 }
  0x7f   :  { %v365_v34 = vunpack.i.h.bf16 %v363_v33  ;;  %v364_v35 = vunpack.i.l.bf16 %v363_v33  ;;  %v358_v36 = vpop.permute.xlu0 %357 }
  0x80   :  { %v360_v37 = vunpack.i.h.bf16 %v358_v36  ;;  %v359_v39 = vunpack.i.l.bf16 %v358_v36  ;;  %v401_v40 = vpack.i.bf16 %v140_v31, %v139_v32 }
  0x81   :  { %v189_v41 = vmax.f32 %v536_v38, %v365_v34  ;;  %v143_v42 = vmax.f32 %v544_v43, %v364_v35 }
  0x82   :  { %v142_v44 = vmax.f32 %v552_v49, %v360_v37  ;;  %v141_v45 = vmax.f32 %v550_v48, %v359_v39  ;;  %402 = vrot.lane.b32.xlu0 %v401_v40, %s426_s25  ;;  %v368_v25 = vpop.permute.xlu1 %367 }
  0x83   :  { %v370_v46 = vunpack.i.h.bf16 %v368_v25  ;;  %v369_v24 = vunpack.i.l.bf16 %v368_v25  ;;  %v373_v47 = vpop.permute.xlu0 %372  ;;  %v411_v50 = vpack.i.bf16 %v189_v41, %v143_v42 }
  0x84   :  { %v375_v51 = vunpack.i.h.bf16 %v373_v47  ;;  %v374_v52 = vunpack.i.l.bf16 %v373_v47  ;;  %v406_v54 = vpack.i.bf16 %v142_v44, %v141_v45 }
  0x85   :  { %v191_v55 = vmax.f32 %v560_v57, %v370_v46  ;;  %v190_v38 = vmax.f32 %v556_v53, %v369_v24  ;;  %v248_v57 = vshrl.u32 %v247_v61, 7 }
  0x86   :  { %v193_v56 = vmax.f32 %v93_v3, %v375_v51  ;;  %v192_v43 = vmax.f32 %v563_v60, %v374_v52  ;;  %412 = vrot.lane.b32.xlu0 %v411_v50, %s426_s25  ;;  %407 = vrot.lane.b32.xlu1 %v406_v54, %s426_s25  ;;  %v378_v58 = vpop.permute.xlu1 %377  ;;  %v245_v60 = vld [vmem:[%s675_s1] sm:$0x3] }
  0x87   :  { %v416_v48 = vpack.i.bf16 %v191_v55, %v190_v38  ;;  %v383_v59 = vpop.permute.xlu0 %382  ;;  %v249_v53 = vsub.s32 0, %v248_v57  ;;  %v379_v0 = vunpack.i.l.bf16 %v378_v58  ;;  %v267_v3 = vld [vmem:[%s676_s2] sm:$0x3]  ;;  %v253_v12 = vsub.s32 1, %v248_v57 }
  0x88   :  { %v421_v49 = vpack.i.bf16 %v193_v56, %v192_v43  ;;  %v380_v14 = vunpack.i.h.bf16 %v378_v58  ;;  %v385_v16 = vunpack.i.h.bf16 %v383_v59  ;;  %v384_v17 = vunpack.i.l.bf16 %v383_v59 }
  0x89   :  { %v250_v7 = vrot.slane %v245_v60, %v249_v53  ;;  %v272_v21 = vrot.slane %v267_v3, %v249_v53  ;;  %v114_v23 = vmax.f32 %v570_v5, %v379_v0  ;;  %v254_v18 = vrot.slane %v245_v60, %v253_v12 }
  0x8a   :  { %422 = vrot.lane.b32.xlu0 %v421_v49, %s426_s25  ;;  %417 = vrot.lane.b32.xlu1 %v416_v48, %s426_s25  ;;  %v388_v62 = vpop.permute.xlu1 %387  ;;  %v633_v27 = vrot.slane %v267_v3, %v253_v12  ;;  %v115_v28 = vmax.f32 %v574_v6, %v380_v14  ;;  %v117_v32 = vmax.f32 %v578_v10, %v385_v16 }
  0x8b   :  { %v393_v63 = vpop.permute.xlu0 %392  ;;  %v390_v19 = vunpack.i.h.bf16 %v388_v62  ;;  %v389_v1 = vunpack.i.l.bf16 %v388_v62  ;;  %v116_v33 = vmax.f32 %v576_v8, %v384_v17 }
  0x8c   :  { %v395_v29 = vunpack.i.h.bf16 %v393_v63  ;;  %v394_v30 = vunpack.i.l.bf16 %v393_v63 }
  0x8d   :  { %v164_v34 = vmax.f32 %v586_v2, %v390_v19  ;;  %v118_v36 = vmax.f32 %v590_v4, %v389_v1 }
  0x8e   :  { %v398_v15 = vpop.permute.xlu1 %397  ;;  %v166_v25 = vmax.f32 %v595_v13, %v395_v29  ;;  %v165_v10 = vmax.f32 %v593_v11, %v394_v30 }
  0x8f   :  { %v400_v37 = vunpack.i.h.bf16 %v398_v15  ;;  %v399_v39 = vunpack.i.l.bf16 %v398_v15 }
  0x91   :  { %v168_v50 = vmax.f32 %v602_v9, %v400_v37  ;;  %v167_v51 = vmax.f32 %v600_v26, %v399_v39 }
  0xf4   :  { %v403_v22 = vpop.permute.xlu0 %402 }
  0xf5   :  { %v404_v20 = vunpack.i.l.bf16 %v403_v22  ;;  %v405_v31 = vunpack.i.h.bf16 %v403_v22 }
  0xf7   :  { %v235_v35 = vsel %vm234_vm0, %v114_v23, %v404_v20  ;;  %v236_v8 = vsel %vm234_vm0, %v115_v28, %v405_v31 }
  0xf8   :  { %v257_v5 = vmul.f32 %v250_v7, %v235_v35  ;;  %v413_v40 = vpop.permute.xlu0 %412  ;;  %v408_v41 = vpop.permute.xlu1 %407  ;;  %v259_v48 = vmul.f32 %v250_v7, %v236_v8 }
  0xf9   :  { %v415_v42 = vunpack.i.h.bf16 %v413_v40  ;;  %v414_v6 = vunpack.i.l.bf16 %v413_v40  ;;  %v410_v44 = vunpack.i.h.bf16 %v408_v41  ;;  %v409_v45 = vunpack.i.l.bf16 %v408_v41 }
  0xfa   :  { %v279_v2 = vadd.f32 %v272_v21, %v257_v5  ;;  %v281_v19 = vadd.f32 %v272_v21, %v259_v48 }
  0xfb   :  { %v239_v46 = vsel %vm234_vm0, %v118_v36, %v414_v6  ;;  %v240_v4 = vsel %vm234_vm0, %v164_v34, %v415_v42  ;;  %v238_v24 = vsel %vm234_vm0, %v117_v32, %v410_v44  ;;  %v237_v47 = vsel %vm234_vm0, %v116_v33, %v409_v45 }
  0xfc   :  { %v258_v52 = vmul.f32 %v254_v18, %v240_v4  ;;  %v265_v54 = vmul.f32 %v250_v7, %v239_v46  ;;  %v423_v13 = vpop.permute.xlu0 %422  ;;  %v418_v55 = vpop.permute.xlu1 %417  ;;  %v263_v11 = vmul.f32 %v250_v7, %v238_v24  ;;  %v261_v38 = vmul.f32 %v250_v7, %v237_v47 }
  0xfd   :  { %v425_v56 = vunpack.i.h.bf16 %v423_v13  ;;  %v424_v43 = vunpack.i.l.bf16 %v423_v13  ;;  %v420_v58 = vunpack.i.h.bf16 %v418_v55  ;;  %v419_v59 = vunpack.i.l.bf16 %v418_v55 }
  0xfe   :  { %v280_v49 = vadd.f32 %v633_v27, %v258_v52  ;;  %v289_v61 = vmax.f32 %v279_v2, 0.0  ;;  %v287_v62 = vadd.f32 %v272_v21, %v265_v54  ;;  %v285_v63 = vadd.f32 %v272_v21, %v263_v11 }
  0xff   :  { %v243_v57 = vsel %vm234_vm0, %v167_v51, %v424_v43  ;;  %v244_v9 = vsel %vm234_vm0, %v168_v50, %v425_v56  ;;  %v283_v60 = vadd.f32 %v272_v21, %v261_v38  ;;  %v242_v3 = vsel %vm234_vm0, %v166_v25, %v420_v58 }
 0x100   :  { %v290_v26 = vmax.f32 %v280_v49, 0.0  ;;  %v264_v53 = vmul.f32 %v254_v18, %v243_v57  ;;  %v266_v0 = vmul.f32 %v254_v18, %v244_v9  ;;  %v241_v12 = vsel %vm234_vm0, %v165_v10, %v419_v59 }
 0x101   :  { %v262_v17 = vmul.f32 %v254_v18, %v242_v3  ;;  %v297_v1 = vmax.f32 %v287_v62, 0.0  ;;  %v260_v7 = vmul.f32 %v254_v18, %v241_v12  ;;  %v295_v22 = vmax.f32 %v285_v63, 0.0 }
 0x102   :  { %v345_v14 = vpack.c.bf16 %v290_v26, %v289_v61  ;;  %v286_v15 = vadd.f32 %v633_v27, %v264_v53  ;;  %v288_v16 = vadd.f32 %v633_v27, %v266_v0  ;;  %v293_v30 = vmax.f32 %v283_v60, 0.0 }
 0x103   :  { %v284_v28 = vadd.f32 %v633_v27, %v262_v17  ;;  %v282_v29 = vadd.f32 %v633_v27, %v260_v7  ;;  %v291_v34 = vmax.f32 %v281_v19, 0.0 }
 0x104   :  { %331 = vst [vmem:[%s677_s3] sm:$0xff] %v345_v14  ;;  %v296_v23 = vmax.f32 %v286_v15, 0.0  ;;  %v298_v20 = vmax.f32 %v288_v16, 0.0 }
 0x105   :  { %v294_v33 = vmax.f32 %v284_v28, 0.0  ;;  %v292_v35 = vmax.f32 %v282_v29, 0.0 }
 0x106   :  { %v348_v31 = vpack.c.bf16 %v296_v23, %v295_v22  ;;  %v349_v32 = vpack.c.bf16 %v298_v20, %v297_v1 }
 0x107   :  { %v347_v21 = vpack.c.bf16 %v294_v33, %v293_v30  ;;  %v346_v18 = vpack.c.bf16 %v292_v35, %v291_v34 }
 0x108   :  { %334 = vst [vmem:[%s677_s3 + $0x18] sm:$0xff] %v348_v31  ;;  %335 = vst [vmem:[%s677_s3 + $0x20] sm:$0xff] %v349_v32 }
 0x109   :  { %333 = vst [vmem:[%s677_s3 + $0x10] sm:$0xff] %v347_v21  ;;  %332 = vst [vmem:[%s677_s3 + $0x8] sm:$0xff] %v346_v18 }

// kernel: generator_forward.16
= control target key start
LH: loop header
LB: loop body
LE: loop exit
PB: predicated region body
PF: predicated region fallthrough
CT: control target
= control target key end

     0   :  { %s86_s18 = smov 64   ;;  %vm62_vm0 = vcmask 519168   ;;  %vm64_vm1 = vcmask 516096   ;;  %s128_s0 = inlined_call_operand.vmem [shape: bf16[10,256], index: 0, kind: input, shape index: {}]   ;;  %s129_s1 = inlined_call_operand.vmem [shape: f32[1,64], index: 1, kind: input, shape index: {}]   ;;  %s130_s2 = inlined_call_operand.vmem [shape: f32[1,64], index: 2, kind: input, shape index: {}]   ;;  %s131_s3 = inlined_call_operand.vmem [shape: bf16[10,64], index: 3, kind: output, shape index: {}]  }
   0x1   :  { %v77_v0 = vld [vmem:[%s128_s0] sm:$0xff]   ;;  %v15_v1 = vld [vmem:[%s128_s0 + $0x8] sm:$0x1]  ;;  %v19_v2 = vld [vmem:[%s128_s0 + $0xc] sm:$0x1] }
   0x2   :  { %v78_v3 = vunpack.c.l.bf16 %v77_v0  ;;  %v79_v4 = vunpack.c.h.bf16 %v77_v0  ;;  %v17_v5 = vunpack.c.l.bf16 %v15_v1  ;;  %v21_v6 = vunpack.c.l.bf16 %v19_v2  ;;  %v70_v13 = vld [vmem:[%s129_s1] ss:$0 sm:$0xff] }
   0x3   :  { %v71_v16 = vld [vmem:[%s130_s2] ss:$0 sm:$0xff] }
   0x4   :  { %v22_v7 = vmax.f32 %v78_v3, %v79_v4  ;;  %v23_v8 = vmax.f32 %v17_v5, %v21_v6 }
   0x6   :  { %v81_v9 = vpack.i.bf16 %v23_v8, %v22_v7 }
   0x8   :  { %82 = vrot.lane.b32.xlu0 %v81_v9, %s86_s18 }
  0x7a   :  { %v83_v10 = vpop.permute.xlu0 %82 }
  0x7b   :  { %v85_v11 = vunpack.i.h.bf16 %v83_v10  ;;  %v84_v12 = vunpack.i.l.bf16 %v83_v10 }
  0x7d   :  { %v33_v14 = vmax.f32 %v23_v8, %v85_v11  ;;  %v32_v15 = vmax.f32 %v22_v7, %v84_v12 }
  0x7f   :  { %v42_v17 = vmul.f32 %v70_v13, %v33_v14  ;;  %v41_v18 = vmul.f32 %v70_v13, %v32_v15 }
  0x81   :  { %v51_v19 = vadd.f32 %v71_v16, %v42_v17  ;;  %v50_v20 = vadd.f32 %v71_v16, %v41_v18 }
  0x83   :  { %v53_v21 = vmax.f32 %v51_v19, 0.0  ;;  %v52_v22 = vmax.f32 %v50_v20, 0.0 }
  0x85   :  { %v75_v23 = vpack.c.bf16 %v53_v21, %v53_v21  ;;  %v74_v24 = vpack.c.bf16 %v52_v22, %v52_v22 }
  0x87   :  { %65 = vst.msk [vmem:[%s131_s3 + $0x4] sm:$0x1] %vm64_vm1, %v75_v23 }
  0x88   :  { %63 = vst.msk [vmem:[%s131_s3] sm:$0xf] %vm62_vm0, %v74_v24 }

// kernel: generator_forward.15
= control target key start
LH: loop header
LB: loop body
LE: loop exit
PB: predicated region body
PF: predicated region fallthrough
CT: control target
= control target key end

     0   :  { %vm897_vm0 = vcmask 519168   ;;  %s1500_s1 = inlined_call_operand.vmem [shape: bf16[1024,64], index: 1, kind: input, shape index: {}]   ;;  %s1501_s0 = inlined_call_operand.vmem [shape: bf16[40,1024], index: 0, kind: input, shape index: {}]   ;;  %s1502_s2 = inlined_call_operand.vmem [shape: bf16[40,64], index: 2, kind: output, shape index: {}]  }
   0x1   :  { %v1141_v0 = vld [vmem:[%s1500_s1 + $0x40] sm:$0xff]   ;;  %v1145_v4 = vld [vmem:[%s1500_s1 + $0x48] sm:$0xff]   ;;  %v1149_v8 = vld [vmem:[%s1500_s1 + $0x50] sm:$0xff]  }
   0x2   :  { %v1142_v1 = vld [vmem:[%s1500_s1 + $0xc0] sm:$0xff]   ;;  %1005 = vmatprep.subr.bf16.mxu0 %v1141_v0  ;;  %v1146_v5 = vld [vmem:[%s1500_s1 + $0xc8] sm:$0xff]   ;;  %v1150_v9 = vld [vmem:[%s1500_s1 + $0xd0] sm:$0xff]  }
   0x3   :  { %v1143_v2 = vld [vmem:[%s1500_s1] sm:$0xff]   ;;  %1039 = vmatprep.subr.bf16.mxu1 %v1142_v1  ;;  %v1147_v6 = vld [vmem:[%s1500_s1 + $0x8] sm:$0xff]   ;;  %v1151_v10 = vld [vmem:[%s1500_s1 + $0x10] sm:$0xff]  }
   0x4   :  { %v1144_v3 = vld [vmem:[%s1500_s1 + $0x80] sm:$0xff]   ;;  %1006 = vmatpush3.bf16.msra.mxu0 %v1143_v2  ;;  %v1148_v7 = vld [vmem:[%s1500_s1 + $0x88] sm:$0xff]   ;;  %v1152_v11 = vld [vmem:[%s1500_s1 + $0x90] sm:$0xff]  }
   0x5   :  { %1040 = vmatpush3.bf16.msra.mxu1 %v1144_v3  ;;  %1007 = vmatprep.subr.bf16.mxu0 %v1145_v4  ;;  %v1153_v12 = vld [vmem:[%s1500_s1 + $0x58] sm:$0xff]   ;;  %v1157_v16 = vld [vmem:[%s1500_s1 + $0x60] sm:$0xff]   ;;  %v1161_v20 = vld [vmem:[%s1500_s1 + $0x68] sm:$0xff]  }
   0x6   :  { %1041 = vmatprep.subr.bf16.mxu1 %v1146_v5  ;;  %v1154_v13 = vld [vmem:[%s1500_s1 + $0xd8] sm:$0xff]   ;;  %v1158_v17 = vld [vmem:[%s1500_s1 + $0xe0] sm:$0xff]   ;;  %v1162_v21 = vld [vmem:[%s1500_s1 + $0xe8] sm:$0xff]  }
   0x7   :  { %v1155_v14 = vld [vmem:[%s1500_s1 + $0x18] sm:$0xff]   ;;  %v1159_v18 = vld [vmem:[%s1500_s1 + $0x20] sm:$0xff]   ;;  %v1163_v22 = vld [vmem:[%s1500_s1 + $0x28] sm:$0xff]  }
   0x8   :  { %1008 = vmatpush3.bf16.msra.mxu0 %v1147_v6  ;;  %v1156_v15 = vld [vmem:[%s1500_s1 + $0x98] sm:$0xff]   ;;  %v1160_v19 = vld [vmem:[%s1500_s1 + $0xa0] sm:$0xff]   ;;  %v1164_v23 = vld [vmem:[%s1500_s1 + $0xa8] sm:$0xff]  }
   0x9   :  { %1042 = vmatpush3.bf16.msra.mxu1 %v1148_v7  ;;  %1009 = vmatprep.subr.bf16.mxu0 %v1149_v8  ;;  %v1165_v24 = vld [vmem:[%s1500_s1 + $0x70] sm:$0xff]   ;;  %v1169_v28 = vld [vmem:[%s1500_s1 + $0x78] sm:$0xff]   ;;  %v12_v32 = vld [vmem:[%s1501_s0] sm:$0xff] }
   0xa   :  { %1043 = vmatprep.subr.bf16.mxu1 %v1150_v9  ;;  %v1166_v25 = vld [vmem:[%s1500_s1 + $0xf0] sm:$0xff]   ;;  %v1170_v29 = vld [vmem:[%s1500_s1 + $0xf8] sm:$0xff]   ;;  %v16_v33 = vld [vmem:[%s1501_s0 + $0x20] sm:$0xff] }
   0xb   :  { %v1167_v26 = vld [vmem:[%s1500_s1 + $0x30] sm:$0xff]   ;;  %v1171_v30 = vld [vmem:[%s1500_s1 + $0x38] sm:$0xff]   ;;  %v13_v34 = vld [vmem:[%s1501_s0 + $0x8] sm:$0xff]  ;;  %v907_v35 = vcombine.low %v12_v32, %v16_v33  ;;  %v908_v36 = vcombine.high %v12_v32, %v16_v33 }
   0xc   :  { %1010 = vmatpush3.bf16.msra.mxu0 %v1151_v10  ;;  %v1168_v27 = vld [vmem:[%s1500_s1 + $0xb0] sm:$0xff]   ;;  %v1172_v31 = vld [vmem:[%s1500_s1 + $0xb8] sm:$0xff]   ;;  %v17_v37 = vld [vmem:[%s1501_s0 + $0x28] sm:$0xff] }
   0xd   :  { %1044 = vmatpush3.bf16.msra.mxu1 %v1152_v11  ;;  %1011 = vmatprep.subr.bf16.mxu0 %v1153_v12  ;;  %v909_v38 = vcombine.low %v13_v34, %v17_v37  ;;  %v910_v39 = vcombine.high %v13_v34, %v17_v37  ;;  %v1173_v40 = vld [vmem:[%s1500_s1 + $0x140] sm:$0xff]   ;;  %v1177_v44 = vld [vmem:[%s1500_s1 + $0x148] sm:$0xff]   ;;  %v1181_v48 = vld [vmem:[%s1500_s1 + $0x150] sm:$0xff]  }
   0xe   :  { %1045 = vmatprep.subr.bf16.mxu1 %v1154_v13  ;;  %684 = vmatprep.mubr.bf16.mxu0 %v908_v36  ;;  %v1174_v41 = vld [vmem:[%s1500_s1 + $0x1c0] sm:$0xff]   ;;  %v1178_v45 = vld [vmem:[%s1500_s1 + $0x1c8] sm:$0xff]   ;;  %v1182_v49 = vld [vmem:[%s1500_s1 + $0x1d0] sm:$0xff]  }
   0xf   :  { %740 = vmatprep.mubr.bf16.mxu1 %v910_v39  ;;  %v1175_v42 = vld [vmem:[%s1500_s1 + $0x100] sm:$0xff]   ;;  %v1179_v46 = vld [vmem:[%s1500_s1 + $0x108] sm:$0xff]   ;;  %v1183_v50 = vld [vmem:[%s1500_s1 + $0x110] sm:$0xff]  }
  0x10   :  { %1012 = vmatpush3.bf16.msra.mxu0 %v1155_v14  ;;  %v1176_v43 = vld [vmem:[%s1500_s1 + $0x180] sm:$0xff]   ;;  %v1180_v47 = vld [vmem:[%s1500_s1 + $0x188] sm:$0xff]   ;;  %v1184_v51 = vld [vmem:[%s1500_s1 + $0x190] sm:$0xff]  }
  0x11   :  { %1046 = vmatpush3.bf16.msra.mxu1 %v1156_v15  ;;  %1013 = vmatprep.subr.bf16.mxu0 %v1157_v16  ;;  %v20_v52 = vld [vmem:[%s1501_s0 + $0x40] sm:$0xff]  ;;  %v21_v55 = vld [vmem:[%s1501_s0 + $0x48] sm:$0xff]  ;;  %v1185_v59 = vld [vmem:[%s1500_s1 + $0x158] sm:$0xff]  }
  0x12   :  { %1047 = vmatprep.subr.bf16.mxu1 %v1158_v17  ;;  %v24_v53 = vld [vmem:[%s1501_s0 + $0x60] sm:$0xff]  ;;  %v25_v56 = vld [vmem:[%s1501_s0 + $0x68] sm:$0xff]  ;;  %v1186_v61 = vld [vmem:[%s1500_s1 + $0x1d8] sm:$0xff]  }
  0x13   :  { %v916_v54 = vcombine.high %v20_v52, %v24_v53  ;;  %v915_v57 = vcombine.low %v20_v52, %v24_v53  ;;  %v918_v58 = vcombine.high %v21_v55, %v25_v56  ;;  %v917_v60 = vcombine.low %v21_v55, %v25_v56  ;;  %v1187_v62 = vld [vmem:[%s1500_s1 + $0x118] sm:$0xff]   ;;  %v1189_v0 = vld [vmem:[%s1500_s1 + $0x160] sm:$0xff]   ;;  %v1194_v6 = vld [vmem:[%s1500_s1 + $0x168] sm:$0xff]  }
  0x14   :  { %1014 = vmatpush3.bf16.msra.mxu0 %v1159_v18  ;;  %v1188_v63 = vld [vmem:[%s1500_s1 + $0x198] sm:$0xff]   ;;  %v1190_v1 = vld [vmem:[%s1500_s1 + $0x1e0] sm:$0xff]   ;;  %v1195_v8 = vld [vmem:[%s1500_s1 + $0x1e8] sm:$0xff]  }
  0x15   :  { %1048 = vmatpush3.bf16.msra.mxu1 %v1160_v19  ;;  %1015 = vmatprep.subr.bf16.mxu0 %v1161_v20  ;;  %v1191_v2 = vld [vmem:[%s1500_s1 + $0x120] sm:$0xff]   ;;  %v1197_v9 = vld [vmem:[%s1500_s1 + $0x128] sm:$0xff]   ;;  %v1201_v14 = vld [vmem:[%s1500_s1 + $0x170] sm:$0xff]  }
  0x16   :  { %1049 = vmatprep.subr.bf16.mxu1 %v1162_v21  ;;  %v1192_v3 = vld [vmem:[%s1500_s1 + $0x1a0] sm:$0xff]   ;;  %v1198_v10 = vld [vmem:[%s1500_s1 + $0x1a8] sm:$0xff]   ;;  %v1202_v15 = vld [vmem:[%s1500_s1 + $0x1f0] sm:$0xff]  }
  0x17   :  { %v28_v4 = vld [vmem:[%s1501_s0 + $0x80] sm:$0xff]  ;;  %v29_v11 = vld [vmem:[%s1501_s0 + $0x88] sm:$0xff]  ;;  %v1203_v16 = vld [vmem:[%s1500_s1 + $0x130] sm:$0xff]  }
  0x18   :  { %1016 = vmatpush3.bf16.msra.mxu0 %v1163_v22  ;;  %v924_v5 = vcombine.high %v28_v4, %v28_v4  ;;  %v923_v7 = vcombine.low %v28_v4, %v28_v4  ;;  %v926_v12 = vcombine.high %v29_v11, %v29_v11  ;;  %v925_v13 = vcombine.low %v29_v11, %v29_v11  ;;  %v1204_v17 = vld [vmem:[%s1500_s1 + $0x1b0] sm:$0xff]   ;;  %v1205_v18 = vld [vmem:[%s1500_s1 + $0x178] sm:$0xff]  }
  0x19   :  { %1050 = vmatpush3.bf16.msra.mxu1 %v1164_v23  ;;  %1017 = vmatprep.subr.bf16.mxu0 %v1165_v24  ;;  %v1206_v19 = vld [vmem:[%s1500_s1 + $0x1f8] sm:$0xff]   ;;  %v14_v22 = vld [vmem:[%s1501_s0 + $0x10] sm:$0xff] }
  0x1a   :  { %1051 = vmatprep.subr.bf16.mxu1 %v1166_v25  ;;  %v1207_v20 = vld [vmem:[%s1500_s1 + $0x138] sm:$0xff]   ;;  %v18_v23 = vld [vmem:[%s1501_s0 + $0x30] sm:$0xff] }
  0x1b   :  { %v1208_v21 = vld [vmem:[%s1500_s1 + $0x1b8] sm:$0xff]   ;;  %v911_v24 = vcombine.low %v14_v22, %v18_v23  ;;  %v912_v25 = vcombine.high %v14_v22, %v18_v23  ;;  %v30_v36 = vld [vmem:[%s1501_s0 + $0x90] sm:$0xff] }
  0x1c   :  { %1018 = vmatpush3.bf16.msra.mxu0 %v1167_v26  ;;  %v15_v26 = vld [vmem:[%s1501_s0 + $0x18] sm:$0xff] }
  0x1d   :  { %1052 = vmatpush3.bf16.msra.mxu1 %v1168_v27  ;;  %1019 = vmatprep.subr.bf16.mxu0 %v1169_v28  ;;  %v19_v27 = vld [vmem:[%s1501_s0 + $0x38] sm:$0xff]  ;;  %v22_v28 = vld [vmem:[%s1501_s0 + $0x50] sm:$0xff] }
  0x1e   :  { %1053 = vmatprep.subr.bf16.mxu1 %v1170_v29  ;;  %v913_v29 = vcombine.low %v15_v26, %v19_v27  ;;  %v23_v32 = vld [vmem:[%s1501_s0 + $0x58] sm:$0xff] }
  0x1f   :  { %v27_v33 = vld [vmem:[%s1501_s0 + $0x78] sm:$0xff] }
  0x20   :  { %1020 = vmatpush3.bf16.msra.mxu0 %v1171_v30  ;;  %v914_v30 = vcombine.high %v15_v26, %v19_v27  ;;  %v31_v37 = vld [vmem:[%s1501_s0 + $0x98] sm:$0xff]  ;;  %v921_v39 = vcombine.low %v23_v32, %v27_v33 }
  0x21   :  { %1054 = vmatpush3.bf16.msra.mxu1 %v1172_v31  ;;  %1073 = vmatprep.subr.bf16.mxu0 %v1173_v40  ;;  %v26_v31 = vld [vmem:[%s1501_s0 + $0x70] sm:$0xff]  ;;  %v928_v40 = vcombine.high %v30_v36, %v30_v36 }
  0x22   :  { %1107 = vmatprep.subr.bf16.mxu1 %v1174_v41  ;;  %v920_v34 = vcombine.high %v22_v28, %v26_v31  ;;  %v930_v41 = vcombine.high %v31_v37, %v31_v37 }
  0x23   :  { %685 = vmatmul.mubr.bf16.vlgmr.msra.gmra.mrb[0].mxu0 %v907_v35  ;;  %v922_v35 = vcombine.high %v23_v32, %v27_v33 }
  0x24   :  { %741 = vmatmul.mubr.bf16.vlgmr.msra.gmra.mrb[0].mxu1 %v909_v38  ;;  %1074 = vmatpush3.bf16.msra.mxu0 %v1175_v42  ;;  %v919_v38 = vcombine.low %v22_v28, %v26_v31  ;;  %v927_v42 = vcombine.low %v30_v36, %v30_v36 }
  0x25   :  { %1108 = vmatpush3.bf16.msra.mxu1 %v1176_v43  ;;  %1075 = vmatprep.subr.bf16.mxu0 %v1177_v44  ;;  %v929_v43 = vcombine.low %v31_v37, %v31_v37 }
  0x26   :  { %1109 = vmatprep.subr.bf16.mxu1 %v1178_v45  ;;  %692 = vmatprep.mubr.bf16.mxu0 %v916_v54 }
  0x27   :  { %748 = vmatprep.mubr.bf16.mxu1 %v918_v58 }
  0x28   :  { %1076 = vmatpush3.bf16.msra.mxu0 %v1179_v46 }
  0x29   :  { %1110 = vmatpush3.bf16.msra.mxu1 %v1180_v47  ;;  %1077 = vmatprep.subr.bf16.mxu0 %v1181_v48 }
  0x2a   :  { %1111 = vmatprep.subr.bf16.mxu1 %v1182_v49 }
  0x2b   :  { %693 = vmatmul.mubr.bf16.gmra.mrb[4].mxu0 %v915_v57 }
  0x2c   :  { %1078 = vmatpush3.bf16.msra.mxu0 %v1183_v50  ;;  %749 = vmatmul.mubr.bf16.gmra.mrb[4].mxu1 %v917_v60 }
  0x2d   :  { %1112 = vmatpush3.bf16.msra.mxu1 %v1184_v51  ;;  %1079 = vmatprep.subr.bf16.mxu0 %v1185_v59 }
  0x2e   :  { %1113 = vmatprep.subr.bf16.mxu1 %v1186_v61  ;;  %700 = vmatprep.mubr.bf16.mxu0 %v924_v5 }
  0x2f   :  { %756 = vmatprep.mubr.bf16.mxu1 %v926_v12 }
  0x30   :  { %1080 = vmatpush3.bf16.msra.mxu0 %v1187_v62 }
  0x31   :  { %1114 = vmatpush3.bf16.msra.mxu1 %v1188_v63  ;;  %1081 = vmatprep.subr.bf16.mxu0 %v1189_v0 }
  0x32   :  { %1115 = vmatprep.subr.bf16.mxu1 %v1190_v1 }
  0x33   :  { %701 = vmatmul.mubr.bf16.gmra.mrb[8].mxu0 %v923_v7 }
  0x34   :  { %1082 = vmatpush3.bf16.msra.mxu0 %v1191_v2  ;;  %757 = vmatmul.mubr.bf16.gmra.mrb[8].mxu1 %v925_v13 }
  0x35   :  { %1116 = vmatpush3.bf16.msra.mxu1 %v1192_v3  ;;  %1083 = vmatprep.subr.bf16.mxu0 %v1194_v6 }
  0x36   :  { %1117 = vmatprep.subr.bf16.mxu1 %v1195_v8  ;;  %796 = vmatprep.mubr.bf16.mxu0 %v912_v25 }
  0x37   :  { %852 = vmatprep.mubr.bf16.mxu1 %v914_v30 }
  0x38   :  { %1084 = vmatpush3.bf16.msra.mxu0 %v1197_v9 }
  0x39   :  { %1118 = vmatpush3.bf16.msra.mxu1 %v1198_v10  ;;  %1085 = vmatprep.subr.bf16.mxu0 %v1201_v14 }
  0x3a   :  { %1119 = vmatprep.subr.bf16.mxu1 %v1202_v15 }
  0x3c   :  { %1086 = vmatpush3.bf16.msra.mxu0 %v1203_v16 }
  0x3d   :  { %1120 = vmatpush3.bf16.msra.mxu1 %v1204_v17  ;;  %1087 = vmatprep.subr.bf16.mxu0 %v1205_v18 }
  0x3e   :  { %1121 = vmatprep.subr.bf16.mxu1 %v1206_v19 }
  0x40   :  { %1088 = vmatpush3.bf16.msra.mxu0 %v1207_v20 }
  0x41   :  { %1122 = vmatpush3.bf16.msra.mxu1 %v1208_v21 }
  0x43   :  { %797 = vmatmul.mubr.bf16.vlgmr.msra.gmra.mrb[12].mxu0 %v911_v24 }
  0x44   :  { %853 = vmatmul.mubr.bf16.vlgmr.msra.gmra.mrb[12].mxu1 %v913_v29  ;;  %804 = vmatprep.mubr.bf16.mxu0 %v920_v34 }
  0x45   :  { %860 = vmatprep.mubr.bf16.mxu1 %v922_v35 }
  0x4b   :  { %805 = vmatmul.mubr.bf16.gmra.mrb[16].mxu0 %v919_v38 }
  0x4c   :  { %861 = vmatmul.mubr.bf16.gmra.mrb[16].mxu1 %v921_v39  ;;  %812 = vmatprep.mubr.bf16.mxu0 %v928_v40 }
  0x4d   :  { %868 = vmatprep.mubr.bf16.mxu1 %v930_v41 }
  0x53   :  { %813 = vmatmul.mubr.bf16.gmra.mrb[20].mxu0 %v927_v42 }
  0x54   :  { %869 = vmatmul.mubr.bf16.gmra.mrb[20].mxu1 %v929_v43 }
  0xf6   :  { %v1021_v44 = vpop.f32.mrb[0].mxu0 }
  0xf7   :  { %v1055_v45 = vpop.f32.mrb[0].mxu1  ;;  %v1022_v46 = vpop.f32.mrb[1].mxu0 }
  0xf8   :  { %v1023_v47 = vadd.f32 %v1022_v46, %v1021_v44  ;;  %v1056_v48 = vpop.f32.mrb[1].mxu1  ;;  %v1024_v49 = vpop.f32.mrb[2].mxu0 }
  0xf9   :  { %v1057_v50 = vadd.f32 %v1056_v48, %v1055_v45  ;;  %v1058_v51 = vpop.f32.mrb[2].mxu1  ;;  %v1025_v52 = vpop.f32.mrb[3].mxu0 }
  0xfa   :  { %v1026_v53 = vadd.f32 %v1025_v52, %v1024_v49  ;;  %v1059_v54 = vpop.f32.mrb[3].mxu1 }
  0xfb   :  { %v743_v55 = vadd.f32 %v1057_v50, %v1023_v47  ;;  %v1060_v56 = vadd.f32 %v1059_v54, %v1058_v51 }
  0xfd   :  { %v746_v57 = vadd.f32 %v1060_v56, %v1026_v53 }
  0xfe   :  { %v1027_v58 = vpop.f32.mrb[4].mxu0 }
  0xff   :  { %v1061_v59 = vpop.f32.mrb[4].mxu1  ;;  %v1028_v60 = vpop.f32.mrb[5].mxu0 }
 0x100   :  { %v1029_v61 = vadd.f32 %v1028_v60, %v1027_v58  ;;  %v1062_v62 = vpop.f32.mrb[5].mxu1  ;;  %v1030_v63 = vpop.f32.mrb[6].mxu0 }
 0x101   :  { %v1063_v0 = vadd.f32 %v1062_v62, %v1061_v59  ;;  %v1064_v1 = vpop.f32.mrb[6].mxu1  ;;  %v1031_v2 = vpop.f32.mrb[7].mxu0 }
 0x102   :  { %v1032_v3 = vadd.f32 %v1031_v2, %v1030_v63  ;;  %v1065_v4 = vpop.f32.mrb[7].mxu1 }
 0x103   :  { %v751_v5 = vadd.f32 %v1063_v0, %v1029_v61  ;;  %v1066_v6 = vadd.f32 %v1065_v4, %v1064_v1 }
 0x105   :  { %v754_v7 = vadd.f32 %v1066_v6, %v1032_v3 }
 0x106   :  { %v1033_v8 = vpop.f32.mrb[8].mxu0 }
 0x107   :  { %v1034_v9 = vpop.f32.mrb[9].mxu0  ;;  %v1067_v13 = vpop.f32.mrb[8].mxu1 }
 0x108   :  { %v1035_v10 = vadd.f32 %v1034_v9, %v1033_v8  ;;  %v1036_v11 = vpop.f32.mrb[10].mxu0  ;;  %v1068_v14 = vpop.f32.mrb[9].mxu1 }
 0x109   :  { %v1037_v12 = vpop.f32.mrb[11].mxu0  ;;  %v1069_v15 = vadd.f32 %v1068_v14, %v1067_v13  ;;  %v1070_v16 = vpop.f32.mrb[10].mxu1 }
 0x10a   :  { %v1071_v17 = vpop.f32.mrb[11].mxu1 }
 0x10b   :  { %v759_v18 = vadd.f32 %v1069_v15, %v1035_v10 }
 0x116   :  { %v1089_v19 = vpop.f32.mrb[12].mxu0 }
 0x117   :  { %v1123_v20 = vpop.f32.mrb[12].mxu1  ;;  %v1090_v21 = vpop.f32.mrb[13].mxu0 }
 0x118   :  { %v1091_v22 = vadd.f32 %v1090_v21, %v1089_v19  ;;  %v1124_v23 = vpop.f32.mrb[13].mxu1  ;;  %v1092_v24 = vpop.f32.mrb[14].mxu0 }
 0x119   :  { %v1125_v25 = vadd.f32 %v1124_v23, %v1123_v20  ;;  %v1126_v26 = vpop.f32.mrb[14].mxu1  ;;  %v1093_v27 = vpop.f32.mrb[15].mxu0 }
 0x11a   :  { %v799_v28 = vadd.f32 %v1091_v22, %v743_v55  ;;  %v1094_v29 = vadd.f32 %v1093_v27, %v1092_v24  ;;  %v1127_v30 = vpop.f32.mrb[15].mxu1 }
 0x11b   :  { %v1128_v31 = vadd.f32 %v1127_v30, %v1126_v26 }
 0x11c   :  { %v855_v32 = vadd.f32 %v1125_v25, %v799_v28  ;;  %v802_v33 = vadd.f32 %v1094_v29, %v746_v57 }
 0x11e   :  { %v1000_v34 = vpack.c.bf16 %v855_v32, %v855_v32  ;;  %v858_v35 = vadd.f32 %v1128_v31, %v802_v33  ;;  %v1095_v36 = vpop.f32.mrb[16].mxu0 }
 0x11f   :  { %v1129_v37 = vpop.f32.mrb[16].mxu1  ;;  %v1096_v38 = vpop.f32.mrb[17].mxu0 }
 0x120   :  { %898 = vst.msk [vmem:[%s1502_s2] sm:$0xf] %vm897_vm0, %v1000_v34  ;;  %v1001_v39 = vpack.c.bf16 %v858_v35, %v858_v35  ;;  %v1097_v40 = vadd.f32 %v1096_v38, %v1095_v36  ;;  %v1130_v41 = vpop.f32.mrb[17].mxu1  ;;  %v1098_v42 = vpop.f32.mrb[18].mxu0 }
 0x121   :  { %v1131_v43 = vadd.f32 %v1130_v41, %v1129_v37  ;;  %v1132_v44 = vpop.f32.mrb[18].mxu1  ;;  %v1099_v45 = vpop.f32.mrb[19].mxu0 }
 0x122   :  { %899 = vst.msk [vmem:[%s1502_s2 + $0x4] sm:$0xf] %vm897_vm0, %v1001_v39  ;;  %v807_v46 = vadd.f32 %v1097_v40, %v751_v5  ;;  %v1100_v47 = vadd.f32 %v1099_v45, %v1098_v42  ;;  %v1133_v48 = vpop.f32.mrb[19].mxu1 }
 0x123   :  { %v1134_v49 = vadd.f32 %v1133_v48, %v1132_v44 }
 0x124   :  { %v863_v50 = vadd.f32 %v1131_v43, %v807_v46  ;;  %v810_v51 = vadd.f32 %v1100_v47, %v754_v7 }
 0x126   :  { %v1002_v52 = vpack.c.bf16 %v863_v50, %v863_v50  ;;  %v866_v53 = vadd.f32 %v1134_v49, %v810_v51  ;;  %v1101_v54 = vpop.f32.mrb[20].mxu0 }
 0x127   :  { %v1135_v55 = vpop.f32.mrb[20].mxu1  ;;  %v1102_v56 = vpop.f32.mrb[21].mxu0 }
 0x128   :  { %900 = vst.msk [vmem:[%s1502_s2 + $0x8] sm:$0xf] %vm897_vm0, %v1002_v52  ;;  %v1003_v57 = vpack.c.bf16 %v866_v53, %v866_v53  ;;  %v1103_v58 = vadd.f32 %v1102_v56, %v1101_v54  ;;  %v1136_v59 = vpop.f32.mrb[21].mxu1  ;;  %v1104_v60 = vpop.f32.mrb[22].mxu0 }
 0x129   :  { %v1137_v61 = vadd.f32 %v1136_v59, %v1135_v55  ;;  %v1138_v62 = vpop.f32.mrb[22].mxu1  ;;  %v1105_v63 = vpop.f32.mrb[23].mxu0 }
 0x12a   :  { %901 = vst.msk [vmem:[%s1502_s2 + $0xc] sm:$0xf] %vm897_vm0, %v1003_v57  ;;  %v815_v0 = vadd.f32 %v1103_v58, %v759_v18  ;;  %v1139_v1 = vpop.f32.mrb[23].mxu1 }
 0x12c   :  { %v871_v2 = vadd.f32 %v1137_v61, %v815_v0 }
 0x12e   :  { %v1004_v3 = vpack.c.bf16 %v871_v2, %v871_v2 }
 0x130   :  { %902 = vst.msk [vmem:[%s1502_s2 + $0x10] sm:$0xf] %vm897_vm0, %v1004_v3 }

// kernel: generator_forward.18
= control target key start
LH: loop header
LB: loop body
LE: loop exit
PB: predicated region body
PF: predicated region fallthrough
CT: control target
= control target key end

     0   :  { %v243_v0 = vmov 0.0   ;;  %vm244_vm0 = vmmov 0   ;;  %vm65_vm1 = vcmask 523264   ;;  %s296_s1 = inlined_call_operand.vmem [shape: bf16[64,128], index: 1, kind: input, shape index: {}]   ;;  %s297_s0 = inlined_call_operand.vmem [shape: bf16[42,64], index: 0, kind: input, shape index: {}]   ;;  %s298_s2 = inlined_call_operand.vmem [shape: bf16[42,128], index: 2, kind: output, shape index: {}]  }
   0x1   :  { %226 = vmatprep.subr.bf16.mxu1 %v243_v0  ;;  %v236_v1 = vld [vmem:[%s296_s1] sm:$0xff]   ;;  %206 = vmatprep.subr.bf16.mxu0 %v243_v0  ;;  %v237_v2 = vld [vmem:[%s296_s1 + $0x8] sm:$0xff]   ;;  %v238_v3 = vld [vmem:[%s296_s1 + $0x10] sm:$0xff]  }
   0x2   :  { %218 = vmatprep.mubr.msk.bf16.mxu1 %vm244_vm0, %v243_v0  ;;  %214 = vmatprep.mubr.msk.bf16.mxu0 %vm244_vm0, %v243_v0  ;;  %v239_v4 = vld [vmem:[%s296_s1 + $0x18] sm:$0xff]   ;;  %v240_v5 = vld [vmem:[%s297_s0 + $0x8] sm:$0xff]   ;;  %v241_v6 = vld [vmem:[%s297_s0] sm:$0xff]  }
   0x3   :  { %230 = vmatpush3.bf16.msra.mxu1 %v236_v1  ;;  %207 = vmatpush3.bf16.msra.mxu0 %v236_v1  ;;  %v242_v7 = vld [vmem:[%s297_s0 + $0x10] sm:$0x1f]  }
   0x4   :  { %227 = vmatprep.subr.bf16.mxu1 %v243_v0  ;;  %208 = vmatprep.subr.bf16.mxu0 %v243_v0 }
   0x7   :  { %231 = vmatpush3.bf16.msra.mxu1 %v237_v2  ;;  %209 = vmatpush3.bf16.msra.mxu0 %v237_v2 }
   0x8   :  { %228 = vmatprep.subr.bf16.mxu1 %v243_v0  ;;  %210 = vmatprep.subr.bf16.mxu0 %v243_v0 }
   0xb   :  { %232 = vmatpush3.bf16.msra.mxu1 %v238_v3  ;;  %211 = vmatpush3.bf16.msra.mxu0 %v238_v3 }
   0xc   :  { %229 = vmatprep.subr.bf16.mxu1 %v243_v0  ;;  %212 = vmatprep.subr.bf16.mxu0 %v243_v0 }
   0xf   :  { %233 = vmatpush3.bf16.msra.mxu1 %v239_v4  ;;  %213 = vmatpush3.bf16.msra.mxu0 %v239_v4 }
  0x12   :  { %219 = vmatmul.mubr.msk.bf16.vlgmr.msra.gmra.mrb[0].mxu1 %vm65_vm1, %v240_v5  ;;  %215 = vmatmul.mubr.msk.bf16.vlgmr.msra.gmra.mrb[0].mxu0 %vm65_vm1, %v241_v6 }
  0x13   :  { %222 = vmatprep.mubr.msk.bf16.mxu1 %vm244_vm0, %v243_v0 }
  0x1a   :  { %223 = vmatmul.mubr.msk.bf16.gmra.mrb[4].mxu1 %vm65_vm1, %v242_v7 }
  0xe5   :  { %v117_v8 = vpop.f32.mrb[0].mxu1  ;;  %v109_v9 = vpop.f32.mrb[0].mxu0 }
  0xe6   :  { %v220_v10 = vpop.f32.mrb[1].mxu1  ;;  %v216_v11 = vpop.f32.mrb[1].mxu0 }
  0xe7   :  { %v120_v12 = vpop.f32.mrb[2].mxu1  ;;  %v112_v13 = vpop.f32.mrb[2].mxu0 }
  0xe8   :  { %v196_v14 = vpack.c.bf16 %v120_v12, %v117_v8  ;;  %v221_v15 = vpop.f32.mrb[3].mxu1  ;;  %v191_v16 = vpack.c.bf16 %v112_v13, %v109_v9  ;;  %v217_v17 = vpop.f32.mrb[3].mxu0 }
  0xea   :  { %198 = vst [vmem:[%s298_s2 + $0x8] sm:$0xff] %v196_v14   ;;  %192 = vst [vmem:[%s298_s2] sm:$0xff] %v191_v16  }
  0xed   :  { %v125_v18 = vpop.f32.mrb[4].mxu1 }
  0xee   :  { %v186_v19 = vpack.c.bf16 %v125_v18, %v125_v18  ;;  %v224_v20 = vpop.f32.mrb[5].mxu1 }
  0xef   :  { %v128_v21 = vpop.f32.mrb[6].mxu1 }
  0xf0   :  { %160 = vst [vmem:[%s298_s2 + $0x10] sm:$0xf] %v186_v19  ;;  %v187_v22 = vpack.c.bf16 %v128_v21, %v128_v21  ;;  %v225_v23 = vpop.f32.mrb[7].mxu1 }
  0xf2   :  { %161 = vst [vmem:[%s298_s2 + $0x14] sm:$0x1] %v187_v22 }

// kernel: generator_forward.19
= control target key start
LH: loop header
LB: loop body
LE: loop exit
PB: predicated region body
PF: predicated region fallthrough
CT: control target
= control target key end

     0   :  { %s83_s0 = inlined_call_operand.vmem [shape: bf16[6,512], index: 0, kind: input, shape index: {}]   ;;  %s84_s1 = inlined_call_operand.vmem [shape: f32[1,128], index: 1, kind: input, shape index: {}]   ;;  %s85_s2 = inlined_call_operand.vmem [shape: f32[1,128], index: 2, kind: input, shape index: {}]   ;;  %s86_s3 = inlined_call_operand.vmem [shape: bf16[6,128], index: 3, kind: output, shape index: {}]  }
   0x1   :  { %v14_v0 = vld [vmem:[%s83_s0] sm:$0x77]  ;;  %v17_v1 = vld [vmem:[%s83_s0 + $0x8] sm:$0x77] }
   0x2   :  { %v15_v2 = vunpack.c.l.bf16 %v14_v0  ;;  %v16_v3 = vunpack.c.h.bf16 %v14_v0  ;;  %v18_v4 = vunpack.c.l.bf16 %v17_v1  ;;  %v19_v5 = vunpack.c.h.bf16 %v17_v1  ;;  %v46_v8 = vld [vmem:[%s84_s1] ss:$0 sm:$0xff] }
   0x3   :  { %v47_v10 = vld [vmem:[%s85_s2] ss:$0 sm:$0xff] }
   0x4   :  { %v20_v6 = vmax.f32 %v15_v2, %v18_v4  ;;  %v21_v7 = vmax.f32 %v16_v3, %v19_v5 }
   0x6   :  { %v22_v9 = vmax.f32 %v20_v6, %v21_v7 }
   0x8   :  { %v30_v11 = vmul.f32 %v46_v8, %v22_v9 }
   0xa   :  { %v38_v12 = vadd.f32 %v47_v10, %v30_v11 }
   0xc   :  { %v39_v13 = vmax.f32 %v38_v12, 0.0 }
   0xe   :  { %v40_v14 = vpack.c.bf16 %v39_v13, %v39_v13 }
  0x10   :  { %41 = vst [vmem:[%s86_s3] sm:$0x7] %v40_v14 }

// kernel: generator_forward.21
= control target key start
LH: loop header
LB: loop body
LE: loop exit
PB: predicated region body
PF: predicated region fallthrough
CT: control target
= control target key end

     0   :  { %v278_v1 = vmov 0   ;;  %s360_s1 = inlined_call_operand.vmem [shape: bf16[128,256], index: 1, kind: input, shape index: {}]   ;;  %s361_s0 = inlined_call_operand.vmem [shape: bf16[30,128], index: 0, kind: input, shape index: {}]   ;;  %s362_s2 = inlined_call_operand.vmem [shape: bf16[30,256], index: 2, kind: output, shape index: {}]  }
   0x1   :  { %v252_v0 = vld [vmem:[%s360_s1 + $0x4] ss:$8 sps:$4 sm:$0xff]   ;;  %156 = vmatprep.mubr.bf16.mxu0 %v278_v1  ;;  %166 = vmatprep.mubr.bf16.mxu1 %v278_v1  ;;  %v254_v2 = vld [vmem:[%s360_s1] ss:$8 sps:$4 sm:$0xff]   ;;  %v255_v3 = vld [vmem:[%s360_s1 + $0x14] ss:$8 sps:$4 sm:$0xff]  }
   0x2   :  { %124 = vmatprep.subr.bf16.mxu0 %v252_v0  ;;  %235 = vmatprep.subr.bf16.mxu1 %v252_v0  ;;  %v257_v4 = vld [vmem:[%s360_s1 + $0x10] ss:$8 sps:$4 sm:$0xff]   ;;  %v258_v5 = vld [vmem:[%s360_s1 + $0x24] ss:$8 sps:$4 sm:$0xff]   ;;  %v260_v6 = vld [vmem:[%s360_s1 + $0x20] ss:$8 sps:$4 sm:$0xff]  }
   0x3   :  { %125 = vmatpush1.bf16.msra.mxu0 %v254_v2  ;;  %243 = vmatpush1.bf16.msra.mxu1 %v254_v2  ;;  %v261_v7 = vld [vmem:[%s360_s1 + $0x34] ss:$8 sps:$4 sm:$0xff]   ;;  %v263_v8 = vld [vmem:[%s360_s1 + $0x30] ss:$8 sps:$4 sm:$0xff]   ;;  %v264_v9 = vld [vmem:[%s360_s1 + $0x44] ss:$8 sps:$4 sm:$0xff]  }
   0x4   :  { %126 = vmatprep.subr.bf16.mxu0 %v255_v3  ;;  %236 = vmatprep.subr.bf16.mxu1 %v255_v3  ;;  %v266_v10 = vld [vmem:[%s360_s1 + $0x40] ss:$8 sps:$4 sm:$0xff]   ;;  %v267_v11 = vld [vmem:[%s360_s1 + $0x54] ss:$8 sps:$4 sm:$0xff]   ;;  %v269_v12 = vld [vmem:[%s360_s1 + $0x50] ss:$8 sps:$4 sm:$0xff]  }
   0x5   :  { %v270_v13 = vld [vmem:[%s360_s1 + $0x64] ss:$8 sps:$4 sm:$0xff]   ;;  %v272_v14 = vld [vmem:[%s360_s1 + $0x60] ss:$8 sps:$4 sm:$0xff]   ;;  %v273_v15 = vld [vmem:[%s360_s1 + $0x74] ss:$8 sps:$4 sm:$0xff]  }
   0x6   :  { %v275_v16 = vld [vmem:[%s360_s1 + $0x70] ss:$8 sps:$4 sm:$0xff]   ;;  %v276_v17 = vld [vmem:[%s361_s0] sm:$0xff]   ;;  %v277_v18 = vld [vmem:[%s361_s0 + $0x8] sm:$0x7f]  }
   0x7   :  { %127 = vmatpush1.bf16.msra.mxu0 %v257_v4  ;;  %244 = vmatpush1.bf16.msra.mxu1 %v257_v4 }
   0x8   :  { %128 = vmatprep.subr.bf16.mxu0 %v258_v5  ;;  %237 = vmatprep.subr.bf16.mxu1 %v258_v5 }
   0xb   :  { %129 = vmatpush1.bf16.msra.mxu0 %v260_v6  ;;  %245 = vmatpush1.bf16.msra.mxu1 %v260_v6 }
   0xc   :  { %130 = vmatprep.subr.bf16.mxu0 %v261_v7  ;;  %238 = vmatprep.subr.bf16.mxu1 %v261_v7 }
   0xf   :  { %131 = vmatpush1.bf16.msra.mxu0 %v263_v8  ;;  %246 = vmatpush1.bf16.msra.mxu1 %v263_v8 }
  0x10   :  { %132 = vmatprep.subr.bf16.mxu0 %v264_v9  ;;  %239 = vmatprep.subr.bf16.mxu1 %v264_v9 }
  0x13   :  { %133 = vmatpush1.bf16.msra.mxu0 %v266_v10  ;;  %247 = vmatpush1.bf16.msra.mxu1 %v266_v10 }
  0x14   :  { %134 = vmatprep.subr.bf16.mxu0 %v267_v11  ;;  %240 = vmatprep.subr.bf16.mxu1 %v267_v11 }
  0x17   :  { %135 = vmatpush1.bf16.msra.mxu0 %v269_v12  ;;  %248 = vmatpush1.bf16.msra.mxu1 %v269_v12 }
  0x18   :  { %136 = vmatprep.subr.bf16.mxu0 %v270_v13  ;;  %241 = vmatprep.subr.bf16.mxu1 %v270_v13 }
  0x1b   :  { %137 = vmatpush1.bf16.msra.mxu0 %v272_v14  ;;  %249 = vmatpush1.bf16.msra.mxu1 %v272_v14 }
  0x1c   :  { %138 = vmatprep.subr.bf16.mxu0 %v273_v15  ;;  %242 = vmatprep.subr.bf16.mxu1 %v273_v15 }
  0x1f   :  { %139 = vmatpush1.bf16.msra.mxu0 %v275_v16  ;;  %250 = vmatpush1.bf16.msra.mxu1 %v275_v16 }
  0x22   :  { %157 = vmatmul.mubr.bf16.vlgmr.msra.gmra.mrb[0].mxu0 %v276_v17  ;;  %167 = vmatmul.mubr.bf16.vlgmr.msra.gmra.mrb[0].mxu1 %v277_v18 }
  0xf5   :  { %v158_v19 = vpop.f32.mrb[0].mxu0  ;;  %v168_v20 = vpop.f32.mrb[0].mxu1 }
  0xf6   :  { %v160_v21 = vpop.f32.mrb[1].mxu0  ;;  %v170_v22 = vpop.f32.mrb[1].mxu1 }
  0xf7   :  { %v231_v23 = vpack.c.bf16 %v160_v21, %v158_v19  ;;  %v233_v24 = vpack.c.bf16 %v170_v22, %v168_v20  ;;  %v162_v25 = vpop.f32.mrb[2].mxu0  ;;  %v172_v26 = vpop.f32.mrb[2].mxu1 }
  0xf8   :  { %v164_v27 = vpop.f32.mrb[3].mxu0  ;;  %v174_v28 = vpop.f32.mrb[3].mxu1 }
  0xf9   :  { %201 = vst [vmem:[%s362_s2] sm:$0xff] %v231_v23  ;;  %203 = vst [vmem:[%s362_s2 + $0x10] sm:$0xff] %v233_v24  ;;  %v232_v29 = vpack.c.bf16 %v164_v27, %v162_v25  ;;  %v234_v30 = vpack.c.bf16 %v174_v28, %v172_v26 }
  0xfb   :  { %202 = vst [vmem:[%s362_s2 + $0x8] sm:$0xff] %v232_v29  ;;  %204 = vst [vmem:[%s362_s2 + $0x18] sm:$0x77] %v234_v30 }

// kernel: generator_forward.22
= control target key start
LH: loop header
LB: loop body
LE: loop exit
PB: predicated region body
PF: predicated region fallthrough
CT: control target
= control target key end

     0   :  { %v25_v0 = vlaneseq  ;;  %s108_s0 = inlined_call_operand.vmem [shape: bf16[4,1024], index: 0, kind: input, shape index: {}]   ;;  %s109_s1 = inlined_call_operand.vmem [shape: f32[1,256], index: 1, kind: input, shape index: {}]   ;;  %s110_s2 = inlined_call_operand.vmem [shape: f32[1,256], index: 2, kind: input, shape index: {}]   ;;  %s111_s3 = inlined_call_operand.vmem [shape: bf16[4,256], index: 3, kind: output, shape index: {}]  }
   0x1   :  { %v14_v1 = vld [vmem:[%s108_s0] sm:$0xff]  ;;  %v17_v2 = vld [vmem:[%s108_s0 + $0x8] sm:$0xff] }
   0x2   :  { %v15_v3 = vunpack.c.l.bf16 %v14_v1  ;;  %v16_v4 = vunpack.c.h.bf16 %v14_v1  ;;  %v18_v5 = vunpack.c.l.bf16 %v17_v2  ;;  %v19_v6 = vunpack.c.h.bf16 %v17_v2  ;;  %v23_v10 = vld [vmem:[%s109_s1] sm:$0x3] }
   0x3   :  { %v26_v7 = vshrl.u32 %v25_v0, 7  ;;  %v36_v11 = vld [vmem:[%s110_s2] sm:$0x3] }
   0x4   :  { %v20_v8 = vmax.f32 %v15_v3, %v18_v5  ;;  %v21_v9 = vmax.f32 %v16_v4, %v19_v6 }
   0x5   :  { %v27_v12 = vsub.s32 0, %v26_v7  ;;  %v31_v13 = vsub.s32 1, %v26_v7 }
   0x6   :  { %v22_v14 = vmax.f32 %v20_v8, %v21_v9 }
   0x7   :  { %v28_v15 = vrot.slane %v23_v10, %v27_v12  ;;  %v32_v16 = vrot.slane %v23_v10, %v31_v13  ;;  %v41_v17 = vrot.slane %v36_v11, %v27_v12  ;;  %v45_v18 = vrot.slane %v36_v11, %v31_v13 }
   0x9   :  { %v33_v19 = vcombine.low %v28_v15, %v32_v16  ;;  %v46_v20 = vcombine.low %v41_v17, %v45_v18 }
   0xb   :  { %v35_v21 = vmul.f32 %v33_v19, %v22_v14 }
   0xd   :  { %v48_v22 = vadd.f32 %v46_v20, %v35_v21 }
   0xf   :  { %v49_v23 = vmax.f32 %v48_v22, 0.0 }
  0x11   :  { %v51_v24 = vcombine.high %v49_v23, %v49_v23 }
  0x13   :  { %v71_v25 = vpack.c.bf16 %v51_v24, %v49_v23 }
  0x15   :  { %72 = vst.sshfl [vmem:[%s111_s3] sm:$0x33 pattern:$0x76325410] %v71_v25 }

// kernel: generator_forward.23
= control target key start
LH: loop header
LB: loop body
LE: loop exit
PB: predicated region body
PF: predicated region fallthrough
CT: control target
= control target key end

     0   :  { %v633_v51 = vmov 1983009808   ;;  %v106_v53 = vlaneseq  ;;  %vm281_vm0 = vcmask 1041408   ;;  %vm636_vm1 = vmmov 0   ;;  %s908_s1 = inlined_call_operand.vmem [shape: f32[512,50], index: 1, kind: input, shape index: {}]   ;;  %s909_s0 = inlined_call_operand.vmem [shape: bf16[2,512], index: 0, kind: input, shape index: {}]   ;;  %s910_s3 = inlined_call_operand.vmem [shape: f32[50,5], index: 3, kind: input, shape index: {}]   ;;  %s911_s5 = inlined_call_operand.vmem [shape: f32[5,1], index: 5, kind: input, shape index: {}]   ;;  %s912_s2 = inlined_call_operand.vmem [shape: f32[1,50], index: 2, kind: input, shape index: {}]   ;;  %s913_s6 = inlined_call_operand.<no memory space> [shape: f32[1,1], index: 6, kind: input, shape index: {}]   ;;  %s914_s4 = inlined_call_operand.vmem [shape: f32[1,5], index: 4, kind: input, shape index: {}]   ;;  %s915_s7 = inlined_call_operand.vmem [shape: f32[2,1], index: 7, kind: output, shape index: {}]  }
   0x1   :  { %v46_v0 = vld [vmem:[%s908_s1 + $0x80] sm:$0xff]  ;;  %v47_v1 = vld [vmem:[%s908_s1 + $0x88] sm:$0xff]  ;;  %v48_v11 = vld [vmem:[%s908_s1 + $0x90] sm:$0xff]  ;;  %v104_v52 = vunpack.c.l.s4 %v633_v51  ;;  %vm367_vm2 = vcmask 1044480   ;;  %vm277_vm3 = vcmask 408576   ;;  %vm363_vm4 = vcmask 39936  }
   0x2   :  { %v30_v2 = vld [vmem:[%s908_s1] sm:$0xff]  ;;  %v556_v3 = vpack.c.bf16 %v47_v1, %v46_v0  ;;  %v31_v4 = vld [vmem:[%s908_s1 + $0x8] sm:$0xff]  ;;  %v49_v13 = vld [vmem:[%s908_s1 + $0x98] sm:$0xff]  ;;  %vm441_vm5 = vcmask 1024  }
   0x3   :  { %v78_v5 = vld [vmem:[%s908_s1 + $0x180] sm:$0xff]  ;;  %v79_v6 = vld [vmem:[%s908_s1 + $0x188] sm:$0xff]  ;;  %v558_v7 = vpack.c.bf16 %v31_v4, %v30_v2  ;;  %v32_v14 = vld [vmem:[%s908_s1 + $0x10] sm:$0xff]  ;;  %v560_v16 = vpack.c.bf16 %v49_v13, %v48_v11  ;;  %v105_v2 = vunpack.c.0.s8 %v104_v52 }
   0x4   :  { %v588_v8 = vpack.c.bf16 %v79_v6, %v78_v5  ;;  %v62_v9 = vld [vmem:[%s908_s1 + $0x100] sm:$0xff]  ;;  %v63_v10 = vld [vmem:[%s908_s1 + $0x108] sm:$0xff]  ;;  %557 = vmatprep.subr.bf16.mxu0 %v556_v3  ;;  %v33_v15 = vld [vmem:[%s908_s1 + $0x18] sm:$0xff]  ;;  %v107_v3 = vshrl.u32 %v106_v53, 7 }
   0x5   :  { %v590_v12 = vpack.c.bf16 %v63_v10, %v62_v9  ;;  %559 = vmatpush3.bf16.msra.mxu0 %v558_v7  ;;  %v562_v17 = vpack.c.bf16 %v33_v15, %v32_v14  ;;  %v80_v18 = vld [vmem:[%s908_s1 + $0x190] sm:$0xff]  ;;  %v81_v19 = vld [vmem:[%s908_s1 + $0x198] sm:$0xff]  ;;  %v50_v23 = vld [vmem:[%s908_s1 + $0xa0] sm:$0xff] }
   0x6   :  { %589 = vmatprep.subr.bf16.mxu1 %v588_v8  ;;  %v64_v20 = vld [vmem:[%s908_s1 + $0x110] sm:$0xff]  ;;  %v592_v21 = vpack.c.bf16 %v81_v19, %v80_v18  ;;  %v65_v22 = vld [vmem:[%s908_s1 + $0x118] sm:$0xff]  ;;  %v51_v24 = vld [vmem:[%s908_s1 + $0xa8] sm:$0xff]  ;;  %561 = vmatprep.subr.bf16.mxu0 %v560_v16 }
   0x7   :  { %591 = vmatpush3.bf16.msra.mxu1 %v590_v12  ;;  %v594_v25 = vpack.c.bf16 %v65_v22, %v64_v20  ;;  %v564_v26 = vpack.c.bf16 %v51_v24, %v50_v23  ;;  %v34_v27 = vld [vmem:[%s908_s1 + $0x20] sm:$0xff]  ;;  %v35_v28 = vld [vmem:[%s908_s1 + $0x28] sm:$0xff]  ;;  %v52_v35 = vld [vmem:[%s908_s1 + $0xb0] sm:$0xff] }
   0x8   :  { %v82_v29 = vld [vmem:[%s908_s1 + $0x1a0] sm:$0xff]  ;;  %593 = vmatprep.subr.bf16.mxu1 %v592_v21  ;;  %v83_v30 = vld [vmem:[%s908_s1 + $0x1a8] sm:$0xff]  ;;  %v566_v33 = vpack.c.bf16 %v35_v28, %v34_v27  ;;  %v53_v36 = vld [vmem:[%s908_s1 + $0xb8] sm:$0xff] }
   0x9   :  { %v66_v31 = vld [vmem:[%s908_s1 + $0x120] sm:$0xff]  ;;  %v67_v32 = vld [vmem:[%s908_s1 + $0x128] sm:$0xff]  ;;  %563 = vmatpush3.bf16.msra.mxu0 %v562_v17  ;;  %v596_v34 = vpack.c.bf16 %v83_v30, %v82_v29  ;;  %v36_v37 = vld [vmem:[%s908_s1 + $0x30] sm:$0xff]  ;;  %v568_v39 = vpack.c.bf16 %v53_v36, %v52_v35  ;;  %v108_v17 = vsub.s32 %v105_v2, %v107_v3  ;;  %v12_v3 = vstv %s913_s6 }
   0xa   :  { %565 = vmatprep.subr.bf16.mxu0 %v564_v26  ;;  %v598_v38 = vpack.c.bf16 %v67_v32, %v66_v31  ;;  %v37_v40 = vld [vmem:[%s908_s1 + $0x38] sm:$0xff]  ;;  %v84_v41 = vld [vmem:[%s908_s1 + $0x1b0] sm:$0xff]  ;;  %v54_v46 = vld [vmem:[%s908_s1 + $0xc0] sm:$0xff]  ;;  %13 = vst [vmem:[#allocation2] sm:$0x1] %v12_v3 }
   0xb   :  { %595 = vmatpush3.bf16.msra.mxu1 %v594_v25  ;;  %v85_v42 = vld [vmem:[%s908_s1 + $0x1b8] sm:$0xff]  ;;  %v68_v44 = vld [vmem:[%s908_s1 + $0x130] sm:$0xff]  ;;  %v55_v47 = vld [vmem:[%s908_s1 + $0xc8] sm:$0xff]  ;;  %v570_v48 = vpack.c.bf16 %v37_v40, %v36_v37 }
   0xc   :  { %597 = vmatprep.subr.bf16.mxu1 %v596_v34  ;;  %v600_v43 = vpack.c.bf16 %v85_v42, %v84_v41  ;;  %v69_v45 = vld [vmem:[%s908_s1 + $0x138] sm:$0xff]  ;;  %v86_v49 = vld [vmem:[%s908_s1 + $0x1c0] sm:$0xff]  ;;  %v87_v50 = vld [vmem:[%s908_s1 + $0x1c8] sm:$0xff]  ;;  %v572_v55 = vpack.c.bf16 %v55_v47, %v54_v46 }
   0xd   :  { %567 = vmatpush3.bf16.msra.mxu0 %v566_v33  ;;  %v602_v54 = vpack.c.bf16 %v69_v45, %v68_v44  ;;  %v38_v56 = vld [vmem:[%s908_s1 + $0x40] sm:$0xff]  ;;  %v39_v57 = vld [vmem:[%s908_s1 + $0x48] sm:$0xff]  ;;  %v604_v59 = vpack.c.bf16 %v87_v50, %v86_v49  ;;  %v56_v61 = vld [vmem:[%s908_s1 + $0xd0] sm:$0xff] }
   0xe   :  { %569 = vmatprep.subr.bf16.mxu0 %v568_v39  ;;  %v70_v58 = vld [vmem:[%s908_s1 + $0x140] sm:$0xff]  ;;  %v71_v60 = vld [vmem:[%s908_s1 + $0x148] sm:$0xff]  ;;  %v57_v62 = vld [vmem:[%s908_s1 + $0xd8] sm:$0xff]  ;;  %v574_v1 = vpack.c.bf16 %v39_v57, %v38_v56 }
   0xf   :  { %599 = vmatpush3.bf16.msra.mxu1 %v598_v38  ;;  %v88_v63 = vld [vmem:[%s908_s1 + $0x1d0] sm:$0xff]  ;;  %v89_v0 = vld [vmem:[%s908_s1 + $0x1d8] sm:$0xff]  ;;  %v606_v4 = vpack.c.bf16 %v71_v60, %v70_v58  ;;  %v576_v5 = vpack.c.bf16 %v57_v62, %v56_v61  ;;  %v58_v11 = vld [vmem:[%s908_s1 + $0xe0] sm:$0xff] }
  0x10   :  { %601 = vmatprep.subr.bf16.mxu1 %v600_v43  ;;  %v40_v6 = vld [vmem:[%s908_s1 + $0x50] sm:$0xff]  ;;  %v41_v7 = vld [vmem:[%s908_s1 + $0x58] sm:$0xff]  ;;  %v608_v9 = vpack.c.bf16 %v89_v0, %v88_v63  ;;  %v59_v12 = vld [vmem:[%s908_s1 + $0xe8] sm:$0xff] }
  0x11   :  { %571 = vmatpush3.bf16.msra.mxu0 %v570_v48  ;;  %v72_v8 = vld [vmem:[%s908_s1 + $0x150] sm:$0xff]  ;;  %v73_v10 = vld [vmem:[%s908_s1 + $0x158] sm:$0xff]  ;;  %v90_v13 = vld [vmem:[%s908_s1 + $0x1e0] sm:$0xff]  ;;  %v578_v15 = vpack.c.bf16 %v41_v7, %v40_v6  ;;  %v580_v19 = vpack.c.bf16 %v59_v12, %v58_v11  ;;  %v634_v48 = vmov 0.0|0.0  }
  0x12   :  { %573 = vmatprep.subr.bf16.mxu0 %v572_v55  ;;  %v91_v14 = vld [vmem:[%s908_s1 + $0x1e8] sm:$0xff]  ;;  %v42_v16 = vld [vmem:[%s908_s1 + $0x60] sm:$0xff]  ;;  %v610_v18 = vpack.c.bf16 %v73_v10, %v72_v8  ;;  %v60_v25 = vld [vmem:[%s908_s1 + $0xf0] sm:$0xff]  ;;  %v635_v55 = vmov 0.0  }
  0x13   :  { %603 = vmatpush3.bf16.msra.mxu1 %v602_v54  ;;  %v43_v20 = vld [vmem:[%s908_s1 + $0x68] sm:$0xff]  ;;  %v74_v21 = vld [vmem:[%s908_s1 + $0x160] sm:$0xff]  ;;  %v612_v23 = vpack.c.bf16 %v91_v14, %v90_v13  ;;  %v61_v26 = vld [vmem:[%s908_s1 + $0xf8] sm:$0xff] }
  0x14   :  { %605 = vmatprep.subr.bf16.mxu1 %v604_v59  ;;  %v28_v22 = vld [vmem:[%s909_s0] sm:$0xf]  ;;  %v75_v24 = vld [vmem:[%s908_s1 + $0x168] sm:$0xff]  ;;  %v92_v28 = vld [vmem:[%s908_s1 + $0x1f0] sm:$0xff]  ;;  %v582_v30 = vpack.c.bf16 %v43_v20, %v42_v16  ;;  %v584_v34 = vpack.c.bf16 %v61_v26, %v60_v25 }
  0x15   :  { %575 = vmatpush3.bf16.msra.mxu0 %v574_v1  ;;  %v29_v27 = vunpack.c.l.bf16 %v28_v22  ;;  %v93_v29 = vld [vmem:[%s908_s1 + $0x1f8] sm:$0xff]  ;;  %v614_v33 = vpack.c.bf16 %v75_v24, %v74_v21  ;;  %v44_v35 = vld [vmem:[%s908_s1 + $0x70] sm:$0xff]  ;;  %v263_v45 = vld [vmem:[%s910_s3] sm:$0xff] }
  0x16   :  { %577 = vmatprep.subr.bf16.mxu0 %v576_v5  ;;  %v45_v36 = vld [vmem:[%s908_s1 + $0x78] sm:$0xff]  ;;  %v616_v37 = vpack.c.bf16 %v93_v29, %v92_v28  ;;  %v76_v38 = vld [vmem:[%s908_s1 + $0x170] sm:$0xff]  ;;  %v264_v46 = vld [vmem:[%s910_s3 + $0x8] sm:$0xff] }
  0x17   :  { %607 = vmatpush3.bf16.msra.mxu1 %v606_v4  ;;  %v109_v31 = vrot.slane %v29_v27, %v108_v17  ;;  %v102_v32 = vcombine.high %v29_v27, %v29_v27  ;;  %v77_v39 = vld [vmem:[%s908_s1 + $0x178] sm:$0xff]  ;;  %v586_v42 = vpack.c.bf16 %v45_v36, %v44_v35  ;;  %v621_v47 = vpack.c.bf16 %v264_v46, %v263_v45  ;;  %v265_v49 = vld [vmem:[%s910_s3 + $0x10] sm:$0xff]  ;;  %v267_v52 = vld [vmem:[%s910_s3 + $0x20] sm:$0xff] }
  0x18   :  { %609 = vmatprep.subr.bf16.mxu1 %v608_v9  ;;  %v618_v44 = vpack.c.bf16 %v77_v39, %v76_v38  ;;  %v266_v50 = vld [vmem:[%s910_s3 + $0x18] sm:$0xff]  ;;  %v268_v53 = vld [vmem:[%s910_s3 + $0x28] sm:$0xff]  ;;  %v269_v56 = vld [vmem:[%s910_s3 + $0x30] sm:$0x3] }
  0x19   :  { %579 = vmatpush3.bf16.msra.mxu0 %v578_v15  ;;  %v117_v40 = vcombine.high %v109_v31, %v109_v31  ;;  %v116_v41 = vrot.slane %v102_v32, %v108_v17  ;;  %v624_v51 = vpack.c.bf16 %v266_v50, %v265_v49  ;;  %v627_v54 = vpack.c.bf16 %v268_v53, %v267_v52  ;;  %v355_v57 = vld [vmem:[%s911_s5] sm:$0x1f] }
  0x1a   :  { %581 = vmatprep.subr.bf16.mxu0 %v580_v19  ;;  %v447_v59 = vld [vmem:[%s912_s2] ss:$0 sm:$0xff] }
  0x1b   :  { %611 = vmatpush3.bf16.msra.mxu1 %v610_v18  ;;  %187 = vmatprep.mubr.f32.mxu0 %v117_v40  ;;  %v118_v43 = vcombine.high %v116_v41, %v116_v41  ;;  %v448_v4 = vld [vmem:[%s914_s4] ss:$0 sm:$0xff] }
  0x1c   :  { %613 = vmatprep.subr.bf16.mxu1 %v612_v23  ;;  %v451_v8 = vld [vmem:[#allocation2] ss:$0 sm:$0xff] }
  0x1d   :  { %583 = vmatpush3.bf16.msra.mxu0 %v582_v30  ;;  %257 = vmatprep.mubr.f32.mxu1 %v118_v43 }
  0x1e   :  { %585 = vmatprep.subr.bf16.mxu0 %v584_v34 }
  0x1f   :  { %615 = vmatpush3.bf16.msra.mxu1 %v614_v33 }
  0x20   :  { %617 = vmatprep.subr.bf16.mxu1 %v616_v37 }
  0x21   :  { %587 = vmatpush3.bf16.msra.mxu0 %v586_v42 }
  0x22   :  { %620 = vmatprep.subr.bf16.mxu0 %v634_v48 }
  0x23   :  { %619 = vmatpush3.bf16.msra.mxu1 %v618_v44 }
  0x24   :  { %188 = vmatmul.mubr.f32.vlgmr.msra.gmra.mrb[0].mxu0 %v109_v31  ;;  %551 = vmatprep.subr.mxu1 %v635_v55 }
  0x25   :  { %622 = vmatpush3.bf16.msra.mxu0 %v621_v47  ;;  %548 = vmatprep.mubr.msk.f32.mxu0 %vm636_vm1, %v635_v55 }
  0x26   :  { %258 = vmatmul.mubr.f32.vlgmr.msra.gmra.mrb[0].mxu1 %v116_v41  ;;  %623 = vmatprep.subr.bf16.mxu0 %v634_v48 }
  0x27   :  { %553 = vmatprep.mubr.msk.f32.mxu1 %vm636_vm1, %v635_v55  ;;  %552 = vmatpush3.msk.msra.mxu1 %vm367_vm2, %v355_v57 }
  0x29   :  { %625 = vmatpush3.bf16.msra.mxu0 %v624_v51 }
  0x2a   :  { %626 = vmatprep.subr.bf16.mxu0 %v634_v48 }
  0x2d   :  { %628 = vmatpush3.bf16.msra.mxu0 %v627_v54 }
  0x2e   :  { %546 = vmatprep.subr.mxu0 %v635_v55 }
  0x31   :  { %547 = vmatpush3.msk.msra.mxu0 %vm281_vm0, %v269_v56 }
  0xf7   :  { %v486_v58 = vpop.f32.mrb[0].mxu0 }
  0xf8   :  { %v487_v60 = vpop.f32.mrb[1].mxu0 }
  0xf9   :  { %v521_v61 = vpop.f32.mrb[0].mxu1  ;;  %v488_v62 = vadd.f32 %v487_v60, %v486_v58 }
  0xfa   :  { %v522_v63 = vpop.f32.mrb[1].mxu1 }
  0xfb   :  { %v523_v0 = vadd.f32 %v522_v63, %v521_v61  ;;  %v190_v1 = vadd.f32 %v488_v62, %v447_v59 }
  0xfd   :  { %v260_v2 = vadd.f32 %v523_v0, %v190_v1 }
  0xff   :  { %549 = vmatmul.mubr.msk.f32.vlgmr.msra.gmra.mrb[2].mxu0 %vm277_vm3, %v260_v2 }
 0x1d2   :  { %v351_v5 = vpop.f32.mrb[2].mxu0 }
 0x1d3   :  { %v352_v6 = vadd.f32 %v448_v4, %v351_v5  ;;  %v550_v7 = vpop.f32.mrb[3].mxu0 }
 0x1d5   :  { %554 = vmatmul.mubr.msk.f32.vlgmr.msra.gmra.mrb[2].mxu1 %vm363_vm4, %v352_v6 }
 0x2a8   :  { %v437_v9 = vpop.f32.mrb[2].mxu1 }
 0x2a9   :  { %v438_v10 = vadd.f32 %v451_v8, %v437_v9  ;;  %v555_v11 = vpop.f32.mrb[3].mxu1 }
 0x2ab   :  { %442 = vst.msk [vmem:[%s915_s7] sm:$0x3] %vm441_vm5, %v438_v10 }

// kernel: generator_forward.20
= control target key start
LH: loop header
LB: loop body
LE: loop exit
PB: predicated region body
PF: predicated region fallthrough
CT: control target
= control target key end

     0   :  { %v498_v3 = vmov 0.0|0.0   ;;  %vm499_vm0 = vmmov 0   ;;  %v500_v8 = vmov 0.0   ;;  %v501_v27 = vmov 1983009808   ;;  %s708_s1 = inlined_call_operand.vmem [shape: f32[384,10], index: 1, kind: input, shape index: {}]   ;;  %s709_s0 = inlined_call_operand.vmem [shape: bf16[2,384], index: 0, kind: input, shape index: {}]   ;;  %s710_s3 = inlined_call_operand.vmem [shape: f32[10,1], index: 3, kind: input, shape index: {}]   ;;  %s711_s4 = inlined_call_operand.<no memory space> [shape: f32[1,1], index: 4, kind: input, shape index: {}]   ;;  %s712_s2 = inlined_call_operand.vmem [shape: f32[1,10], index: 2, kind: input, shape index: {}]   ;;  %s713_s5 = inlined_call_operand.vmem [shape: f32[2,1], index: 5, kind: output, shape index: {}]  }
   0x1   :  { %v40_v0 = vld [vmem:[%s708_s1 + $0x80] sm:$0xff]  ;;  %v41_v1 = vld [vmem:[%s708_s1 + $0x88] sm:$0xff]  ;;  %465 = vmatprep.subr.bf16.mxu1 %v498_v3  ;;  %v42_v6 = vld [vmem:[%s708_s1 + $0x90] sm:$0xff]  ;;  %423 = vmatprep.mubr.msk.f32.mxu1 %vm499_vm0, %v500_v8  ;;  %v82_v28 = vunpack.c.l.s4 %v501_v27  ;;  %v84_v29 = vlaneseq  ;;  %vm252_vm1 = vcmask 1041408   ;;  %vm502_vm2 = vmmov 1  }
   0x2   :  { %v24_v2 = vld [vmem:[%s708_s1] sm:$0xff]  ;;  %v433_v4 = vpack.c.bf16 %v41_v1, %v40_v0  ;;  %v25_v5 = vld [vmem:[%s708_s1 + $0x8] sm:$0xff]  ;;  %v43_v7 = vld [vmem:[%s708_s1 + $0x98] sm:$0xff]  ;;  %vm248_vm4 = vcmask 80896   ;;  %vm326_vm5 = vcmask 1024  }
   0x3   :  { %v435_v9 = vpack.c.bf16 %v25_v5, %v24_v2  ;;  %v437_v10 = vpack.c.bf16 %v43_v7, %v42_v6  ;;  %v26_v11 = vld [vmem:[%s708_s1 + $0x10] sm:$0xff]  ;;  %v27_v12 = vld [vmem:[%s708_s1 + $0x18] sm:$0xff]  ;;  %v56_v13 = vld [vmem:[%s708_s1 + $0x100] sm:$0xff]  ;;  %v83_v39 = vunpack.c.0.s8 %v82_v28  ;;  %v85_v40 = vshrl.u32 %v84_v29, 7 }
   0x4   :  { %434 = vmatprep.subr.bf16.mxu0 %v433_v4  ;;  %v57_v14 = vld [vmem:[%s708_s1 + $0x108] sm:$0xff]  ;;  %v44_v15 = vld [vmem:[%s708_s1 + $0xa0] sm:$0xff]  ;;  %v439_v17 = vpack.c.bf16 %v27_v12, %v26_v11  ;;  %v58_v19 = vld [vmem:[%s708_s1 + $0x110] sm:$0xff] }
   0x5   :  { %v45_v16 = vld [vmem:[%s708_s1 + $0xa8] sm:$0xff]  ;;  %436 = vmatpush3.bf16.msra.mxu0 %v435_v9  ;;  %v466_v18 = vpack.c.bf16 %v57_v14, %v56_v13  ;;  %v28_v21 = vld [vmem:[%s708_s1 + $0x20] sm:$0xff]  ;;  %v59_v23 = vld [vmem:[%s708_s1 + $0x118] sm:$0xff]  ;;  %v86_v50 = vsub.s32 %v83_v39, %v85_v40 }
   0x6   :  { %438 = vmatprep.subr.bf16.mxu0 %v437_v10  ;;  %v441_v20 = vpack.c.bf16 %v45_v16, %v44_v15  ;;  %v29_v22 = vld [vmem:[%s708_s1 + $0x28] sm:$0xff]  ;;  %v469_v24 = vpack.c.bf16 %v59_v23, %v58_v19  ;;  %v46_v25 = vld [vmem:[%s708_s1 + $0xb0] sm:$0xff]  ;;  %v47_v26 = vld [vmem:[%s708_s1 + $0xb8] sm:$0xff] }
   0x7   :  { %467 = vmatpush3.bf16.msra.mxu1 %v466_v18  ;;  %v60_v30 = vld [vmem:[%s708_s1 + $0x120] sm:$0xff]  ;;  %v61_v31 = vld [vmem:[%s708_s1 + $0x128] sm:$0xff]  ;;  %v443_v32 = vpack.c.bf16 %v29_v22, %v28_v21  ;;  %v445_v33 = vpack.c.bf16 %v47_v26, %v46_v25  ;;  %v30_v34 = vld [vmem:[%s708_s1 + $0x30] sm:$0xff] }
   0x8   :  { %468 = vmatprep.subr.bf16.mxu1 %v498_v3  ;;  %v31_v35 = vld [vmem:[%s708_s1 + $0x38] sm:$0xff]  ;;  %v472_v36 = vpack.c.bf16 %v61_v31, %v60_v30  ;;  %v48_v37 = vld [vmem:[%s708_s1 + $0xc0] sm:$0xff]  ;;  %v49_v38 = vld [vmem:[%s708_s1 + $0xc8] sm:$0xff] }
   0x9   :  { %440 = vmatpush3.bf16.msra.mxu0 %v439_v17  ;;  %v62_v41 = vld [vmem:[%s708_s1 + $0x130] sm:$0xff]  ;;  %v63_v42 = vld [vmem:[%s708_s1 + $0x138] sm:$0xff]  ;;  %v447_v43 = vpack.c.bf16 %v31_v35, %v30_v34  ;;  %v449_v44 = vpack.c.bf16 %v49_v38, %v48_v37  ;;  %v32_v45 = vld [vmem:[%s708_s1 + $0x40] sm:$0xff] }
   0xa   :  { %442 = vmatprep.subr.bf16.mxu0 %v441_v20  ;;  %v33_v46 = vld [vmem:[%s708_s1 + $0x48] sm:$0xff]  ;;  %v475_v47 = vpack.c.bf16 %v63_v42, %v62_v41  ;;  %v50_v48 = vld [vmem:[%s708_s1 + $0xd0] sm:$0xff]  ;;  %v51_v49 = vld [vmem:[%s708_s1 + $0xd8] sm:$0xff] }
   0xb   :  { %470 = vmatpush3.bf16.msra.mxu1 %v469_v24  ;;  %v64_v51 = vld [vmem:[%s708_s1 + $0x140] sm:$0xff]  ;;  %v65_v52 = vld [vmem:[%s708_s1 + $0x148] sm:$0xff]  ;;  %v451_v54 = vpack.c.bf16 %v33_v46, %v32_v45  ;;  %v453_v56 = vpack.c.bf16 %v51_v49, %v50_v48  ;;  %v34_v57 = vld [vmem:[%s708_s1 + $0x50] sm:$0xff] }
   0xc   :  { %471 = vmatprep.subr.bf16.mxu1 %v498_v3  ;;  %v22_v53 = vld [vmem:[%s709_s0] sm:$0x7]  ;;  %v35_v58 = vld [vmem:[%s708_s1 + $0x58] sm:$0xff]  ;;  %v478_v59 = vpack.c.bf16 %v65_v52, %v64_v51  ;;  %v53_v61 = vld [vmem:[%s708_s1 + $0xe8] sm:$0xff] }
   0xd   :  { %444 = vmatpush3.bf16.msra.mxu0 %v443_v32  ;;  %v23_v55 = vunpack.c.l.bf16 %v22_v53  ;;  %v52_v60 = vld [vmem:[%s708_s1 + $0xe0] sm:$0xff]  ;;  %v66_v63 = vld [vmem:[%s708_s1 + $0x150] sm:$0xff]  ;;  %v67_v0 = vld [vmem:[%s708_s1 + $0x158] sm:$0xff]  ;;  %v455_v1 = vpack.c.bf16 %v35_v58, %v34_v57 }
   0xe   :  { %446 = vmatprep.subr.bf16.mxu0 %v445_v33  ;;  %v457_v4 = vpack.c.bf16 %v53_v61, %v52_v60  ;;  %v36_v5 = vld [vmem:[%s708_s1 + $0x60] sm:$0xff]  ;;  %v37_v6 = vld [vmem:[%s708_s1 + $0x68] sm:$0xff]  ;;  %v481_v7 = vpack.c.bf16 %v67_v0, %v66_v63  ;;  %v54_v9 = vld [vmem:[%s708_s1 + $0xf0] sm:$0xff] }
   0xf   :  { %473 = vmatpush3.bf16.msra.mxu1 %v472_v36  ;;  %v87_v62 = vrot.slane %v23_v55, %v86_v50  ;;  %v55_v10 = vld [vmem:[%s708_s1 + $0xf8] sm:$0xff]  ;;  %v68_v11 = vld [vmem:[%s708_s1 + $0x160] sm:$0xff]  ;;  %v69_v12 = vld [vmem:[%s708_s1 + $0x168] sm:$0xff]  ;;  %v459_v13 = vpack.c.bf16 %v37_v6, %v36_v5  ;;  %v80_v21 = vcombine.high %v23_v55, %v23_v55 }
  0x10   :  { %474 = vmatprep.subr.bf16.mxu1 %v498_v3  ;;  %v461_v14 = vpack.c.bf16 %v55_v10, %v54_v9  ;;  %v38_v15 = vld [vmem:[%s708_s1 + $0x70] sm:$0xff]  ;;  %v39_v16 = vld [vmem:[%s708_s1 + $0x78] sm:$0xff]  ;;  %v484_v17 = vpack.c.bf16 %v69_v12, %v68_v11  ;;  %v239_v24 = vld [vmem:[%s710_s3] sm:$0xff] }
  0x11   :  { %448 = vmatpush3.bf16.msra.mxu0 %v447_v43  ;;  %v95_v2 = vcombine.high %v87_v62, %v87_v62  ;;  %v70_v18 = vld [vmem:[%s708_s1 + $0x170] sm:$0xff]  ;;  %v71_v19 = vld [vmem:[%s708_s1 + $0x178] sm:$0xff]  ;;  %v463_v20 = vpack.c.bf16 %v39_v16, %v38_v15  ;;  %v94_v23 = vrot.slane %v80_v21, %v86_v50  ;;  %v240_v25 = vld [vmem:[%s710_s3 + $0x8] sm:$0x3] }
  0x12   :  { %450 = vmatprep.subr.bf16.mxu0 %v449_v44  ;;  %v487_v22 = vpack.c.bf16 %v71_v19, %v70_v18  ;;  %v490_v26 = vpack.c.bf16 %v240_v25, %v239_v24  ;;  %vm491_vm3 = vmpackc.low %vm252_vm1, %vm502_vm2  ;;  %v332_v28 = vld [vmem:[%s712_s2] ss:$0 sm:$0xff] }
  0x13   :  { %476 = vmatpush3.bf16.msra.mxu1 %v475_v47  ;;  %163 = vmatprep.mubr.f32.mxu0 %v95_v2 }
  0x14   :  { %477 = vmatprep.subr.bf16.mxu1 %v498_v3 }
  0x15   :  { %452 = vmatpush3.bf16.msra.mxu0 %v451_v54 }
  0x16   :  { %454 = vmatprep.subr.bf16.mxu0 %v453_v56 }
  0x17   :  { %479 = vmatpush3.bf16.msra.mxu1 %v478_v59 }
  0x18   :  { %480 = vmatprep.subr.bf16.mxu1 %v498_v3 }
  0x19   :  { %456 = vmatpush3.bf16.msra.mxu0 %v455_v1 }
  0x1a   :  { %458 = vmatprep.subr.bf16.mxu0 %v457_v4 }
  0x1b   :  { %482 = vmatpush3.bf16.msra.mxu1 %v481_v7 }
  0x1c   :  { %483 = vmatprep.subr.bf16.mxu1 %v498_v3 }
  0x1d   :  { %460 = vmatpush3.bf16.msra.mxu0 %v459_v13 }
  0x1e   :  { %462 = vmatprep.subr.bf16.mxu0 %v461_v14 }
  0x1f   :  { %485 = vmatpush3.bf16.msra.mxu1 %v484_v17 }
  0x20   :  { %486 = vmatprep.subr.bf16.mxu1 %v498_v3 }
  0x21   :  { %464 = vmatpush3.bf16.msra.mxu0 %v463_v20 }
  0x22   :  { %489 = vmatprep.subr.bf16.mxu0 %v498_v3  ;;  %v10_v3 = vstv %s711_s4 }
  0x23   :  { %488 = vmatpush3.bf16.msra.mxu1 %v487_v22  ;;  %11 = vst [vmem:[#allocation2] sm:$0x1] %v10_v3 }
  0x24   :  { %164 = vmatmul.mubr.f32.vlgmr.msra.gmra.mrb[0].mxu0 %v87_v62 }
  0x25   :  { %430 = vmatprep.mubr.msk.f32.mxu0 %vm499_vm0, %v500_v8  ;;  %492 = vmatpush3.bf16.msk.msra.mxu0 %vm491_vm3, %v490_v26 }
  0x26   :  { %424 = vmatmul.mubr.f32.vlgmr.msra.gmra.mrb[0].mxu1 %v94_v23 }
  0x2a   :  { %v333_v34 = vld [vmem:[#allocation2] ss:$0 sm:$0xff] }
  0xf7   :  { %v368_v8 = vpop.f32.mrb[0].mxu0 }
  0xf8   :  { %v369_v27 = vpop.f32.mrb[1].mxu0 }
  0xf9   :  { %v370_v29 = vadd.f32 %v369_v27, %v368_v8  ;;  %v235_v30 = vpop.f32.mrb[0].mxu1 }
  0xfa   :  { %v425_v31 = vpop.f32.mrb[1].mxu1 }
  0xfb   :  { %v166_v32 = vadd.f32 %v370_v29, %v332_v28 }
  0xfd   :  { %v236_v33 = vadd.f32 %v235_v30, %v166_v32 }
  0xff   :  { %431 = vmatmul.mubr.msk.f32.vlgmr.msra.gmra.mrb[2].mxu0 %vm248_vm4, %v236_v33 }
 0x1d2   :  { %v322_v35 = vpop.f32.mrb[2].mxu0 }
 0x1d3   :  { %v323_v36 = vadd.f32 %v333_v34, %v322_v35  ;;  %v432_v37 = vpop.f32.mrb[3].mxu0 }
 0x1d5   :  { %327 = vst.msk [vmem:[%s713_s5] sm:$0x3] %vm326_vm5, %v323_v36 }

// kernel: generator_forward.17
= control target key start
LH: loop header
LB: loop body
LE: loop exit
PB: predicated region body
PF: predicated region fallthrough
CT: control target
= control target key end

     0   :  { %v457_v3 = vmov 0.0|0.0   ;;  %vm458_vm0 = vmmov 0   ;;  %v459_v8 = vmov 0.0   ;;  %v460_v15 = vmov 1983009808   ;;  %s639_s1 = inlined_call_operand.vmem [shape: f32[320,10], index: 1, kind: input, shape index: {}]   ;;  %s640_s0 = inlined_call_operand.vmem [shape: bf16[2,320], index: 0, kind: input, shape index: {}]   ;;  %s641_s3 = inlined_call_operand.vmem [shape: f32[10,1], index: 3, kind: input, shape index: {}]   ;;  %s642_s4 = inlined_call_operand.<no memory space> [shape: f32[1,1], index: 4, kind: input, shape index: {}]   ;;  %s643_s2 = inlined_call_operand.vmem [shape: f32[1,10], index: 2, kind: input, shape index: {}]   ;;  %s644_s5 = inlined_call_operand.vmem [shape: f32[2,1], index: 5, kind: output, shape index: {}]  }
   0x1   :  { %v40_v0 = vld [vmem:[%s639_s1 + $0x80] sm:$0xff]  ;;  %v41_v1 = vld [vmem:[%s639_s1 + $0x88] sm:$0xff]  ;;  %436 = vmatprep.subr.bf16.mxu1 %v457_v3  ;;  %v42_v6 = vld [vmem:[%s639_s1 + $0x90] sm:$0xff]  ;;  %394 = vmatprep.mubr.msk.f32.mxu1 %vm458_vm0, %v459_v8  ;;  %v74_v16 = vunpack.c.l.s4 %v460_v15  ;;  %v76_v17 = vlaneseq  ;;  %vm90_vm1 = vcmask 523264   ;;  %vm246_vm2 = vcmask 1041408  }
   0x2   :  { %v24_v2 = vld [vmem:[%s639_s1] sm:$0xff]  ;;  %v404_v4 = vpack.c.bf16 %v41_v1, %v40_v0  ;;  %v25_v5 = vld [vmem:[%s639_s1 + $0x8] sm:$0xff]  ;;  %v43_v7 = vld [vmem:[%s639_s1 + $0x98] sm:$0xff]  ;;  %vm461_vm3 = vmmov 1   ;;  %vm242_vm5 = vcmask 80896   ;;  %vm320_vm6 = vcmask 1024  }
   0x3   :  { %v406_v9 = vpack.c.bf16 %v25_v5, %v24_v2  ;;  %v408_v10 = vpack.c.bf16 %v43_v7, %v42_v6  ;;  %v26_v11 = vld [vmem:[%s639_s1 + $0x10] sm:$0xff]  ;;  %v27_v12 = vld [vmem:[%s639_s1 + $0x18] sm:$0xff]  ;;  %v44_v13 = vld [vmem:[%s639_s1 + $0xa0] sm:$0xff]  ;;  %v75_v24 = vunpack.c.0.s8 %v74_v16  ;;  %v77_v25 = vshrl.u32 %v76_v17, 7 }
   0x4   :  { %405 = vmatprep.subr.bf16.mxu0 %v404_v4  ;;  %v45_v14 = vld [vmem:[%s639_s1 + $0xa8] sm:$0xff]  ;;  %v410_v18 = vpack.c.bf16 %v27_v12, %v26_v11  ;;  %v28_v20 = vld [vmem:[%s639_s1 + $0x20] sm:$0xff]  ;;  %v46_v22 = vld [vmem:[%s639_s1 + $0xb0] sm:$0xff] }
   0x5   :  { %407 = vmatpush3.bf16.msra.mxu0 %v406_v9  ;;  %v412_v19 = vpack.c.bf16 %v45_v14, %v44_v13  ;;  %v29_v21 = vld [vmem:[%s639_s1 + $0x28] sm:$0xff]  ;;  %v47_v23 = vld [vmem:[%s639_s1 + $0xb8] sm:$0xff]  ;;  %v56_v27 = vld [vmem:[%s639_s1 + $0x100] sm:$0xff]  ;;  %v78_v38 = vsub.s32 %v75_v24, %v77_v25 }
   0x6   :  { %409 = vmatprep.subr.bf16.mxu0 %v408_v10  ;;  %v414_v26 = vpack.c.bf16 %v29_v21, %v28_v20  ;;  %v57_v28 = vld [vmem:[%s639_s1 + $0x108] sm:$0xff]  ;;  %v416_v29 = vpack.c.bf16 %v47_v23, %v46_v22  ;;  %v30_v30 = vld [vmem:[%s639_s1 + $0x30] sm:$0xff]  ;;  %v31_v31 = vld [vmem:[%s639_s1 + $0x38] sm:$0xff] }
   0x7   :  { %v48_v32 = vld [vmem:[%s639_s1 + $0xc0] sm:$0xff]  ;;  %v437_v33 = vpack.c.bf16 %v57_v28, %v56_v27  ;;  %v49_v34 = vld [vmem:[%s639_s1 + $0xc8] sm:$0xff]  ;;  %v58_v35 = vld [vmem:[%s639_s1 + $0x110] sm:$0xff]  ;;  %v418_v39 = vpack.c.bf16 %v31_v31, %v30_v30 }
   0x8   :  { %v59_v36 = vld [vmem:[%s639_s1 + $0x118] sm:$0xff]  ;;  %v60_v40 = vld [vmem:[%s639_s1 + $0x120] sm:$0xff]  ;;  %v61_v41 = vld [vmem:[%s639_s1 + $0x128] sm:$0xff]  ;;  %v420_v43 = vpack.c.bf16 %v49_v34, %v48_v32 }
   0x9   :  { %411 = vmatpush3.bf16.msra.mxu0 %v410_v18  ;;  %438 = vmatpush3.bf16.msra.mxu1 %v437_v33  ;;  %v440_v37 = vpack.c.bf16 %v59_v36, %v58_v35  ;;  %v22_v42 = vld [vmem:[%s640_s0] sm:$0x7]  ;;  %v33_v45 = vld [vmem:[%s639_s1 + $0x48] sm:$0xff]  ;;  %v50_v47 = vld [vmem:[%s639_s1 + $0xd0] sm:$0xff]  ;;  %v443_v49 = vpack.c.bf16 %v61_v41, %v60_v40 }
   0xa   :  { %413 = vmatprep.subr.bf16.mxu0 %v412_v19  ;;  %439 = vmatprep.subr.bf16.mxu1 %v457_v3  ;;  %v32_v44 = vld [vmem:[%s639_s1 + $0x40] sm:$0xff]  ;;  %v23_v46 = vunpack.c.l.bf16 %v22_v42  ;;  %v51_v48 = vld [vmem:[%s639_s1 + $0xd8] sm:$0xff]  ;;  %v62_v52 = vld [vmem:[%s639_s1 + $0x130] sm:$0xff] }
   0xb   :  { %v422_v51 = vpack.c.bf16 %v33_v45, %v32_v44  ;;  %v63_v53 = vld [vmem:[%s639_s1 + $0x138] sm:$0xff]  ;;  %v424_v54 = vpack.c.bf16 %v51_v48, %v50_v47  ;;  %v34_v55 = vld [vmem:[%s639_s1 + $0x50] sm:$0xff]  ;;  %v52_v58 = vld [vmem:[%s639_s1 + $0xe0] sm:$0xff] }
   0xc   :  { %v79_v50 = vrot.slane %v23_v46, %v78_v38  ;;  %v35_v56 = vld [vmem:[%s639_s1 + $0x58] sm:$0xff]  ;;  %v53_v59 = vld [vmem:[%s639_s1 + $0xe8] sm:$0xff]  ;;  %v72_v60 = vcombine.high %v23_v46, %v23_v46  ;;  %v446_v61 = vpack.c.bf16 %v63_v53, %v62_v52  ;;  %v36_v0 = vld [vmem:[%s639_s1 + $0x60] sm:$0xff] }
   0xd   :  { %415 = vmatpush3.bf16.msra.mxu0 %v414_v26  ;;  %441 = vmatpush3.bf16.msra.mxu1 %v440_v37  ;;  %v426_v62 = vpack.c.bf16 %v35_v56, %v34_v55  ;;  %v428_v63 = vpack.c.bf16 %v53_v59, %v52_v58  ;;  %v37_v1 = vld [vmem:[%s639_s1 + $0x68] sm:$0xff]  ;;  %v54_v2 = vld [vmem:[%s639_s1 + $0xf0] sm:$0xff]  ;;  %v55_v4 = vld [vmem:[%s639_s1 + $0xf8] sm:$0xff] }
   0xe   :  { %417 = vmatprep.subr.bf16.mxu0 %v416_v29  ;;  %442 = vmatprep.subr.bf16.mxu1 %v457_v3  ;;  %v87_v57 = vcombine.high %v79_v50, %v79_v50  ;;  %v86_v5 = vrot.slane %v72_v60, %v78_v38  ;;  %v430_v6 = vpack.c.bf16 %v37_v1, %v36_v0  ;;  %v38_v9 = vld [vmem:[%s639_s1 + $0x70] sm:$0xff]  ;;  %v39_v10 = vld [vmem:[%s639_s1 + $0x78] sm:$0xff]  ;;  %v234_v12 = vld [vmem:[%s641_s3 + $0x8] sm:$0x3] }
   0xf   :  { %v432_v7 = vpack.c.bf16 %v55_v4, %v54_v2  ;;  %v434_v11 = vpack.c.bf16 %v39_v10, %v38_v9  ;;  %vm450_vm4 = vmpackc.low %vm246_vm2, %vm461_vm3  ;;  %v326_v18 = vld [vmem:[%s643_s2] ss:$0 sm:$0xff] }
  0x10   :  { %157 = vmatprep.mubr.f32.mxu0 %v87_v57 }
  0x11   :  { %419 = vmatpush3.bf16.msra.mxu0 %v418_v39  ;;  %444 = vmatpush3.bf16.msra.mxu1 %v443_v49 }
  0x12   :  { %421 = vmatprep.subr.bf16.mxu0 %v420_v43  ;;  %445 = vmatprep.subr.bf16.mxu1 %v457_v3 }
  0x15   :  { %423 = vmatpush3.bf16.msra.mxu0 %v422_v51  ;;  %447 = vmatpush3.bf16.msra.mxu1 %v446_v61 }
  0x16   :  { %425 = vmatprep.subr.bf16.mxu0 %v424_v54  ;;  %448 = vmatprep.subr.bf16.mxu1 %v457_v3  ;;  %v233_v3 = vld [vmem:[%s641_s3] sm:$0xff] }
  0x17   :  { %v449_v13 = vpack.c.bf16 %v234_v12, %v233_v3 }
  0x18   :  { %395 = vmatmul.mubr.msk.f32.vlgmr.msra.gmra.mrb[0].mxu1 %vm90_vm1, %v86_v5 }
  0x19   :  { %427 = vmatpush3.bf16.msra.mxu0 %v426_v62  ;;  %401 = vmatprep.mubr.msk.f32.mxu1 %vm458_vm0, %v459_v8  ;;  %v10_v8 = vstv %s642_s4 }
  0x1a   :  { %429 = vmatprep.subr.bf16.mxu0 %v428_v63  ;;  %451 = vmatpush3.bf16.msk.msra.mxu1 %vm450_vm4, %v449_v13  ;;  %11 = vst [vmem:[#allocation2] sm:$0x1] %v10_v8 }
  0x1d   :  { %431 = vmatpush3.bf16.msra.mxu0 %v430_v6 }
  0x1e   :  { %433 = vmatprep.subr.bf16.mxu0 %v432_v7 }
  0x21   :  { %435 = vmatpush3.bf16.msra.mxu0 %v434_v11  ;;  %v328_v22 = vld [vmem:[#allocation2] ss:$0 sm:$0xff] }
  0x24   :  { %158 = vmatmul.mubr.f32.vlgmr.msra.gmra.mrb[0].mxu0 %v79_v50 }
  0xeb   :  { %v229_v14 = vpop.f32.mrb[0].mxu1 }
  0xec   :  { %v396_v15 = vpop.f32.mrb[1].mxu1 }
  0xf7   :  { %v363_v16 = vpop.f32.mrb[0].mxu0 }
  0xf8   :  { %v364_v17 = vpop.f32.mrb[1].mxu0 }
  0xf9   :  { %v365_v19 = vadd.f32 %v364_v17, %v363_v16 }
  0xfb   :  { %v160_v20 = vadd.f32 %v365_v19, %v326_v18 }
  0xfd   :  { %v230_v21 = vadd.f32 %v229_v14, %v160_v20 }
  0xff   :  { %402 = vmatmul.mubr.msk.f32.vlgmr.msra.gmra.mrb[2].mxu1 %vm242_vm5, %v230_v21 }
 0x1d2   :  { %v316_v23 = vpop.f32.mrb[2].mxu1 }
 0x1d3   :  { %v317_v24 = vadd.f32 %v328_v22, %v316_v23  ;;  %v403_v25 = vpop.f32.mrb[3].mxu1 }
 0x1d5   :  { %321 = vst.msk [vmem:[%s644_s5] sm:$0x3] %vm320_vm6, %v317_v24 }

</bundles_post_ra>
